<compile_context>
chip_gen: v5e
topology: v5e:2x2
jax: 0.10.0
libtpu: 0.0.40
codegen_flags: <defaults>
</compile_context>

<pallas_src>
import math
from functools import partial

import jax
import jax.numpy as jnp
from jax import lax
from jax.experimental import pallas as pl
from jax.experimental.pallas import tpu as pltpu


def _round_up(x, m):
    return ((x + m - 1) // m) * m


def _pick_tile(total, candidates=(64, 32, 16, 8)):
    for c in candidates:
        if total % c == 0:
            return c
    return 8


# ----------------------------------------------------------------------------
# Pallas kernels
# ----------------------------------------------------------------------------
def _fused_conv_kernel(p1_ref, w1_ref, b1_ref, w2_ref, b2_ref, o_ref, y1_ref,
                       *, ow1, tail):
    """Fused conv1(3x3,s2)+ReLU+conv2(3x3,s1)+ReLU on a tile of whole frames.

    p1_ref : (Mb, K1)    bf16  conv1 im2col patches, Mb = ft * P_pad
    w1_ref : (K1, nf)    bf16  (K1 = 9*Cin zero-padded, /255 folded in)
    b1_ref : (1, nf)     f32
    w2_ref : (9*nf, nf)  bf16  rows in (kh, kw, cin) order
    b2_ref : (1, nf)     f32
    o_ref  : (Mb, nf)    bf16  conv2 output at EVERY conv1 position; positions
                               with h >= oh2 or w >= ow2 (and per-frame pad
                               rows) are junk and get zero fc-weight rows.
    y1_ref : (Mb+tail, nf) f32 VMEM scratch for conv1 output (+ zero tail).
    """
    Mb, nf = o_ref.shape

    # conv1: one MXU matmul, bias + ReLU in f32 on the VPU, stash in scratch.
    y1 = jnp.dot(p1_ref[...], w1_ref[...], preferred_element_type=jnp.float32)
    y1_ref[pl.ds(0, Mb), :] = jnp.maximum(y1 + b1_ref[...], 0.0)
    # Zero tail every step (scratch is per-core; safe under "parallel").
    y1_ref[pl.ds(Mb, tail), :] = jnp.zeros((tail, nf), jnp.float32)

    # conv2: nine accumulating K=nf matmuls against sublane-shifted scratch
    # reads (no lane concat, no 9x im2col intermediate). Row r = f*P_pad +
    # h*ow1 + w; its (kh, kw) tap is row r + kh*ow1 + kw. Valid outputs never
    # cross a frame boundary; the zero tail only feeds discarded positions.
    acc = None
    for kh in range(3):
        for kw in range(3):
            off = kh * ow1 + kw
            tap = y1_ref[pl.ds(off, Mb), :].astype(jnp.bfloat16)
            w = w2_ref[pl.ds((kh * 3 + kw) * nf, nf), :]
            d = jnp.dot(tap, w, preferred_element_type=jnp.float32)
            acc = d if acc is None else acc + d

    o_ref[...] = jnp.maximum(acc + b2_ref[...], 0.0).astype(o_ref.dtype)


def _head_kernel(x_ref, v_ref, b_ref, g_ref, beta_ref, o_ref, acc_ref):
    """fc (delta folded into the weight) + LayerNorm + tanh, K tiled per frame.

    x_ref   : (BT, KT)  bf16  per-frame conv features (junk positions included)
    v_ref   : (KT, OUT) bf16  folded fc weight block (zero rows at junk pos.)
    b/g/beta: (1, OUT)  f32
    o_ref   : (BT, OUT) f32
    acc_ref : (BT, OUT) f32 VMEM accumulator (resident across the K axis)
    """
    k = pl.program_id(1)

    @pl.when(k == 0)
    def _():
        acc_ref[...] = jnp.zeros_like(acc_ref)

    acc_ref[...] += jnp.dot(x_ref[...], v_ref[...],
                            preferred_element_type=jnp.float32)

    @pl.when(k == pl.num_programs(1) - 1)
    def _():
        y = acc_ref[...] + b_ref[...]
        mu = jnp.mean(y, axis=-1, keepdims=True)
        var = jnp.mean(jnp.square(y - mu), axis=-1, keepdims=True)
        yn = (y - mu) * lax.rsqrt(var + 1e-5)
        o_ref[...] = jnp.tanh(yn * g_ref[...] + beta_ref[...])


# ----------------------------------------------------------------------------
# pallas_call wrappers
# ----------------------------------------------------------------------------
def _fused_conv(p1, w1, b1, w2, b2, *, rows_per_block, ow1, tail):
    Mtot, K1 = p1.shape
    nf = w1.shape[1]
    return pl.pallas_call(
        partial(_fused_conv_kernel, ow1=ow1, tail=tail),
        out_shape=jax.ShapeDtypeStruct((Mtot, nf), jnp.bfloat16),
        grid=(Mtot // rows_per_block,),
        in_specs=[
            pl.BlockSpec((rows_per_block, K1), lambda i: (i, 0)),
            pl.BlockSpec((K1, nf), lambda i: (0, 0)),
            pl.BlockSpec((1, nf), lambda i: (0, 0)),
            pl.BlockSpec((9 * nf, nf), lambda i: (0, 0)),
            pl.BlockSpec((1, nf), lambda i: (0, 0)),
        ],
        out_specs=pl.BlockSpec((rows_per_block, nf), lambda i: (i, 0)),
        scratch_shapes=[pltpu.VMEM((rows_per_block + tail, nf), jnp.float32)],
        compiler_params=pltpu.CompilerParams(
            dimension_semantics=("parallel",)),
    )(p1, w1, b1.reshape(1, -1), w2, b2.reshape(1, -1))


def _head(feat, v_head, fc_b, ln_g, ln_b, *, k_tile, batch_tile):
    b_pad, Kh = feat.shape
    OUT = v_head.shape[1]
    return pl.pallas_call(
        _head_kernel,
        out_shape=jax.ShapeDtypeStruct((b_pad, OUT), jnp.float32),
        grid=(b_pad // batch_tile, Kh // k_tile),
        in_specs=[
            pl.BlockSpec((batch_tile, k_tile), lambda i, k: (i, k)),
            pl.BlockSpec((k_tile, OUT), lambda i, k: (k, 0)),
            pl.BlockSpec((1, OUT), lambda i, k: (0, 0)),
            pl.BlockSpec((1, OUT), lambda i, k: (0, 0)),
            pl.BlockSpec((1, OUT), lambda i, k: (0, 0)),
        ],
        out_specs=pl.BlockSpec((batch_tile, OUT), lambda i, k: (i, 0)),
        scratch_shapes=[pltpu.VMEM((batch_tile, OUT), jnp.float32)],
        compiler_params=pltpu.CompilerParams(
            dimension_semantics=("parallel", "arbitrary")),
    )(feat, v_head, fc_b.reshape(1, -1), ln_g.reshape(1, -1),
      ln_b.reshape(1, -1))


# ----------------------------------------------------------------------------
# Glue: conv1 im2col (bf16), parameter prep (torch layouts -> kernel layouts)
# ----------------------------------------------------------------------------
def _im2col_s2(x_nhwc, oh, ow):
    """x:(N,H,W,C) -> (N, oh, ow, 9*C) stride-2 3x3 patches, (kh, kw, c) order."""
    cols = []
    for kh in range(3):
        for kw in range(3):
            cols.append(x_nhwc[:, kh:kh + 2 * (oh - 1) + 1:2,
                               kw:kw + 2 * (ow - 1) + 1:2, :])
    p = jnp.stack(cols, axis=3)                     # (N, oh, ow, 9, C)
    N, C = p.shape[0], p.shape[-1]
    return p.reshape(N, oh, ow, 9 * C)


def _flatten_torch_conv_weight(w_oihw):
    """(Cout, Cin, kh, kw) -> (kh*kw*Cin, Cout), matching im2col column order."""
    return jnp.transpose(w_oihw, (2, 3, 1, 0)).reshape(-1, w_oihw.shape[0])


def init_params(key, obs_shape, feature_dim, num_filters=32, image_channel=3):
    """Deterministic parameter init mirroring the module's shapes."""
    C, H, W = obs_shape
    time_step = C // image_channel
    oh1 = (H - 3) // 2 + 1
    out_dim = oh1 - 2                                # stride-1 3x3 conv
    fc_in = num_filters * out_dim * out_dim * (2 * time_step - 2)

    ks = jax.random.split(key, 6)

    def u(k, shape, fan_in):
        b = 1.0 / math.sqrt(fan_in)
        return jax.random.uniform(k, shape, jnp.float32, -b, b)

    params = {
        # torch Conv2d weight layout (Cout, Cin, kh, kw)
        "conv0_w": u(ks[0], (num_filters, image_channel, 3, 3), image_channel * 9),
        "conv0_b": u(ks[1], (num_filters,), image_channel * 9),
        "conv1_w": u(ks[2], (num_filters, num_filters, 3, 3), num_filters * 9),
        "conv1_b": u(ks[3], (num_filters,), num_filters * 9),
        # torch Linear weight layout (out, in)
        "fc_w": u(ks[4], (feature_dim, fc_in), fc_in),
        "fc_b": u(ks[5], (feature_dim,), fc_in),
        "ln_g": jnp.ones((feature_dim,), jnp.float32),
        "ln_b": jnp.zeros((feature_dim,), jnp.float32),
    }
    # Note: with num_layers=2 the module also builds convs[2], but the forward
    # pass never uses it, so it is omitted here.
    return params, dict(time_step=time_step, out_dim=out_dim,
                        num_filters=num_filters, image_channel=image_channel)


def prepare_params(params, meta):
    """One-time (outside jit) layout / dtype prep of the torch-style params."""
    ic = meta["image_channel"]
    nf = meta["num_filters"]
    od = meta["out_dim"]
    T = meta["time_step"]
    OUT = params["fc_b"].shape[0]

    oh2 = ow2 = od
    oh1 = ow1 = od + 2
    P = oh1 * ow1
    P_pad = _round_up(P, 8)

    k1 = 9 * ic
    k1p = _round_up(k1, 8)                           # pad conv1 K (27 -> 32)
    w1 = _flatten_torch_conv_weight(params["conv0_w"])          # (k1, nf) f32
    w1 = jnp.pad(w1, ((0, k1p - k1), (0, 0)))
    w2 = _flatten_torch_conv_weight(params["conv1_w"]).astype(jnp.bfloat16)

    # Fold the temporal delta + concat into the fc weight:
    #   fc(h) = sum_i cur_i@Wc_i + (cur_i - prev_i)@Wd_i = sum_t x_t @ V_t
    #   V_t   = [t>=1](Wc_{t-1} + Wd_{t-1}) - [t<=T-2] Wd_t
    # torch fc input order per block is (c, h, w); kernels produce (h, w, c);
    # junk conv positions (h>=oh2, w>=ow2, per-frame pad rows) get zero rows.
    wf = params["fc_w"].reshape(OUT, 2 * (T - 1), nf, oh2, ow2)
    wf = jnp.transpose(wf, (1, 3, 4, 2, 0))          # (2(T-1), oh2, ow2, nf, OUT)
    wc, wd = wf[:T - 1], wf[T - 1:]
    v = jnp.zeros((T, oh2, ow2, nf, OUT), jnp.float32)
    v = v.at[1:].add(wc + wd)
    v = v.at[:T - 1].add(-wd)
    v_full = jnp.zeros((T, oh1, ow1, nf, OUT), jnp.float32)
    v_full = v_full.at[:, :oh2, :ow2].set(v)
    v_full = v_full.reshape(T, P, nf, OUT)
    v_full = jnp.pad(v_full, ((0, 0), (0, P_pad - P), (0, 0), (0, 0)))
    v_head = v_full.reshape(T * P_pad * nf, OUT).astype(jnp.bfloat16)

    return {
        "w1_flat": w1,                    # f32 (scaled per-call by the /255 fold)
        "b1": params["conv0_b"],
        "w2_flat": w2,
        "b2": params["conv1_b"],
        "v_head": v_head,
        "fc_b": params["fc_b"],
        "ln_g": params["ln_g"],
        "ln_b": params["ln_b"],
    }


# ----------------------------------------------------------------------------
# Full forward
# ----------------------------------------------------------------------------
@partial(jax.jit, static_argnames=("image_channel",))
def pixel_delta_encoder_forward(obs, prep, image_channel=3):
    """obs: (B, T*image_channel, H, W) float32 NCHW, like the torch module."""
    B, C, H, W = obs.shape
    T = C // image_channel
    nf = prep["b1"].shape[0]
    K1p = prep["w1_flat"].shape[0]

    oh1, ow1 = (H - 3) // 2 + 1, (W - 3) // 2 + 1
    P = oh1 * ow1
    P_pad = _round_up(P, 8)

    # `if obs.max() > 1.0: obs = obs / 255.0` -> fold the scale into the tiny
    # conv1 weight instead of an extra elementwise pass over obs in HBM.
    # TODO(synk): the full-tensor jnp.max(obs) reduction is still an XLA pass.
    scale = jnp.where(jnp.max(obs) > 1.0, 1.0 / 255.0, 1.0).astype(jnp.float32)
    w1 = (prep["w1_flat"] * scale).astype(jnp.bfloat16)

    b_pad = _round_up(B, 8)
    n = b_pad * T                                     # frames (multiple of 8)

    # (B, T*ic, H, W) -> frames NHWC, bf16 BEFORE im2col; pad the frame axis so
    # padded frames belong to padded batch rows (dropped at the very end).
    x = obs.reshape(B * T, image_channel, H, W).transpose(0, 2, 3, 1)
    x = x.astype(jnp.bfloat16)
    x = jnp.pad(x, ((0, n - B * T), (0, 0), (0, 0), (0, 0)))

    # conv1 im2col only (small); conv2 patches are built inside the kernel.
    # Per-frame positions padded P -> P_pad (multiple of 8) for aligned tiling.
    p1 = _im2col_s2(x, oh1, ow1).reshape(n, P, 9 * image_channel)
    p1 = jnp.pad(p1, ((0, 0), (0, P_pad - P), (0, K1p - 9 * image_channel)))
    p1 = p1.reshape(n * P_pad, K1p)

    ft = 8                                            # frames per conv grid step
    tail = _round_up(2 * ow1 + 2, 8)
    y2 = _fused_conv(p1, w1, prep["b1"], prep["w2_flat"], prep["b2"],
                     rows_per_block=ft * P_pad, ow1=ow1, tail=tail)

    # No compaction pass: the conv output slab feeds the head directly via a
    # free row-major reshape; junk positions have zero rows in v_head.
    # TODO(synk): a lane-dense (block-diagonal packed) conv layout would make
    # the 32-lane conv stores unmasked; left as a follow-up.
    feat = y2.reshape(b_pad, T * P_pad * nf)

    bt = _pick_tile(b_pad)
    out = _head(feat, prep["v_head"], prep["fc_b"], prep["ln_g"], prep["ln_b"],
                k_tile=P_pad * nf, batch_tile=bt)
    return out[:B]


# ----------------------------------------------------------------------------
# Pure-JAX reference (mirrors the PyTorch forward) for a sanity check.
# ----------------------------------------------------------------------------
def reference_forward(obs, params, image_channel=3):
    B, C, H, W = obs.shape
    T = C // image_channel
    scale = jnp.where(jnp.max(obs) > 1.0, 1.0 / 255.0, 1.0)
    x = obs.astype(jnp.float32) * scale
    x = x.reshape(B * T, image_channel, H, W)
    dn = ("NCHW", "OIHW", "NCHW")
    y = lax.conv_general_dilated(x, params["conv0_w"], (2, 2), "VALID",
                                 dimension_numbers=dn,
                                 precision=lax.Precision.HIGHEST)
    y = jnp.maximum(y + params["conv0_b"][None, :, None, None], 0.0)
    y = lax.conv_general_dilated(y, params["conv1_w"], (1, 1), "VALID",
                                 dimension_numbers=dn,
                                 precision=lax.Precision.HIGHEST)
    y = jnp.maximum(y + params["conv1_b"][None, :, None, None], 0.0)
    nf, oh, ow = y.shape[1], y.shape[2], y.shape[3]
    y = y.reshape(B, T, nf, oh, ow)
    cur = y[:, 1:]
    delta = cur - y[:, :T - 1]
    h = jnp.concatenate([cur, delta], axis=1).reshape(B, -1)
    fc = jnp.dot(h, params["fc_w"].T, precision=lax.Precision.HIGHEST) + params["fc_b"]
    mu = fc.mean(-1, keepdims=True)
    var = jnp.square(fc - mu).mean(-1, keepdims=True)
    ln = (fc - mu) / jnp.sqrt(var + 1e-5) * params["ln_g"] + params["ln_b"]
    return jnp.tanh(ln)


if __name__ == "__main__":
    # Small shapes: obs_shape=(9,16,16) -> image_channel=3, time_step=3,
    # conv output dim = 5, fc input = 32*5*5*(2*3-2) = 3200, feature_dim = 32.
    B, obs_shape, feature_dim = 2, (9, 16, 16), 32

    key = jax.random.PRNGKey(0)
    k_obs, k_par = jax.random.split(key)
    obs = jax.random.uniform(k_obs, (B,) + obs_shape, jnp.float32, 0.0, 255.0)

    params, meta = init_params(k_par, obs_shape, feature_dim)
    prep = prepare_params(params, meta)

    out = pixel_delta_encoder_forward(obs, prep, image_channel=3)
    out = jax.block_until_ready(out)
    assert out.shape == (B, feature_dim)

    ref = reference_forward(obs, params)
    max_err = float(jnp.max(jnp.abs(out - ref)))
    mean_err = float(jnp.mean(jnp.abs(out - ref)))
    # bf16 MXU operands (f32 accumulation) through two convs + fc + LayerNorm
    # leave ~1e-2-level differences after tanh; also gate the mean error so the
    # loose max gate cannot hide weight-permutation bugs.
    assert max_err < 1e-1 and mean_err < 3e-2, \
        f"mismatch vs reference: max={max_err} mean={mean_err}"

    print("KERNEL_OK")
</pallas_src>

<mosaic_0001>
module attributes {stable_mosaic.version = 11 : i64} {
  func.func @_fused_conv_kernel(%arg0: i32, %arg1: memref<448x32xbf16, #tpu.memory_space<vmem>>, %arg2: memref<32x32xbf16, #tpu.memory_space<vmem>>, %arg3: memref<1x32xf32, #tpu.memory_space<vmem>>, %arg4: memref<288x32xbf16, #tpu.memory_space<vmem>>, %arg5: memref<1x32xf32, #tpu.memory_space<vmem>>, %arg6: memref<448x32xbf16, #tpu.memory_space<vmem>>, %arg7: memref<464x32xf32, #tpu.memory_space<vmem>>) attributes {dimension_semantics = [#tpu.dimension_semantics<parallel>], iteration_bounds = array<i64: 3>, scalar_prefetch = 0 : i64, scratch_operands = 1 : i64, tpu.core_type = #tpu.core_type<tc>, window_params = [{transform_indices = @transform_0, window_bounds = array<i64: 448, 32>}, {pipeline_mode = #tpu.pipeline_mode<synchronous>, transform_indices = @transform_1, window_bounds = array<i64: 32, 32>}, {pipeline_mode = #tpu.pipeline_mode<synchronous>, transform_indices = @transform_2, window_bounds = array<i64: 1, 32>}, {pipeline_mode = #tpu.pipeline_mode<synchronous>, transform_indices = @transform_3, window_bounds = array<i64: 288, 32>}, {pipeline_mode = #tpu.pipeline_mode<synchronous>, transform_indices = @transform_4, window_bounds = array<i64: 1, 32>}, {transform_indices = @transform_5, window_bounds = array<i64: 448, 32>}]} {
    %c0 = arith.constant 0 : index
    %c0_0 = arith.constant 0 : index
    %0 = vector.load %arg1[%c0, %c0_0] : memref<448x32xbf16, #tpu.memory_space<vmem>>, vector<448x32xbf16>
    %c0_1 = arith.constant 0 : index
    %c0_2 = arith.constant 0 : index
    %1 = vector.load %arg2[%c0_1, %c0_2] : memref<32x32xbf16, #tpu.memory_space<vmem>>, vector<32x32xbf16>
    %cst = arith.constant dense<0.000000e+00> : vector<448x32xf32>
    %2 = tpu.matmul %0, %1, %cst {dimension_numbers = #tpu.dot_dimension_numbers<[1], [0], [0], [1], [0, 0, 1, 1], [], []>} : vector<448x32xbf16>, vector<32x32xbf16>, vector<448x32xf32> -> vector<448x32xf32>
    %c0_3 = arith.constant 0 : index
    %c0_4 = arith.constant 0 : index
    %3 = vector.load %arg3[%c0_3, %c0_4] : memref<1x32xf32, #tpu.memory_space<vmem>>, vector<1x32xf32>
    %4 = vector.broadcast %3 : vector<1x32xf32> to vector<448x32xf32>
    %5 = arith.addf %2, %4 : vector<448x32xf32>
    %cst_5 = arith.constant 0.000000e+00 : f32
    %6 = vector.broadcast %cst_5 : f32 to vector<448x32xf32>
    %7 = arith.maximumf %5, %6 : vector<448x32xf32>
    %c0_6 = arith.constant 0 : index
    %c0_7 = arith.constant 0 : index
    %8 = vector.load %arg7[%c0_6, %c0_7] : memref<464x32xf32, #tpu.memory_space<vmem>>, vector<448x32xf32>
    tpu.vector_store %arg7[%c0_6, %c0_7], %7 {strides = array<i32>} : memref<464x32xf32, #tpu.memory_space<vmem>>, vector<448x32xf32>,
    %cst_8 = arith.constant 0.000000e+00 : f32
    %9 = vector.broadcast %cst_8 : f32 to vector<16x32xf32>
    %c448 = arith.constant 448 : index
    %c0_9 = arith.constant 0 : index
    %10 = vector.load %arg7[%c448, %c0_9] : memref<464x32xf32, #tpu.memory_space<vmem>>, vector<16x32xf32>
    tpu.vector_store %arg7[%c448, %c0_9], %9 {strides = array<i32>} : memref<464x32xf32, #tpu.memory_space<vmem>>, vector<16x32xf32>,
    %c0_10 = arith.constant 0 : index
    %c0_11 = arith.constant 0 : index
    %11 = vector.load %arg7[%c0_10, %c0_11] : memref<464x32xf32, #tpu.memory_space<vmem>>, vector<448x32xf32>
    %12 = arith.truncf %11 : vector<448x32xf32> to vector<448x32xbf16>
    %c0_12 = arith.constant 0 : index
    %c0_13 = arith.constant 0 : index
    %13 = vector.load %arg4[%c0_12, %c0_13] : memref<288x32xbf16, #tpu.memory_space<vmem>>, vector<32x32xbf16>
    %cst_14 = arith.constant dense<0.000000e+00> : vector<448x32xf32>
    %14 = tpu.matmul %12, %13, %cst_14 {dimension_numbers = #tpu.dot_dimension_numbers<[1], [0], [0], [1], [0, 0, 1, 1], [], []>} : vector<448x32xbf16>, vector<32x32xbf16>, vector<448x32xf32> -> vector<448x32xf32>
    %c1 = arith.constant 1 : index
    %c0_15 = arith.constant 0 : index
    %15 = vector.load %arg7[%c1, %c0_15] : memref<464x32xf32, #tpu.memory_space<vmem>>, vector<448x32xf32>
    %16 = arith.truncf %15 : vector<448x32xf32> to vector<448x32xbf16>
    %c32 = arith.constant 32 : index
    %c0_16 = arith.constant 0 : index
    %17 = vector.load %arg4[%c32, %c0_16] : memref<288x32xbf16, #tpu.memory_space<vmem>>, vector<32x32xbf16>
    %cst_17 = arith.constant dense<0.000000e+00> : vector<448x32xf32>
    %18 = tpu.matmul %16, %17, %cst_17 {dimension_numbers = #tpu.dot_dimension_numbers<[1], [0], [0], [1], [0, 0, 1, 1], [], []>} : vector<448x32xbf16>, vector<32x32xbf16>, vector<448x32xf32> -> vector<448x32xf32>
    %19 = arith.addf %14, %18 : vector<448x32xf32>
    %c2 = arith.constant 2 : index
    %c0_18 = arith.constant 0 : index
    %20 = vector.load %arg7[%c2, %c0_18] : memref<464x32xf32, #tpu.memory_space<vmem>>, vector<448x32xf32>
    %21 = arith.truncf %20 : vector<448x32xf32> to vector<448x32xbf16>
    %c64 = arith.constant 64 : index
    %c0_19 = arith.constant 0 : index
    %22 = vector.load %arg4[%c64, %c0_19] : memref<288x32xbf16, #tpu.memory_space<vmem>>, vector<32x32xbf16>
    %cst_20 = arith.constant dense<0.000000e+00> : vector<448x32xf32>
    %23 = tpu.matmul %21, %22, %cst_20 {dimension_numbers = #tpu.dot_dimension_numbers<[1], [0], [0], [1], [0, 0, 1, 1], [], []>} : vector<448x32xbf16>, vector<32x32xbf16>, vector<448x32xf32> -> vector<448x32xf32>
    %24 = arith.addf %19, %23 : vector<448x32xf32>
    %c7 = arith.constant 7 : index
    %c0_21 = arith.constant 0 : index
    %25 = vector.load %arg7[%c7, %c0_21] : memref<464x32xf32, #tpu.memory_space<vmem>>, vector<448x32xf32>
    %26 = arith.truncf %25 : vector<448x32xf32> to vector<448x32xbf16>
    %c96 = arith.constant 96 : index
    %c0_22 = arith.constant 0 : index
    %27 = vector.load %arg4[%c96, %c0_22] : memref<288x32xbf16, #tpu.memory_space<vmem>>, vector<32x32xbf16>
    %cst_23 = arith.constant dense<0.000000e+00> : vector<448x32xf32>
    %28 = tpu.matmul %26, %27, %cst_23 {dimension_numbers = #tpu.dot_dimension_numbers<[1], [0], [0], [1], [0, 0, 1, 1], [], []>} : vector<448x32xbf16>, vector<32x32xbf16>, vector<448x32xf32> -> vector<448x32xf32>
    %29 = arith.addf %24, %28 : vector<448x32xf32>
    %c8 = arith.constant 8 : index
    %c0_24 = arith.constant 0 : index
    %30 = vector.load %arg7[%c8, %c0_24] : memref<464x32xf32, #tpu.memory_space<vmem>>, vector<448x32xf32>
    %31 = arith.truncf %30 : vector<448x32xf32> to vector<448x32xbf16>
    %c128 = arith.constant 128 : index
    %c0_25 = arith.constant 0 : index
    %32 = vector.load %arg4[%c128, %c0_25] : memref<288x32xbf16, #tpu.memory_space<vmem>>, vector<32x32xbf16>
    %cst_26 = arith.constant dense<0.000000e+00> : vector<448x32xf32>
    %33 = tpu.matmul %31, %32, %cst_26 {dimension_numbers = #tpu.dot_dimension_numbers<[1], [0], [0], [1], [0, 0, 1, 1], [], []>} : vector<448x32xbf16>, vector<32x32xbf16>, vector<448x32xf32> -> vector<448x32xf32>
    %34 = arith.addf %29, %33 : vector<448x32xf32>
    %c9 = arith.constant 9 : index
    %c0_27 = arith.constant 0 : index
    %35 = vector.load %arg7[%c9, %c0_27] : memref<464x32xf32, #tpu.memory_space<vmem>>, vector<448x32xf32>
    %36 = arith.truncf %35 : vector<448x32xf32> to vector<448x32xbf16>
    %c160 = arith.constant 160 : index
    %c0_28 = arith.constant 0 : index
    %37 = vector.load %arg4[%c160, %c0_28] : memref<288x32xbf16, #tpu.memory_space<vmem>>, vector<32x32xbf16>
    %cst_29 = arith.constant dense<0.000000e+00> : vector<448x32xf32>
    %38 = tpu.matmul %36, %37, %cst_29 {dimension_numbers = #tpu.dot_dimension_numbers<[1], [0], [0], [1], [0, 0, 1, 1], [], []>} : vector<448x32xbf16>, vector<32x32xbf16>, vector<448x32xf32> -> vector<448x32xf32>
    %39 = arith.addf %34, %38 : vector<448x32xf32>
    %c14 = arith.constant 14 : index
    %c0_30 = arith.constant 0 : index
    %40 = vector.load %arg7[%c14, %c0_30] : memref<464x32xf32, #tpu.memory_space<vmem>>, vector<448x32xf32>
    %41 = arith.truncf %40 : vector<448x32xf32> to vector<448x32xbf16>
    %c192 = arith.constant 192 : index
    %c0_31 = arith.constant 0 : index
    %42 = vector.load %arg4[%c192, %c0_31] : memref<288x32xbf16, #tpu.memory_space<vmem>>, vector<32x32xbf16>
    %cst_32 = arith.constant dense<0.000000e+00> : vector<448x32xf32>
    %43 = tpu.matmul %41, %42, %cst_32 {dimension_numbers = #tpu.dot_dimension_numbers<[1], [0], [0], [1], [0, 0, 1, 1], [], []>} : vector<448x32xbf16>, vector<32x32xbf16>, vector<448x32xf32> -> vector<448x32xf32>
    %44 = arith.addf %39, %43 : vector<448x32xf32>
    %c15 = arith.constant 15 : index
    %c0_33 = arith.constant 0 : index
    %45 = vector.load %arg7[%c15, %c0_33] : memref<464x32xf32, #tpu.memory_space<vmem>>, vector<448x32xf32>
    %46 = arith.truncf %45 : vector<448x32xf32> to vector<448x32xbf16>
    %c224 = arith.constant 224 : index
    %c0_34 = arith.constant 0 : index
    %47 = vector.load %arg4[%c224, %c0_34] : memref<288x32xbf16, #tpu.memory_space<vmem>>, vector<32x32xbf16>
    %cst_35 = arith.constant dense<0.000000e+00> : vector<448x32xf32>
    %48 = tpu.matmul %46, %47, %cst_35 {dimension_numbers = #tpu.dot_dimension_numbers<[1], [0], [0], [1], [0, 0, 1, 1], [], []>} : vector<448x32xbf16>, vector<32x32xbf16>, vector<448x32xf32> -> vector<448x32xf32>
    %49 = arith.addf %44, %48 : vector<448x32xf32>
    %c16 = arith.constant 16 : index
    %c0_36 = arith.constant 0 : index
    %50 = vector.load %arg7[%c16, %c0_36] : memref<464x32xf32, #tpu.memory_space<vmem>>, vector<448x32xf32>
    %51 = arith.truncf %50 : vector<448x32xf32> to vector<448x32xbf16>
    %c256 = arith.constant 256 : index
    %c0_37 = arith.constant 0 : index
    %52 = vector.load %arg4[%c256, %c0_37] : memref<288x32xbf16, #tpu.memory_space<vmem>>, vector<32x32xbf16>
    %cst_38 = arith.constant dense<0.000000e+00> : vector<448x32xf32>
    %53 = tpu.matmul %51, %52, %cst_38 {dimension_numbers = #tpu.dot_dimension_numbers<[1], [0], [0], [1], [0, 0, 1, 1], [], []>} : vector<448x32xbf16>, vector<32x32xbf16>, vector<448x32xf32> -> vector<448x32xf32>
    %54 = arith.addf %49, %53 : vector<448x32xf32>
    %c0_39 = arith.constant 0 : index
    %c0_40 = arith.constant 0 : index
    %55 = vector.load %arg5[%c0_39, %c0_40] : memref<1x32xf32, #tpu.memory_space<vmem>>, vector<1x32xf32>
    %56 = vector.broadcast %55 : vector<1x32xf32> to vector<448x32xf32>
    %57 = arith.addf %54, %56 : vector<448x32xf32>
    %cst_41 = arith.constant 0.000000e+00 : f32
    %58 = vector.broadcast %cst_41 : f32 to vector<448x32xf32>
    %59 = arith.maximumf %57, %58 : vector<448x32xf32>
    %60 = arith.truncf %59 : vector<448x32xf32> to vector<448x32xbf16>
    %c0_42 = arith.constant 0 : index
    %c0_43 = arith.constant 0 : index
    %61 = vector.load %arg6[%c0_42, %c0_43] : memref<448x32xbf16, #tpu.memory_space<vmem>>, vector<448x32xbf16>
    tpu.vector_store %arg6[%c0_42, %c0_43], %60 {strides = array<i32>} : memref<448x32xbf16, #tpu.memory_space<vmem>>, vector<448x32xbf16>,
    return
  }
  func.func @transform_0(%arg0: i32) -> (i32, i32) {
    %c0_i32 = arith.constant 0 : i32
    %c0_i32_0 = arith.constant 0 : i32
    return %arg0, %c0_i32 : i32, i32
  }
  func.func @transform_1(%arg0: i32) -> (i32, i32) {
    %c0_i32 = arith.constant 0 : i32
    %c0_i32_0 = arith.constant 0 : i32
    %c0_i32_1 = arith.constant 0 : i32
    return %c0_i32, %c0_i32_0 : i32, i32
  }
  func.func @transform_2(%arg0: i32) -> (i32, i32) {
    %c0_i32 = arith.constant 0 : i32
    %c0_i32_0 = arith.constant 0 : i32
    %c0_i32_1 = arith.constant 0 : i32
    return %c0_i32, %c0_i32_0 : i32, i32
  }
  func.func @transform_3(%arg0: i32) -> (i32, i32) {
    %c0_i32 = arith.constant 0 : i32
    %c0_i32_0 = arith.constant 0 : i32
    %c0_i32_1 = arith.constant 0 : i32
    return %c0_i32, %c0_i32_0 : i32, i32
  }
  func.func @transform_4(%arg0: i32) -> (i32, i32) {
    %c0_i32 = arith.constant 0 : i32
    %c0_i32_0 = arith.constant 0 : i32
    %c0_i32_1 = arith.constant 0 : i32
    return %c0_i32, %c0_i32_0 : i32, i32
  }
  func.func @transform_5(%arg0: i32) -> (i32, i32) {
    %c0_i32 = arith.constant 0 : i32
    %c0_i32_0 = arith.constant 0 : i32
    return %arg0, %c0_i32 : i32, i32
  }
}

module attributes {stable_mosaic.version = 11 : i64} {
  func.func @_head_kernel(%arg0: i32, %arg1: i32, %arg2: memref<8x1792xbf16, #tpu.memory_space<vmem>>, %arg3: memref<1792x32xbf16, #tpu.memory_space<vmem>>, %arg4: memref<1x32xf32, #tpu.memory_space<vmem>>, %arg5: memref<1x32xf32, #tpu.memory_space<vmem>>, %arg6: memref<1x32xf32, #tpu.memory_space<vmem>>, %arg7: memref<8x32xf32, #tpu.memory_space<vmem>>, %arg8: memref<8x32xf32, #tpu.memory_space<vmem>>) attributes {dimension_semantics = [#tpu.dimension_semantics<parallel>, #tpu.dimension_semantics<arbitrary>], iteration_bounds = array<i64: 1, 3>, scalar_prefetch = 0 : i64, scratch_operands = 1 : i64, tpu.core_type = #tpu.core_type<tc>, window_params = [{transform_indices = @transform_0, window_bounds = array<i64: 8, 1792>}, {transform_indices = @transform_1, window_bounds = array<i64: 1792, 32>}, {pipeline_mode = #tpu.pipeline_mode<synchronous>, transform_indices = @transform_2, window_bounds = array<i64: 1, 32>}, {pipeline_mode = #tpu.pipeline_mode<synchronous>, transform_indices = @transform_3, window_bounds = array<i64: 1, 32>}, {pipeline_mode = #tpu.pipeline_mode<synchronous>, transform_indices = @transform_4, window_bounds = array<i64: 1, 32>}, {transform_indices = @transform_5, window_bounds = array<i64: 8, 32>}]} {
    %c0_i32 = arith.constant 0 : i32
    %0 = arith.cmpi eq, %arg1, %c0_i32 : i32
    %1 = arith.extui %0 : i1 to i32
    %c0_i32_0 = arith.constant 0 : i32
    %2 = arith.cmpi ne, %1, %c0_i32_0 : i32
    scf.if %2 {
      %cst_9 = arith.constant 0.000000e+00 : f32
      %12 = vector.broadcast %cst_9 : f32 to vector<8x32xf32>
      %c0_10 = arith.constant 0 : index
      %c0_11 = arith.constant 0 : index
      %13 = vector.load %arg8[%c0_10, %c0_11] : memref<8x32xf32, #tpu.memory_space<vmem>>, vector<8x32xf32>
      tpu.vector_store %arg8[%c0_10, %c0_11], %12 {strides = array<i32>} : memref<8x32xf32, #tpu.memory_space<vmem>>, vector<8x32xf32>,
    } else {
    }
    %c0 = arith.constant 0 : index
    %c0_1 = arith.constant 0 : index
    %3 = vector.load %arg8[%c0, %c0_1] : memref<8x32xf32, #tpu.memory_space<vmem>>, vector<8x32xf32>
    %c0_2 = arith.constant 0 : index
    %c0_3 = arith.constant 0 : index
    %4 = vector.load %arg2[%c0_2, %c0_3] : memref<8x1792xbf16, #tpu.memory_space<vmem>>, vector<8x1792xbf16>
    %c0_4 = arith.constant 0 : index
    %c0_5 = arith.constant 0 : index
    %5 = vector.load %arg3[%c0_4, %c0_5] : memref<1792x32xbf16, #tpu.memory_space<vmem>>, vector<1792x32xbf16>
    %cst = arith.constant dense<0.000000e+00> : vector<8x32xf32>
    %6 = tpu.matmul %4, %5, %cst {dimension_numbers = #tpu.dot_dimension_numbers<[1], [0], [0], [1], [0, 0, 1, 1], [], []>} : vector<8x1792xbf16>, vector<1792x32xbf16>, vector<8x32xf32> -> vector<8x32xf32>
    %7 = arith.addf %3, %6 : vector<8x32xf32>
    %c0_6 = arith.constant 0 : index
    %c0_7 = arith.constant 0 : index
    %8 = vector.load %arg8[%c0_6, %c0_7] : memref<8x32xf32, #tpu.memory_space<vmem>>, vector<8x32xf32>
    tpu.vector_store %arg8[%c0_6, %c0_7], %7 {strides = array<i32>} : memref<8x32xf32, #tpu.memory_space<vmem>>, vector<8x32xf32>,
    %c2_i32 = arith.constant 2 : i32
    %9 = arith.cmpi eq, %arg1, %c2_i32 : i32
    %10 = arith.extui %9 : i1 to i32
    %c0_i32_8 = arith.constant 0 : i32
    %11 = arith.cmpi ne, %10, %c0_i32_8 : i32
    scf.if %11 {
      %c0_9 = arith.constant 0 : index
      %c0_10 = arith.constant 0 : index
      %12 = vector.load %arg8[%c0_9, %c0_10] : memref<8x32xf32, #tpu.memory_space<vmem>>, vector<8x32xf32>
      %c0_11 = arith.constant 0 : index
      %c0_12 = arith.constant 0 : index
      %13 = vector.load %arg4[%c0_11, %c0_12] : memref<1x32xf32, #tpu.memory_space<vmem>>, vector<1x32xf32>
      %14 = vector.broadcast %13 : vector<1x32xf32> to vector<8x32xf32>
      %15 = arith.addf %12, %14 : vector<8x32xf32>
      %cst_13 = arith.constant dense<0.000000e+00> : vector<8xf32>
      %16 = vector.multi_reduction <add>, %15, %cst_13 [1] : vector<8x32xf32> to vector<8xf32>
      %17 = vector.shape_cast %16 : vector<8xf32> to vector<8x1xf32>
      %cst_14 = arith.constant 3.200000e+01 : f32
      %18 = vector.broadcast %cst_14 : f32 to vector<8x1xf32>
      %19 = arith.divf %17, %18 : vector<8x1xf32>
      %20 = vector.broadcast %19 : vector<8x1xf32> to vector<8x32xf32>
      %21 = arith.subf %15, %20 : vector<8x32xf32>
      %22 = arith.mulf %21, %21 : vector<8x32xf32>
      %cst_15 = arith.constant dense<0.000000e+00> : vector<8xf32>
      %23 = vector.multi_reduction <add>, %22, %cst_15 [1] : vector<8x32xf32> to vector<8xf32>
      %24 = vector.shape_cast %23 : vector<8xf32> to vector<8x1xf32>
      %cst_16 = arith.constant 3.200000e+01 : f32
      %25 = vector.broadcast %cst_16 : f32 to vector<8x1xf32>
      %26 = arith.divf %24, %25 : vector<8x1xf32>
      %27 = vector.broadcast %19 : vector<8x1xf32> to vector<8x32xf32>
      %28 = arith.subf %15, %27 : vector<8x32xf32>
      %cst_17 = arith.constant 9.99999974E-6 : f32
      %29 = vector.broadcast %cst_17 : f32 to vector<8x1xf32>
      %30 = arith.addf %26, %29 : vector<8x1xf32>
      %31 = math.rsqrt %30 : vector<8x1xf32>
      %32 = vector.broadcast %31 : vector<8x1xf32> to vector<8x32xf32>
      %33 = arith.mulf %28, %32 : vector<8x32xf32>
      %c0_18 = arith.constant 0 : index
      %c0_19 = arith.constant 0 : index
      %34 = vector.load %arg5[%c0_18, %c0_19] : memref<1x32xf32, #tpu.memory_space<vmem>>, vector<1x32xf32>
      %35 = vector.broadcast %34 : vector<1x32xf32> to vector<8x32xf32>
      %36 = arith.mulf %33, %35 : vector<8x32xf32>
      %c0_20 = arith.constant 0 : index
      %c0_21 = arith.constant 0 : index
      %37 = vector.load %arg6[%c0_20, %c0_21] : memref<1x32xf32, #tpu.memory_space<vmem>>, vector<1x32xf32>
      %38 = vector.broadcast %37 : vector<1x32xf32> to vector<8x32xf32>
      %39 = arith.addf %36, %38 : vector<8x32xf32>
      %40 = math.tanh %39 : vector<8x32xf32>
      %c0_22 = arith.constant 0 : index
      %c0_23 = arith.constant 0 : index
      %41 = vector.load %arg7[%c0_22, %c0_23] : memref<8x32xf32, #tpu.memory_space<vmem>>, vector<8x32xf32>
      tpu.vector_store %arg7[%c0_22, %c0_23], %40 {strides = array<i32>} : memref<8x32xf32, #tpu.memory_space<vmem>>, vector<8x32xf32>,
    } else {
    }
    return
  }
  func.func @transform_0(%arg0: i32, %arg1: i32) -> (i32, i32) {
    %c0_i32 = arith.constant 0 : i32
    return %arg0, %arg1 : i32, i32
  }
  func.func @transform_1(%arg0: i32, %arg1: i32) -> (i32, i32) {
    %c0_i32 = arith.constant 0 : i32
    %c0_i32_0 = arith.constant 0 : i32
    return %arg1, %c0_i32 : i32, i32
  }
  func.func @transform_2(%arg0: i32, %arg1: i32) -> (i32, i32) {
    %c0_i32 = arith.constant 0 : i32
    %c0_i32_0 = arith.constant 0 : i32
    %c0_i32_1 = arith.constant 0 : i32
    return %c0_i32, %c0_i32_0 : i32, i32
  }
  func.func @transform_3(%arg0: i32, %arg1: i32) -> (i32, i32) {
    %c0_i32 = arith.constant 0 : i32
    %c0_i32_0 = arith.constant 0 : i32
    %c0_i32_1 = arith.constant 0 : i32
    return %c0_i32, %c0_i32_0 : i32, i32
  }
  func.func @transform_4(%arg0: i32, %arg1: i32) -> (i32, i32) {
    %c0_i32 = arith.constant 0 : i32
    %c0_i32_0 = arith.constant 0 : i32
    %c0_i32_1 = arith.constant 0 : i32
    return %c0_i32, %c0_i32_0 : i32, i32
  }
  func.func @transform_5(%arg0: i32, %arg1: i32) -> (i32, i32) {
    %c0_i32 = arith.constant 0 : i32
    %c0_i32_0 = arith.constant 0 : i32
    return %arg0, %c0_i32 : i32, i32
  }
}

</mosaic_0001>

<bundles_post_ra>
// kernel: pixel_delta_encoder_forward.2
= control target key start
LH: loop header
LB: loop body
LE: loop exit
PB: predicated region body
PF: predicated region fallthrough
CT: control target
= control target key end

     0   :  { %s5062_s18 = smov 0   ;;  %s6951_s0 = inlined_call_operand.vmem [shape: bf16[1344,32], index: 0, kind: input, shape index: {}]   ;;  %s6952_s1 = inlined_call_operand.vmem [shape: bf16[32,32], index: 1, kind: input, shape index: {}]   ;;  %s6953_s2 = inlined_call_operand.vmem [shape: f32[1,32], index: 2, kind: input, shape index: {}]   ;;  %s6954_s3 = inlined_call_operand.vmem [shape: bf16[288,32], index: 3, kind: input, shape index: {}]   ;;  %s6955_s4 = inlined_call_operand.vmem [shape: f32[1,32], index: 4, kind: input, shape index: {}]   ;;  %s6956_s5 = inlined_call_operand.vmem [shape: bf16[1344,32], index: 5, kind: output, shape index: {}]  }
   0x1 LB: > { %s4467_s19 = sadd.s32 4294967295, %s5029_s18   ;;  %p4471_p0 = scmp.ge.s32.totalorder %s5029_s18, 1  ;;  %s5029_s18 = sphi %s5062_s18, %s15_s18  }
   0x2   : > { %p188_p1 = scmp.lt.s32.totalorder %s5029_s18, 4 }
   0x4   : > { %p189_p2 = pnand %p4471_p0, %p188_p1 }
   0x6   : > { %192 = sbr.rel (%p189_p2) target bundleno = 1438 (0x59e), region = 40 }
   0xb   : > { %v4977_v0 = vld [vmem:[%s6952_s1 + $0x8] sm:$0xff]  ;;  %s216_s22 = smul.u32 56, %s4467_s19  ;;  %v4976_v1 = vld [vmem:[%s6952_s1] sm:$0xff]  ;;  %vm445_vm0 = vcmask 261120   ;;  %v4981_v18 = vld [vmem:[%s6954_s3 + $0x18] sm:$0xff]  ;;  %vm4354_vm1 = vcmask 257024  }
   0xc   : > { %536 = vmatpush.bf16.msra.mxu0 %v4977_v0  ;;  %4996 = vmatpush.bf16.msra.mxu2 %v4977_v0  ;;  %v4980_v19 = vld [vmem:[%s6954_s3 + $0x10] sm:$0xff]  ;;  %v5127_v20 = vld [vmem:[%s6953_s2] ss:$0 sm:$0xff]  ;;  %v4979_v26 = vld [vmem:[%s6954_s3 + $0x8] sm:$0xff] }
   0xd   : > { %p217_p3 = scmp.lt.s32.totalorder %s216_s22, 167  ;;  %1071 = vmatpush.bf16.msra.mxu1 %v4981_v18  ;;  %4998 = vmatpush.bf16.msra.mxu3 %v4981_v18  ;;  %v4983_v27 = vld [vmem:[%s6954_s3 + $0x28] sm:$0xff]  ;;  %v4985_v34 = vld [vmem:[%s6954_s3 + $0x38] sm:$0xff] }
   0xe   : > { %v4987_v43 = vld [vmem:[%s6954_s3 + $0x48] sm:$0xff] }
   0xf   : > { %s7301_s22 = smov (!%p217_p3, %s216_s22), 167 }
  0x10   : > { %537 = vmatpush.bf16.msra.mxu0 %v4976_v1  ;;  %4997 = vmatpush.bf16.msra.mxu2 %v4976_v1  ;;  %s4472_s25 = sshll.u32 %s7301_s22, 2 }
  0x11   : > { %s5084_s28 = scalar_lea.vmem %s6951_s0, %s4472_s25  ;;  %1072 = vmatpush.bf16.msra.mxu1 %v4980_v19  ;;  %4999 = vmatpush.bf16.msra.mxu3 %v4980_v19  ;;  %s6533_s27 = scalar_lea.vmem %s6956_s5, %s4472_s25 }
  0x12   : > { %v4948_v2 = vld [vmem:[%s5084_s28] sm:$0xff]  ;;  %v4962_v3 = vld [vmem:[%s5084_s28 + $0x70] sm:$0xff]  ;;  %v4949_v4 = vld [vmem:[%s5084_s28 + $0x8] sm:$0xff] }
  0x13   : > { %4594 = vmatmul.msk.bf16.vlgmr.msra.gmra.mxu0 %vm445_vm0, %v4948_v2  ;;  %4608 = vmatmul.msk.bf16.vlgmr.msra.gmra.mxu2 %vm445_vm0, %v4962_v3  ;;  %v4963_v5 = vld [vmem:[%s5084_s28 + $0x78] sm:$0xff]  ;;  %v4950_v6 = vld [vmem:[%s5084_s28 + $0x10] sm:$0xff]  ;;  %v4964_v7 = vld [vmem:[%s5084_s28 + $0x80] sm:$0xff] }
  0x14   : > { %v4951_v8 = vld [vmem:[%s5084_s28 + $0x18] sm:$0xff]  ;;  %v4965_v9 = vld [vmem:[%s5084_s28 + $0x88] sm:$0xff]  ;;  %v4952_v10 = vld [vmem:[%s5084_s28 + $0x20] sm:$0xff]  ;;  %1316 = vmatpush.bf16.msrb.mxu2 %v4979_v26  ;;  %2038 = vmatpush.bf16.msrb.mxu0 %v4985_v34 }
  0x15   : > { %v4966_v11 = vld [vmem:[%s5084_s28 + $0x90] sm:$0xff]  ;;  %v4953_v12 = vld [vmem:[%s5084_s28 + $0x28] sm:$0xff]  ;;  %v4967_v13 = vld [vmem:[%s5084_s28 + $0x98] sm:$0xff]  ;;  %1649 = vmatpush.bf16.msrb.mxu3 %v4983_v27  ;;  %2427 = vmatpush.bf16.msrb.mxu1 %v4987_v43 }
  0x16   : > { %v4954_v14 = vld [vmem:[%s5084_s28 + $0x30] sm:$0xff]  ;;  %v4968_v15 = vld [vmem:[%s5084_s28 + $0xa0] sm:$0xff]  ;;  %v4955_v16 = vld [vmem:[%s5084_s28 + $0x38] sm:$0xff] }
  0x17   : > { %v4969_v17 = vld [vmem:[%s5084_s28 + $0xa8] sm:$0xff]  ;;  %v4956_v21 = vld [vmem:[%s5084_s28 + $0x40] sm:$0xff]  ;;  %v4970_v22 = vld [vmem:[%s5084_s28 + $0xb0] sm:$0xff] }
  0x18   : > { %v4957_v37 = vld [vmem:[%s5084_s28 + $0x48] sm:$0xff]  ;;  %v4971_v38 = vld [vmem:[%s5084_s28 + $0xb8] sm:$0xff]  ;;  %v4958_v58 = vld [vmem:[%s5084_s28 + $0x50] sm:$0xff] }
  0x19   : > { %v4972_v59 = vld [vmem:[%s5084_s28 + $0xc0] sm:$0xff] }
  0x23   : > { %4595 = vmatmul.msk.bf16.gmra.mxu0 %vm445_vm0, %v4949_v4  ;;  %4609 = vmatmul.msk.bf16.gmra.mxu2 %vm445_vm0, %v4963_v5 }
  0x33   : > { %4596 = vmatmul.msk.bf16.gmra.mxu0 %vm445_vm0, %v4950_v6  ;;  %4610 = vmatmul.msk.bf16.gmra.mxu2 %vm445_vm0, %v4964_v7 }
  0x43   : > { %4597 = vmatmul.msk.bf16.gmra.mxu0 %vm445_vm0, %v4951_v8  ;;  %4611 = vmatmul.msk.bf16.gmra.mxu2 %vm445_vm0, %v4965_v9 }
  0x53   : > { %4598 = vmatmul.msk.bf16.gmra.mxu0 %vm445_vm0, %v4952_v10  ;;  %4612 = vmatmul.msk.bf16.gmra.mxu2 %vm445_vm0, %v4966_v11 }
  0x63   : > { %4599 = vmatmul.msk.bf16.gmra.mxu0 %vm445_vm0, %v4953_v12  ;;  %4613 = vmatmul.msk.bf16.gmra.mxu2 %vm445_vm0, %v4967_v13 }
  0x73   : > { %4600 = vmatmul.msk.bf16.gmra.mxu0 %vm445_vm0, %v4954_v14  ;;  %4614 = vmatmul.msk.bf16.gmra.mxu2 %vm445_vm0, %v4968_v15 }
  0x83   : > { %4601 = vmatmul.msk.bf16.gmra.mxu0 %vm445_vm0, %v4955_v16  ;;  %4615 = vmatmul.msk.bf16.gmra.mxu2 %vm445_vm0, %v4969_v17 }
  0x90   : > { %v539_v23 = vpop.f32.mrf.mxu0 }
  0x91   : > { %v540_v24 = vadd.f32 %v5127_v20, %v539_v23 }
  0x93   : > { %v679_v25 = vmax.f32 %v540_v24, 0.0  ;;  %4602 = vmatmul.msk.bf16.gmra.mxu0 %vm445_vm0, %v4956_v21  ;;  %4616 = vmatmul.msk.bf16.gmra.mxu2 %vm445_vm0, %v4970_v22  ;;  %v4959_v21 = vld [vmem:[%s5084_s28 + $0x58] sm:$0xff]  ;;  %v4973_v22 = vld [vmem:[%s5084_s28 + $0xc8] sm:$0xff] }
  0x95   : > { %735 = vst.msk [vmem:[#allocation2] sm:$0xff] %vm445_vm0, %v679_v25 }
  0x96   : > { %v609_v28 = vpop.f32.mrf.mxu2 }
  0x97   : > { %v610_v29 = vadd.f32 %v5127_v20, %v609_v28 }
  0x98   : > { %v541_v30 = vpop.f32.mrf.mxu0 }
  0x99   : > { %v707_v31 = vmax.f32 %v610_v29, 0.0  ;;  %v542_v32 = vadd.f32 %v5127_v20, %v541_v30 }
  0x9b   : > { %763 = vst.msk [vmem:[#allocation2 + $0xe0] sm:$0xff] %vm445_vm0, %v707_v31  ;;  %v680_v33 = vmax.f32 %v542_v32, 0.0 }
  0x9d   : > { %736 = vst.msk [vmem:[#allocation2 + $0x8] sm:$0xff] %vm445_vm0, %v680_v33 }
  0x9e   : > { %v611_v35 = vpop.f32.mrf.mxu2 }
  0x9f   : > { %v612_v36 = vadd.f32 %v5127_v20, %v611_v35 }
  0xa0   : > { %v544_v39 = vpop.f32.mrf.mxu0 }
  0xa1   : > { %v708_v40 = vmax.f32 %v612_v36, 0.0  ;;  %v545_v41 = vadd.f32 %v5127_v20, %v544_v39 }
  0xa3   : > { %764 = vst.msk [vmem:[#allocation2 + $0xe8] sm:$0xff] %vm445_vm0, %v708_v40  ;;  %v681_v42 = vmax.f32 %v545_v41, 0.0  ;;  %4603 = vmatmul.msk.bf16.gmra.mxu0 %vm445_vm0, %v4957_v37  ;;  %4617 = vmatmul.msk.bf16.gmra.mxu2 %vm445_vm0, %v4971_v38 }
  0xa4   : > { %v881_v49 = vld [vmem:[#allocation2 + $0x1] sm:$0xff] }
  0xa5   : > { %737 = vst.msk [vmem:[#allocation2 + $0x10] sm:$0xff] %vm445_vm0, %v681_v42  ;;  %v5161_v50 = vld [vmem:[#allocation2 + $0x8] sm:$0xff] }
  0xa6   : > { %v614_v44 = vpop.f32.mrf.mxu2 }
  0xa7   : > { %v615_v45 = vadd.f32 %v5127_v20, %v614_v44 }
  0xa8   : > { %v546_v46 = vpop.f32.mrf.mxu0 }
  0xa9   : > { %v709_v47 = vmax.f32 %v615_v45, 0.0  ;;  %v547_v48 = vadd.f32 %v5127_v20, %v546_v46  ;;  %v4978_v46 = vld [vmem:[%s6954_s3] sm:$0xff] }
  0xaa   : > { %v909_v63 = vld [vmem:[#allocation2 + $0xe1] sm:$0xff]  ;;  %1317 = vmatpush.bf16.msrb.mxu2 %v4978_v46 }
  0xab   : > { %765 = vst.msk [vmem:[#allocation2 + $0xf0] sm:$0xff] %vm445_vm0, %v709_v47  ;;  %v682_v51 = vmax.f32 %v547_v48, 0.0  ;;  %v5179_v4 = vld [vmem:[#allocation2 + $0xe8] sm:$0xff]  ;;  %v4984_v47 = vld [vmem:[%s6954_s3 + $0x30] sm:$0xff] }
  0xac   : > { %v882_v52 = vld [vmem:[#allocation2 + $0x9] sm:$0xff]  ;;  %6987 = vst [vmem:[#allocation4_spill] sm:$0xff] %v5179_v4  ;;  %2039 = vmatpush.bf16.msrb.mxu0 %v4984_v47 }
  0xad   : > { %v5164_v53 = vld [vmem:[#allocation2 + $0x10] sm:$0xff]  ;;  %738 = vst.msk [vmem:[#allocation2 + $0x18] sm:$0xff] %vm445_vm0, %v682_v51  ;;  %v937_v54 = vpack.c.bf16 %v882_v52, %v881_v49  ;;  %v4960_v49 = vld [vmem:[%s5084_s28 + $0x60] sm:$0xff] }
  0xae   : > { %v616_v56 = vpop.f32.mrf.mxu2  ;;  %v4974_v51 = vld [vmem:[%s5084_s28 + $0xd0] sm:$0xff] }
  0xaf   : > { %v617_v57 = vadd.f32 %v5127_v20, %v616_v56  ;;  %4630 = vmatmul.msk.bf16.vlgmr.msra.gmra.mxu1 %vm445_vm0, %v937_v54 }
  0xb0   : > { %v549_v60 = vpop.f32.mrf.mxu0 }
  0xb1   : > { %v710_v61 = vmax.f32 %v617_v57, 0.0  ;;  %v550_v62 = vadd.f32 %v5127_v20, %v549_v60 }
  0xb2   : > { %v910_v0 = vld [vmem:[#allocation2 + $0xe9] sm:$0xff] }
  0xb3   : > { %v5174_v1 = vld [vmem:[#allocation2 + $0xf0] sm:$0xff]  ;;  %766 = vst.msk [vmem:[#allocation2 + $0xf8] sm:$0xff] %vm445_vm0, %v710_v61  ;;  %v683_v2 = vmax.f32 %v550_v62, 0.0  ;;  %4604 = vmatmul.msk.bf16.gmra.mxu0 %vm445_vm0, %v4958_v58  ;;  %4618 = vmatmul.msk.bf16.gmra.mxu2 %vm445_vm0, %v4972_v59  ;;  %v951_v3 = vpack.c.bf16 %v910_v0, %v909_v63 }
  0xb4   : > { %6986 = vst [vmem:[#allocation3_spill] sm:$0xff] %v5174_v1  ;;  %v883_v11 = vld [vmem:[#allocation2 + $0x11] sm:$0xff] }
  0xb5   : > { %739 = vst.msk [vmem:[#allocation2 + $0x20] sm:$0xff] %vm445_vm0, %v683_v2  ;;  %4644 = vmatmul.msk.bf16.vlgmr.msra.gmra.mxu3 %vm445_vm0, %v951_v3  ;;  %v5187_v12 = vld [vmem:[#allocation2 + $0x18] sm:$0xff] }
  0xb6   : > { %v619_v6 = vpop.f32.mrf.mxu2 }
  0xb7   : > { %v620_v7 = vadd.f32 %v5127_v20, %v619_v6 }
  0xb8   : > { %v551_v8 = vpop.f32.mrf.mxu0 }
  0xb9   : > { %v711_v9 = vmax.f32 %v620_v7, 0.0  ;;  %v552_v10 = vadd.f32 %v5127_v20, %v551_v8 }
  0xba   : > { %v911_v26 = vld [vmem:[#allocation2 + $0xf1] sm:$0xff] }
  0xbb   : > { %767 = vst.msk [vmem:[#allocation2 + $0x100] sm:$0xff] %vm445_vm0, %v711_v9  ;;  %v684_v13 = vmax.f32 %v552_v10, 0.0  ;;  %v5205_v31 = vld [vmem:[#allocation2 + $0xf8] sm:$0xff] }
  0xbc   : > { %v884_v14 = vld [vmem:[#allocation2 + $0x19] sm:$0xff]  ;;  %6989 = vst [vmem:[#allocation6_spill] sm:$0xff] %v5205_v31 }
  0xbd   : > { %v5190_v15 = vld [vmem:[#allocation2 + $0x20] sm:$0xff]  ;;  %740 = vst.msk [vmem:[#allocation2 + $0x28] sm:$0xff] %vm445_vm0, %v684_v13  ;;  %v938_v16 = vpack.c.bf16 %v884_v14, %v883_v11 }
  0xbe   : > { %v621_v18 = vpop.f32.mrf.mxu2 }
  0xbf   : > { %v622_v19 = vadd.f32 %v5127_v20, %v621_v18  ;;  %4631 = vmatmul.msk.bf16.gmra.mxu1 %vm445_vm0, %v938_v16 }
  0xc0   : > { %v554_v23 = vpop.f32.mrf.mxu0 }
  0xc1   : > { %v712_v24 = vmax.f32 %v622_v19, 0.0  ;;  %v555_v25 = vadd.f32 %v5127_v20, %v554_v23 }
  0xc2   : > { %v912_v27 = vld [vmem:[#allocation2 + $0xf9] sm:$0xff] }
  0xc3   : > { %v5200_v28 = vld [vmem:[#allocation2 + $0x100] sm:$0xff]  ;;  %768 = vst.msk [vmem:[#allocation2 + $0x108] sm:$0xff] %vm445_vm0, %v712_v24  ;;  %v685_v29 = vmax.f32 %v555_v25, 0.0  ;;  %4605 = vmatmul.msk.bf16.gmra.mxu0 %vm445_vm0, %v4959_v21  ;;  %4619 = vmatmul.msk.bf16.gmra.mxu2 %vm445_vm0, %v4973_v22  ;;  %v952_v30 = vpack.c.bf16 %v912_v27, %v911_v26  ;;  %v4961_v21 = vld [vmem:[%s5084_s28 + $0x68] sm:$0xff]  ;;  %v4975_v22 = vld [vmem:[%s5084_s28 + $0xd8] sm:$0xff] }
  0xc4   : > { %6988 = vst [vmem:[#allocation5_spill] sm:$0xff] %v5200_v28  ;;  %v885_v38 = vld [vmem:[#allocation2 + $0x21] sm:$0xff] }
  0xc5   : > { %741 = vst.msk [vmem:[#allocation2 + $0x30] sm:$0xff] %vm445_vm0, %v685_v29  ;;  %4645 = vmatmul.msk.bf16.gmra.mxu3 %vm445_vm0, %v952_v30  ;;  %v5213_v39 = vld [vmem:[#allocation2 + $0x28] sm:$0xff] }
  0xc6   : > { %v624_v33 = vpop.f32.mrf.mxu2 }
  0xc7   : > { %v625_v34 = vadd.f32 %v5127_v20, %v624_v33 }
  0xc8   : > { %v556_v35 = vpop.f32.mrf.mxu0 }
  0xc9   : > { %v713_v36 = vmax.f32 %v625_v34, 0.0  ;;  %v557_v37 = vadd.f32 %v5127_v20, %v556_v35 }
  0xca   : > { %v913_v57 = vld [vmem:[#allocation2 + $0x101] sm:$0xff] }
  0xcb   : > { %769 = vst.msk [vmem:[#allocation2 + $0x110] sm:$0xff] %vm445_vm0, %v713_v36  ;;  %v686_v40 = vmax.f32 %v557_v37, 0.0  ;;  %v5237_v62 = vld [vmem:[#allocation2 + $0x108] sm:$0xff] }
  0xcc   : > { %v886_v41 = vld [vmem:[#allocation2 + $0x29] sm:$0xff]  ;;  %6991 = vst [vmem:[#allocation8_spill] sm:$0xff] %v5237_v62 }
  0xcd   : > { %v5216_v42 = vld [vmem:[#allocation2 + $0x30] sm:$0xff]  ;;  %742 = vst.msk [vmem:[#allocation2 + $0x38] sm:$0xff] %vm445_vm0, %v686_v40  ;;  %v939_v43 = vpack.c.bf16 %v886_v41, %v885_v38 }
  0xce   : > { %v626_v45 = vpop.f32.mrf.mxu2 }
  0xcf   : > { %v627_v48 = vadd.f32 %v5127_v20, %v626_v45  ;;  %4632 = vmatmul.msk.bf16.gmra.mxu1 %vm445_vm0, %v939_v43 }
  0xd0   : > { %v559_v52 = vpop.f32.mrf.mxu0 }
  0xd1   : > { %v714_v54 = vmax.f32 %v627_v48, 0.0  ;;  %v560_v56 = vadd.f32 %v5127_v20, %v559_v52 }
  0xd2   : > { %v914_v58 = vld [vmem:[#allocation2 + $0x109] sm:$0xff] }
  0xd3   : > { %v5232_v59 = vld [vmem:[#allocation2 + $0x110] sm:$0xff]  ;;  %770 = vst.msk [vmem:[#allocation2 + $0x118] sm:$0xff] %vm445_vm0, %v714_v54  ;;  %v687_v60 = vmax.f32 %v560_v56, 0.0  ;;  %4606 = vmatmul.msk.bf16.gmra.mxu0 %vm445_vm0, %v4960_v49  ;;  %4620 = vmatmul.msk.bf16.gmra.mxu2 %vm445_vm0, %v4974_v51  ;;  %v953_v61 = vpack.c.bf16 %v914_v58, %v913_v57  ;;  %v793_v54 = vld [vmem:[#allocation2] sm:$0xff] }
  0xd4   : > { %6990 = vst [vmem:[#allocation7_spill] sm:$0xff] %v5232_v59  ;;  %v887_v8 = vld [vmem:[#allocation2 + $0x31] sm:$0xff]  ;;  %v1848_v56 = vld [vmem:[#allocation2 + $0x7] sm:$0xff] }
  0xd5   : > { %743 = vst.msk [vmem:[#allocation2 + $0x40] sm:$0xff] %vm445_vm0, %v687_v60  ;;  %4646 = vmatmul.msk.bf16.gmra.mxu3 %vm445_vm0, %v953_v61  ;;  %v5245_v9 = vld [vmem:[#allocation2 + $0x38] sm:$0xff]  ;;  %v1849_v57 = vld [vmem:[#allocation2 + $0xf] sm:$0xff] }
  0xd6   : > { %v629_v0 = vpop.f32.mrf.mxu2 }
  0xd7   : > { %v630_v2 = vadd.f32 %v5127_v20, %v629_v0 }
  0xd8   : > { %v561_v3 = vpop.f32.mrf.mxu0 }
  0xd9   : > { %v715_v6 = vmax.f32 %v630_v2, 0.0  ;;  %v562_v7 = vadd.f32 %v5127_v20, %v561_v3  ;;  %v849_v2 = vpack.c.bf16 %v5161_v50, %v793_v54  ;;  %v1904_v3 = vpack.c.bf16 %v1849_v57, %v1848_v56 }
  0xda   : > { %v915_v26 = vld [vmem:[#allocation2 + $0x111] sm:$0xff] }
  0xdb   : > { %771 = vst.msk [vmem:[#allocation2 + $0x120] sm:$0xff] %vm445_vm0, %v715_v6  ;;  %v688_v10 = vmax.f32 %v562_v7, 0.0  ;;  %v5263_v34 = vld [vmem:[#allocation2 + $0x118] sm:$0xff] }
  0xdc   : > { %v888_v11 = vld [vmem:[#allocation2 + $0x39] sm:$0xff]  ;;  %6993 = vst [vmem:[#allocation10_spill] sm:$0xff] %v5263_v34 }
  0xdd   : > { %v5248_v13 = vld [vmem:[#allocation2 + $0x40] sm:$0xff]  ;;  %744 = vst.msk [vmem:[#allocation2 + $0x48] sm:$0xff] %vm445_vm0, %v688_v10  ;;  %v940_v14 = vpack.c.bf16 %v888_v11, %v887_v8 }
  0xde   : > { %v631_v18 = vpop.f32.mrf.mxu2 }
  0xdf   : > { %v632_v19 = vadd.f32 %v5127_v20, %v631_v18  ;;  %4633 = vmatmul.msk.bf16.gmra.mxu1 %vm445_vm0, %v940_v14 }
  0xe0   : > { %v564_v23 = vpop.f32.mrf.mxu0 }
  0xe1   : > { %v716_v24 = vmax.f32 %v632_v19, 0.0  ;;  %v565_v25 = vadd.f32 %v5127_v20, %v564_v23 }
  0xe2   : > { %v916_v27 = vld [vmem:[#allocation2 + $0x119] sm:$0xff] }
  0xe3   : > { %v5258_v29 = vld [vmem:[#allocation2 + $0x120] sm:$0xff]  ;;  %772 = vst.msk [vmem:[#allocation2 + $0x128] sm:$0xff] %vm445_vm0, %v716_v24  ;;  %v689_v30 = vmax.f32 %v565_v25, 0.0  ;;  %4607 = vmatmul.msk.bf16.gmra.mxu0 %vm445_vm0, %v4961_v21  ;;  %4621 = vmatmul.msk.bf16.gmra.mxu2 %vm445_vm0, %v4975_v22  ;;  %v954_v33 = vpack.c.bf16 %v916_v27, %v915_v26 }
  0xe4   : > { %6992 = vst [vmem:[#allocation9_spill] sm:$0xff] %v5258_v29  ;;  %v889_v43 = vld [vmem:[#allocation2 + $0x41] sm:$0xff] }
  0xe5   : > { %745 = vst.msk [vmem:[#allocation2 + $0x50] sm:$0xff] %vm445_vm0, %v689_v30  ;;  %4647 = vmatmul.msk.bf16.gmra.mxu3 %vm445_vm0, %v954_v33  ;;  %v5271_v45 = vld [vmem:[#allocation2 + $0x48] sm:$0xff] }
  0xe6   : > { %v634_v36 = vpop.f32.mrf.mxu2 }
  0xe7   : > { %v635_v37 = vadd.f32 %v5127_v20, %v634_v36 }
  0xe8   : > { %v566_v38 = vpop.f32.mrf.mxu0 }
  0xe9   : > { %v717_v40 = vmax.f32 %v635_v37, 0.0  ;;  %v567_v41 = vadd.f32 %v5127_v20, %v566_v38 }
  0xea   : > { %v917_v6 = vld [vmem:[#allocation2 + $0x121] sm:$0xff] }
  0xeb   : > { %773 = vst.msk [vmem:[#allocation2 + $0x130] sm:$0xff] %vm445_vm0, %v717_v40  ;;  %v690_v46 = vmax.f32 %v567_v41, 0.0  ;;  %v5288_v14 = vld [vmem:[#allocation2 + $0x128] sm:$0xff]  ;;  %v1850_v40 = vld [vmem:[#allocation2 + $0x17] sm:$0xff]  ;;  %v1851_v41 = vld [vmem:[#allocation2 + $0x1f] sm:$0xff] }
  0xec   : > { %v890_v47 = vld [vmem:[#allocation2 + $0x49] sm:$0xff]  ;;  %v1905_v54 = vpack.c.bf16 %v1851_v41, %v1850_v40 }
  0xed   : > { %v5274_v48 = vld [vmem:[#allocation2 + $0x50] sm:$0xff]  ;;  %746 = vst.msk [vmem:[#allocation2 + $0x58] sm:$0xff] %vm445_vm0, %v690_v46  ;;  %v941_v49 = vpack.c.bf16 %v890_v47, %v889_v43 }
  0xee   : > { %v636_v52 = vpop.f32.mrf.mxu2  ;;  %v1853_v40 = vld [vmem:[#allocation2 + $0x2f] sm:$0xff] }
  0xef   : > { %v637_v58 = vadd.f32 %v5127_v20, %v636_v52  ;;  %4634 = vmatmul.msk.bf16.gmra.mxu1 %vm445_vm0, %v941_v49  ;;  %v850_v52 = vpack.c.bf16 %v5187_v12, %v5164_v53 }
  0xf0   : > { %v569_v60 = vpop.f32.mrf.mxu0 }
  0xf1   : > { %v718_v61 = vmax.f32 %v637_v58, 0.0  ;;  %v570_v0 = vadd.f32 %v5127_v20, %v569_v60 }
  0xf2   : > { %v918_v7 = vld [vmem:[#allocation2 + $0x129] sm:$0xff] }
  0xf3   : > { %v5283_v8 = vld [vmem:[#allocation2 + $0x130] sm:$0xff]  ;;  %774 = vst.msk [vmem:[#allocation2 + $0x138] sm:$0xff] %vm445_vm0, %v718_v61  ;;  %v691_v10 = vmax.f32 %v570_v0, 0.0  ;;  %4666 = vmatmul.msk.bf16.vlgmr.msrb.gmra.mxu2 %vm445_vm0, %v849_v2  ;;  %4738 = vmatmul.msk.bf16.vlgmr.msrb.gmra.mxu0 %vm445_vm0, %v1904_v3  ;;  %v955_v11 = vpack.c.bf16 %v918_v7, %v917_v6  ;;  %v4982_v3 = vld [vmem:[%s6954_s3 + $0x20] sm:$0xff] }
  0xf4   : > { %6994 = vst [vmem:[#allocation11_spill] sm:$0xff] %v5283_v8  ;;  %v891_v25 = vld [vmem:[#allocation2 + $0x51] sm:$0xff]  ;;  %1650 = vmatpush.bf16.msrb.mxu3 %v4982_v3  ;;  %v4986_v3 = vld [vmem:[%s6954_s3 + $0x40] sm:$0xff] }
  0xf5   : > { %747 = vst.msk [vmem:[#allocation2 + $0x60] sm:$0xff] %vm445_vm0, %v691_v10  ;;  %4648 = vmatmul.msk.bf16.gmra.mxu3 %vm445_vm0, %v955_v11  ;;  %v5296_v26 = vld [vmem:[#allocation2 + $0x58] sm:$0xff]  ;;  %2428 = vmatpush.bf16.msrb.mxu1 %v4986_v3 }
  0xf6   : > { %v639_v19 = vpop.f32.mrf.mxu2  ;;  %v1858_v63 = vld [vmem:[#allocation2 + $0x57] sm:$0xff] }
  0xf7   : > { %v640_v21 = vadd.f32 %v5127_v20, %v639_v19 }
  0xf8   : > { %v571_v22 = vpop.f32.mrf.mxu0 }
  0xf9   : > { %v719_v23 = vmax.f32 %v640_v21, 0.0  ;;  %v572_v24 = vadd.f32 %v5127_v20, %v571_v22 }
  0xfa   : > { %v919_v56 = vld [vmem:[#allocation2 + $0x131] sm:$0xff] }
  0xfb   : > { %775 = vst.msk [vmem:[#allocation2 + $0x140] sm:$0xff] %vm445_vm0, %v719_v23  ;;  %v692_v27 = vmax.f32 %v572_v24, 0.0  ;;  %v5314_v0 = vld [vmem:[#allocation2 + $0x138] sm:$0xff] }
  0xfc   : > { %v892_v30 = vld [vmem:[#allocation2 + $0x59] sm:$0xff] }
  0xfd   : > { %v5299_v33 = vld [vmem:[#allocation2 + $0x60] sm:$0xff]  ;;  %748 = vst.msk [vmem:[#allocation2 + $0x68] sm:$0xff] %vm445_vm0, %v692_v27  ;;  %v942_v36 = vpack.c.bf16 %v892_v30, %v891_v25 }
  0xfe   : > { %v641_v38 = vpop.f32.mrf.mxu2 }
  0xff   : > { %v642_v43 = vadd.f32 %v5127_v20, %v641_v38  ;;  %4635 = vmatmul.msk.bf16.gmra.mxu1 %vm445_vm0, %v942_v36  ;;  %v1852_v38 = vld [vmem:[#allocation2 + $0x27] sm:$0xff] }
 0x100   : > { %v574_v46 = vpop.f32.mrf.mxu0 }
 0x101   : > { %v720_v47 = vmax.f32 %v642_v43, 0.0  ;;  %v575_v49 = vadd.f32 %v5127_v20, %v574_v46 }
 0x102   : > { %v920_v57 = vld [vmem:[#allocation2 + $0x139] sm:$0xff] }
 0x103   : > { %v5309_v58 = vld [vmem:[#allocation2 + $0x140] sm:$0xff]  ;;  %776 = vst.msk [vmem:[#allocation2 + $0x148] sm:$0xff] %vm445_vm0, %v720_v47  ;;  %v693_v60 = vmax.f32 %v575_v49, 0.0  ;;  %4667 = vmatmul.msk.bf16.gmra.mxu2 %vm445_vm0, %v850_v52  ;;  %4739 = vmatmul.msk.bf16.gmra.mxu0 %vm445_vm0, %v1905_v54  ;;  %v956_v61 = vpack.c.bf16 %v920_v57, %v919_v56  ;;  %v851_v49 = vpack.c.bf16 %v5213_v39, %v5190_v15 }
 0x104   : > { %6995 = vst [vmem:[#allocation12_spill] sm:$0xff] %v5309_v58  ;;  %v893_v21 = vld [vmem:[#allocation2 + $0x61] sm:$0xff]  ;;  %v1906_v52 = vpack.c.bf16 %v1853_v40, %v1852_v38 }
 0x105   : > { %749 = vst.msk [vmem:[#allocation2 + $0x70] sm:$0xff] %vm445_vm0, %v693_v60  ;;  %4649 = vmatmul.msk.bf16.gmra.mxu3 %vm445_vm0, %v956_v61  ;;  %v5325_v22 = vld [vmem:[#allocation2 + $0x68] sm:$0xff] }
 0x106   : > { %v644_v6 = vpop.f32.mrf.mxu2  ;;  %v1860_v16 = vld [vmem:[#allocation2 + $0x67] sm:$0xff] }
 0x107   : > { %v645_v7 = vadd.f32 %v5127_v20, %v644_v6 }
 0x108   : > { %v576_v10 = vpop.f32.mrf.mxu0 }
 0x109   : > { %v721_v11 = vmax.f32 %v645_v7, 0.0  ;;  %v577_v19 = vadd.f32 %v5127_v20, %v576_v10 }
 0x10a   : > { %v921_v54 = vld [vmem:[#allocation2 + $0x141] sm:$0xff] }
 0x10b   : > { %777 = vst.msk [vmem:[#allocation2 + $0x150] sm:$0xff] %vm445_vm0, %v721_v11  ;;  %v694_v23 = vmax.f32 %v577_v19, 0.0  ;;  %v5346_v6 = vld [vmem:[#allocation2 + $0x148] sm:$0xff] }
 0x10c   : > { %v894_v24 = vld [vmem:[#allocation2 + $0x69] sm:$0xff] }
 0x10d   : > { %v5328_v25 = vld [vmem:[#allocation2 + $0x70] sm:$0xff]  ;;  %750 = vst.msk [vmem:[#allocation2 + $0x78] sm:$0xff] %vm445_vm0, %v694_v23  ;;  %v943_v27 = vpack.c.bf16 %v894_v24, %v893_v21 }
 0x10e   : > { %v646_v36 = vpop.f32.mrf.mxu2 }
 0x10f   : > { %v647_v41 = vadd.f32 %v5127_v20, %v646_v36  ;;  %4636 = vmatmul.msk.bf16.gmra.mxu1 %vm445_vm0, %v943_v27 }
 0x110   : > { %v579_v43 = vpop.f32.mrf.mxu0 }
 0x111   : > { %v722_v46 = vmax.f32 %v647_v41, 0.0  ;;  %v580_v47 = vadd.f32 %v5127_v20, %v579_v43 }
 0x112   : > { %v922_v56 = vld [vmem:[#allocation2 + $0x149] sm:$0xff] }
 0x113   : > { %v5338_v57 = vld [vmem:[#allocation2 + $0x150] sm:$0xff]  ;;  %778 = vst.msk [vmem:[#allocation2 + $0x158] sm:$0xff] %vm445_vm0, %v722_v46  ;;  %v695_v60 = vmax.f32 %v580_v47, 0.0  ;;  %4668 = vmatmul.msk.bf16.gmra.mxu2 %vm445_vm0, %v851_v49  ;;  %4740 = vmatmul.msk.bf16.gmra.mxu0 %vm445_vm0, %v1906_v52  ;;  %v957_v61 = vpack.c.bf16 %v922_v56, %v921_v54  ;;  %v1855_v49 = vld [vmem:[#allocation2 + $0x3f] sm:$0xff] }
 0x114   : > { %6996 = vst [vmem:[#allocation13_spill] sm:$0xff] %v5338_v57  ;;  %v895_v24 = vld [vmem:[#allocation2 + $0x71] sm:$0xff] }
 0x115   : > { %751 = vst.msk [vmem:[#allocation2 + $0x80] sm:$0xff] %vm445_vm0, %v695_v60  ;;  %4650 = vmatmul.msk.bf16.gmra.mxu3 %vm445_vm0, %v957_v61  ;;  %v5354_v27 = vld [vmem:[#allocation2 + $0x78] sm:$0xff]  ;;  %v852_v61 = vpack.c.bf16 %v5245_v9, %v5216_v42 }
 0x116   : > { %v649_v10 = vpop.f32.mrf.mxu2  ;;  %v1854_v47 = vld [vmem:[#allocation2 + $0x37] sm:$0xff] }
 0x117   : > { %v650_v11 = vadd.f32 %v5127_v20, %v649_v10  ;;  %v1907_v3 = vpack.c.bf16 %v1855_v49, %v1854_v47 }
 0x118   : > { %v581_v19 = vpop.f32.mrf.mxu0 }
 0x119   : > { %v723_v21 = vmax.f32 %v650_v11, 0.0  ;;  %v582_v23 = vadd.f32 %v5127_v20, %v581_v19 }
 0x11a   : > { %v923_v10 = vld [vmem:[#allocation2 + $0x151] sm:$0xff] }
 0x11b   : > { %779 = vst.msk [vmem:[#allocation2 + $0x160] sm:$0xff] %vm445_vm0, %v723_v21  ;;  %v696_v36 = vmax.f32 %v582_v23, 0.0 }
 0x11c   : > { %v896_v38 = vld [vmem:[#allocation2 + $0x79] sm:$0xff] }
 0x11d   : > { %v5357_v40 = vld [vmem:[#allocation2 + $0x80] sm:$0xff]  ;;  %752 = vst.msk [vmem:[#allocation2 + $0x88] sm:$0xff] %vm445_vm0, %v696_v36  ;;  %v944_v41 = vpack.c.bf16 %v896_v38, %v895_v24  ;;  %v5372_v24 = vld [vmem:[#allocation2 + $0x158] sm:$0xff]  ;;  %v853_v36 = vpack.c.bf16 %v5271_v45, %v5248_v13 }
 0x11e   : > { %v651_v46 = vpop.f32.mrf.mxu2 }
 0x11f   : > { %v652_v52 = vadd.f32 %v5127_v20, %v651_v46  ;;  %4637 = vmatmul.msk.bf16.gmra.mxu1 %vm445_vm0, %v944_v41 }
 0x120   : > { %v584_v54 = vpop.f32.mrf.mxu0 }
 0x121   : > { %v724_v56 = vmax.f32 %v652_v52, 0.0  ;;  %v585_v60 = vadd.f32 %v5127_v20, %v584_v54 }
 0x122   : > { %v924_v11 = vld [vmem:[#allocation2 + $0x159] sm:$0xff] }
 0x123   : > { %v5367_v19 = vld [vmem:[#allocation2 + $0x160] sm:$0xff]  ;;  %780 = vst.msk [vmem:[#allocation2 + $0x168] sm:$0xff] %vm445_vm0, %v724_v56  ;;  %v697_v21 = vmax.f32 %v585_v60, 0.0  ;;  %4669 = vmatmul.msk.bf16.gmra.mxu2 %vm445_vm0, %v852_v61  ;;  %4741 = vmatmul.msk.bf16.gmra.mxu0 %vm445_vm0, %v1907_v3  ;;  %v958_v23 = vpack.c.bf16 %v924_v11, %v923_v10 }
 0x124   : > { %v897_v52 = vld [vmem:[#allocation2 + $0x81] sm:$0xff] }
 0x125   : > { %753 = vst.msk [vmem:[#allocation2 + $0x90] sm:$0xff] %vm445_vm0, %v697_v21  ;;  %4651 = vmatmul.msk.bf16.gmra.mxu3 %vm445_vm0, %v958_v23  ;;  %v5380_v54 = vld [vmem:[#allocation2 + $0x88] sm:$0xff] }
 0x126   : > { %v654_v38 = vpop.f32.mrf.mxu2  ;;  %v1856_v23 = vld [vmem:[#allocation2 + $0x47] sm:$0xff] }
 0x127   : > { %v655_v41 = vadd.f32 %v5127_v20, %v654_v38  ;;  %v1857_v38 = vld [vmem:[#allocation2 + $0x4f] sm:$0xff] }
 0x128   : > { %v586_v46 = vpop.f32.mrf.mxu0  ;;  %v1908_v7 = vpack.c.bf16 %v1857_v38, %v1856_v23 }
 0x129   : > { %v725_v47 = vmax.f32 %v655_v41, 0.0  ;;  %v587_v49 = vadd.f32 %v5127_v20, %v586_v46 }
 0x12b   : > { %781 = vst.msk [vmem:[#allocation2 + $0x170] sm:$0xff] %vm445_vm0, %v725_v47  ;;  %v698_v56 = vmax.f32 %v587_v49, 0.0 }
 0x12c   : > { %v5383_v60 = vpop.f32.mrf.mxu1  ;;  %v898_v61 = vld [vmem:[#allocation2 + $0x89] sm:$0xff] }
 0x12d   : > { %v5385_v3 = vld [vmem:[#allocation2 + $0x90] sm:$0xff]  ;;  %754 = vst.msk [vmem:[#allocation2 + $0x98] sm:$0xff] %vm445_vm0, %v698_v56  ;;  %v945_v10 = vpack.c.bf16 %v898_v61, %v897_v52  ;;  %v925_v56 = vld [vmem:[#allocation2 + $0x161] sm:$0xff] }
 0x12e   : > { %v656_v21 = vpop.f32.mrf.mxu2 }
 0x12f   : > { %v657_v41 = vadd.f32 %v5127_v20, %v656_v21  ;;  %4638 = vmatmul.msk.bf16.gmra.mxu1 %vm445_vm0, %v945_v10  ;;  %v5400_v21 = vld [vmem:[#allocation2 + $0x168] sm:$0xff] }
 0x130   : > { %v589_v46 = vpop.f32.mrf.mxu0 }
 0x131   : > { %v726_v47 = vmax.f32 %v657_v41, 0.0  ;;  %v590_v49 = vadd.f32 %v5127_v20, %v589_v46 }
 0x132   : > { %v926_v52 = vld [vmem:[#allocation2 + $0x169] sm:$0xff] }
 0x133   : > { %v5395_v61 = vld [vmem:[#allocation2 + $0x170] sm:$0xff]  ;;  %782 = vst.msk [vmem:[#allocation2 + $0x178] sm:$0xff] %vm445_vm0, %v726_v47  ;;  %v699_v2 = vmax.f32 %v590_v49, 0.0  ;;  %4670 = vmatmul.msk.bf16.gmra.mxu2 %vm445_vm0, %v853_v36  ;;  %4742 = vmatmul.msk.bf16.gmra.mxu0 %vm445_vm0, %v1908_v7  ;;  %v959_v10 = vpack.c.bf16 %v926_v52, %v925_v56 }
 0x134   : > { %6997 = vst [vmem:[#allocation14_spill] sm:$0xff] %v5395_v61  ;;  %v5402_v41 = vpop.f32.mrf.mxu1  ;;  %v899_v56 = vld [vmem:[#allocation2 + $0x91] sm:$0xff] }
 0x135   : > { %755 = vst.msk [vmem:[#allocation2 + $0xa0] sm:$0xff] %vm445_vm0, %v699_v2  ;;  %4652 = vmatmul.msk.bf16.gmra.mxu3 %vm445_vm0, %v959_v10  ;;  %v5412_v52 = vld [vmem:[#allocation2 + $0x98] sm:$0xff] }
 0x136   : > { %v659_v23 = vpop.f32.mrf.mxu2 }
 0x137   : > { %v660_v38 = vadd.f32 %v5127_v20, %v659_v23 }
 0x138   : > { %v591_v47 = vpop.f32.mrf.mxu0  ;;  %v5409_v49 = vpop.f32.mrf.mxu3 }
 0x139   : > { %6998 = vst [vmem:[#allocation15_spill] sm:$0xff] %v5409_v49  ;;  %v727_v36 = vmax.f32 %v660_v38, 0.0  ;;  %v592_v7 = vadd.f32 %v5127_v20, %v591_v47  ;;  %v1859_v47 = vld [vmem:[#allocation2 + $0x5f] sm:$0xff] }
 0x13b   : > { %783 = vst.msk [vmem:[#allocation2 + $0x180] sm:$0xff] %vm445_vm0, %v727_v36  ;;  %v700_v18 = vmax.f32 %v592_v7, 0.0 }
 0x13c   : > { %v5415_v46 = vpop.f32.mrf.mxu1  ;;  %v900_v2 = vld [vmem:[#allocation2 + $0x99] sm:$0xff] }
 0x13d   : > { %v5417_v35 = vld [vmem:[#allocation2 + $0xa0] sm:$0xff]  ;;  %756 = vst.msk [vmem:[#allocation2 + $0xa8] sm:$0xff] %vm445_vm0, %v700_v18  ;;  %v946_v10 = vpack.c.bf16 %v900_v2, %v899_v56  ;;  %v854_v18 = vpack.c.bf16 %v5296_v26, %v5274_v48  ;;  %v1909_v56 = vpack.c.bf16 %v1859_v47, %v1858_v63  ;;  %v927_v2 = vld [vmem:[#allocation2 + $0x171] sm:$0xff] }
 0x13e   : > { %v661_v38 = vpop.f32.mrf.mxu2 }
 0x13f   : > { %v662_v32 = vadd.f32 %v5127_v20, %v661_v38  ;;  %4639 = vmatmul.msk.bf16.gmra.mxu1 %vm445_vm0, %v946_v10  ;;  %v5434_v38 = vld [vmem:[#allocation2 + $0x178] sm:$0xff] }
 0x140   : > { %v594_v36 = vpop.f32.mrf.mxu0  ;;  %v5424_v7 = vpop.f32.mrf.mxu3  ;;  %7001 = vst [vmem:[#allocation18_spill] sm:$0xff] %v5434_v38 }
 0x141   : > { %6999 = vst [vmem:[#allocation16_spill] sm:$0xff] %v5424_v7  ;;  %v728_v5 = vmax.f32 %v662_v32, 0.0  ;;  %v595_v11 = vadd.f32 %v5127_v20, %v594_v36 }
 0x142   : > { %v928_v43 = vld [vmem:[#allocation2 + $0x179] sm:$0xff] }
 0x143   : > { %v5429_v23 = vld [vmem:[#allocation2 + $0x180] sm:$0xff]  ;;  %784 = vst.msk [vmem:[#allocation2 + $0x188] sm:$0xff] %vm445_vm0, %v728_v5  ;;  %v701_v30 = vmax.f32 %v595_v11, 0.0  ;;  %4671 = vmatmul.msk.bf16.gmra.mxu2 %vm445_vm0, %v854_v18  ;;  %4743 = vmatmul.msk.bf16.gmra.mxu0 %vm445_vm0, %v1909_v56  ;;  %v960_v10 = vpack.c.bf16 %v928_v43, %v927_v2 }
 0x144   : > { %7000 = vst [vmem:[#allocation17_spill] sm:$0xff] %v5429_v23  ;;  %v5436_v32 = vpop.f32.mrf.mxu1  ;;  %v901_v56 = vld [vmem:[#allocation2 + $0xa1] sm:$0xff] }
 0x145   : > { %757 = vst.msk [vmem:[#allocation2 + $0xb0] sm:$0xff] %vm445_vm0, %v701_v30  ;;  %4653 = vmatmul.msk.bf16.gmra.mxu3 %vm445_vm0, %v960_v10  ;;  %v5446_v2 = vld [vmem:[#allocation2 + $0xa8] sm:$0xff] }
 0x146   : > { %v664_v63 = vpop.f32.mrf.mxu2 }
 0x147   : > { %v665_v5 = vadd.f32 %v5127_v20, %v664_v63 }
 0x148   : > { %v596_v11 = vpop.f32.mrf.mxu0  ;;  %v5443_v47 = vpop.f32.mrf.mxu3 }
 0x149   : > { %7002 = vst [vmem:[#allocation19_spill] sm:$0xff] %v5443_v47  ;;  %v729_v18 = vmax.f32 %v665_v5, 0.0  ;;  %v597_v43 = vadd.f32 %v5127_v20, %v596_v11  ;;  %v1861_v11 = vld [vmem:[#allocation2 + $0x6f] sm:$0xff] }
 0x14b   : > { %785 = vst.msk [vmem:[#allocation2 + $0x190] sm:$0xff] %vm445_vm0, %v729_v18  ;;  %v702_v37 = vmax.f32 %v597_v43, 0.0 }
 0x14c   : > { %v5449_v36 = vpop.f32.mrf.mxu1  ;;  %v902_v30 = vld [vmem:[#allocation2 + $0xa9] sm:$0xff] }
 0x14d   : > { %v5451_v51 = vld [vmem:[#allocation2 + $0xb0] sm:$0xff]  ;;  %758 = vst.msk [vmem:[#allocation2 + $0xb8] sm:$0xff] %vm445_vm0, %v702_v37  ;;  %v947_v10 = vpack.c.bf16 %v902_v30, %v901_v56  ;;  %v855_v37 = vpack.c.bf16 %v5325_v22, %v5299_v33  ;;  %v1910_v56 = vpack.c.bf16 %v1861_v11, %v1860_v16  ;;  %v929_v30 = vld [vmem:[#allocation2 + $0x181] sm:$0xff] }
 0x14e   : > { %v666_v5 = vpop.f32.mrf.mxu2 }
 0x14f   : > { %v667_v44 = vadd.f32 %v5127_v20, %v666_v5  ;;  %4640 = vmatmul.msk.bf16.gmra.mxu1 %vm445_vm0, %v947_v10  ;;  %v5468_v5 = vld [vmem:[#allocation2 + $0x188] sm:$0xff] }
 0x150   : > { %v599_v18 = vpop.f32.mrf.mxu0  ;;  %v5458_v43 = vpop.f32.mrf.mxu3  ;;  %7005 = vst [vmem:[#allocation22_spill] sm:$0xff] %v5468_v5 }
 0x151   : > { %7003 = vst [vmem:[#allocation20_spill] sm:$0xff] %v5458_v43  ;;  %v730_v17 = vmax.f32 %v667_v44, 0.0  ;;  %v600_v55 = vadd.f32 %v5127_v20, %v599_v18  ;;  %v5031_v18 = vmov 0.0  }
 0x152   : > { %v930_v47 = vld [vmem:[#allocation2 + $0x189] sm:$0xff]  ;;  %791 = vst.msk [vmem:[#allocation2 + $0x1c0] sm:$0xff] %vm445_vm0, %v5031_v18 }
 0x153   : > { %v5463_v63 = vld [vmem:[#allocation2 + $0x190] sm:$0xff]  ;;  %786 = vst.msk [vmem:[#allocation2 + $0x198] sm:$0xff] %vm445_vm0, %v730_v17  ;;  %v703_v7 = vmax.f32 %v600_v55, 0.0  ;;  %4672 = vmatmul.msk.bf16.gmra.mxu2 %vm445_vm0, %v855_v37  ;;  %4744 = vmatmul.msk.bf16.gmra.mxu0 %vm445_vm0, %v1910_v56  ;;  %v961_v10 = vpack.c.bf16 %v930_v47, %v929_v30 }
 0x154   : > { %7004 = vst [vmem:[#allocation21_spill] sm:$0xff] %v5463_v63  ;;  %v5470_v44 = vpop.f32.mrf.mxu1  ;;  %v903_v30 = vld [vmem:[#allocation2 + $0xb1] sm:$0xff] }
 0x155   : > { %759 = vst.msk [vmem:[#allocation2 + $0xc0] sm:$0xff] %vm445_vm0, %v703_v7  ;;  %4654 = vmatmul.msk.bf16.gmra.mxu3 %vm445_vm0, %v961_v10  ;;  %v5482_v43 = vld [vmem:[#allocation2 + $0xb8] sm:$0xff] }
 0x156   : > { %v669_v55 = vpop.f32.mrf.mxu2  ;;  %792 = vst.msk [vmem:[#allocation2 + $0x1c8] sm:$0xff] %vm445_vm0, %v5031_v18 }
 0x157   : > { %v670_v17 = vadd.f32 %v5127_v20, %v669_v55 }
 0x158   : > { %v601_v47 = vpop.f32.mrf.mxu0  ;;  %v5479_v11 = vpop.f32.mrf.mxu3 }
 0x159   : > { %7006 = vst [vmem:[#allocation23_spill] sm:$0xff] %v5479_v11  ;;  %v731_v37 = vmax.f32 %v670_v17, 0.0  ;;  %v602_v56 = vadd.f32 %v5127_v20, %v601_v47  ;;  %v1862_v11 = vld [vmem:[#allocation2 + $0x77] sm:$0xff]  ;;  %v1863_v47 = vld [vmem:[#allocation2 + $0x7f] sm:$0xff] }
 0x15b   : > { %787 = vst.msk [vmem:[#allocation2 + $0x1a0] sm:$0xff] %vm445_vm0, %v731_v37  ;;  %v704_v16 = vmax.f32 %v602_v56, 0.0 }
 0x15c   : > { %v5485_v7 = vpop.f32.mrf.mxu1  ;;  %v904_v10 = vld [vmem:[#allocation2 + $0xb9] sm:$0xff] }
 0x15d   : > { %v5487_v49 = vld [vmem:[#allocation2 + $0xc0] sm:$0xff]  ;;  %760 = vst.msk [vmem:[#allocation2 + $0xc8] sm:$0xff] %vm445_vm0, %v704_v16  ;;  %v948_v18 = vpack.c.bf16 %v904_v10, %v903_v30  ;;  %v856_v16 = vpack.c.bf16 %v5354_v27, %v5328_v25  ;;  %v1911_v30 = vpack.c.bf16 %v1863_v47, %v1862_v11  ;;  %v931_v10 = vld [vmem:[#allocation2 + $0x191] sm:$0xff] }
 0x15e   : > { %v671_v17 = vpop.f32.mrf.mxu2 }
 0x15f   : > { %v672_v57 = vadd.f32 %v5127_v20, %v671_v17  ;;  %4641 = vmatmul.msk.bf16.gmra.mxu1 %vm445_vm0, %v948_v18  ;;  %v5504_v17 = vld [vmem:[#allocation2 + $0x198] sm:$0xff] }
 0x160   : > { %v604_v37 = vpop.f32.mrf.mxu0  ;;  %v5494_v56 = vpop.f32.mrf.mxu3  ;;  %7009 = vst [vmem:[#allocation26_spill] sm:$0xff] %v5504_v17  ;;  %v857_v17 = vpack.c.bf16 %v5380_v54, %v5357_v40 }
 0x161   : > { %7007 = vst [vmem:[#allocation24_spill] sm:$0xff] %v5494_v56  ;;  %v732_v58 = vmax.f32 %v672_v57, 0.0  ;;  %v605_v8 = vadd.f32 %v5127_v20, %v604_v37 }
 0x162   : > { %v932_v34 = vld [vmem:[#allocation2 + $0x199] sm:$0xff] }
 0x163   : > { %v5499_v55 = vld [vmem:[#allocation2 + $0x1a0] sm:$0xff]  ;;  %788 = vst.msk [vmem:[#allocation2 + $0x1a8] sm:$0xff] %vm445_vm0, %v732_v58  ;;  %v705_v29 = vmax.f32 %v605_v8, 0.0  ;;  %4673 = vmatmul.msk.bf16.gmra.mxu2 %vm445_vm0, %v856_v16  ;;  %4745 = vmatmul.msk.bf16.gmra.mxu0 %vm445_vm0, %v1911_v30  ;;  %v962_v18 = vpack.c.bf16 %v932_v34, %v931_v10 }
 0x164   : > { %7008 = vst [vmem:[#allocation25_spill] sm:$0xff] %v5499_v55  ;;  %v5506_v57 = vpop.f32.mrf.mxu1  ;;  %v905_v30 = vld [vmem:[#allocation2 + $0xc1] sm:$0xff] }
 0x165   : > { %761 = vst.msk [vmem:[#allocation2 + $0xd0] sm:$0xff] %vm445_vm0, %v705_v29  ;;  %4655 = vmatmul.msk.bf16.gmra.mxu3 %vm445_vm0, %v962_v18  ;;  %v5516_v10 = vld [vmem:[#allocation2 + $0xc8] sm:$0xff] }
 0x166   : > { %v674_v11 = vpop.f32.mrf.mxu2 }
 0x167   : > { %v675_v58 = vadd.f32 %v5127_v20, %v674_v11 }
 0x168   : > { %v606_v8 = vpop.f32.mrf.mxu0  ;;  %v5513_v47 = vpop.f32.mrf.mxu3 }
 0x169   : > { %7010 = vst [vmem:[#allocation27_spill] sm:$0xff] %v5513_v47  ;;  %v733_v16 = vmax.f32 %v675_v58, 0.0  ;;  %v607_v34 = vadd.f32 %v5127_v20, %v606_v8  ;;  %v1864_v47 = vld [vmem:[#allocation2 + $0x87] sm:$0xff]  ;;  %v1865_v8 = vld [vmem:[#allocation2 + $0x8f] sm:$0xff] }
 0x16a   : > { %v5534_v63 = vld [vmem:[#allocation2 + $0x1a8] sm:$0xff] }
 0x16b   : > { %789 = vst.msk [vmem:[#allocation2 + $0x1b0] sm:$0xff] %vm445_vm0, %v733_v16  ;;  %v706_v56 = vmax.f32 %v607_v34, 0.0 }
 0x16c   : > { %v5519_v37 = vpop.f32.mrf.mxu1  ;;  %v906_v29 = vld [vmem:[#allocation2 + $0xc9] sm:$0xff]  ;;  %7012 = vst [vmem:[#allocation29_spill] sm:$0xff] %v5534_v63 }
 0x16d   : > { %v5521_v55 = vld [vmem:[#allocation2 + $0xd0] sm:$0xff]  ;;  %762 = vst.msk [vmem:[#allocation2 + $0xd8] sm:$0xff] %vm445_vm0, %v706_v56  ;;  %v949_v18 = vpack.c.bf16 %v906_v29, %v905_v30  ;;  %v1912_v56 = vpack.c.bf16 %v1865_v8, %v1864_v47  ;;  %v933_v30 = vld [vmem:[#allocation2 + $0x1a1] sm:$0xff] }
 0x16e   : > { %v676_v58 = vpop.f32.mrf.mxu2 }
 0x16f   : > { %v677_v62 = vadd.f32 %v5127_v20, %v676_v58  ;;  %4642 = vmatmul.msk.bf16.gmra.mxu1 %vm445_vm0, %v949_v18 }
 0x170   : > { %v5528_v16 = vpop.f32.mrf.mxu3  ;;  %v5530_v34 = vpop.f32.mrf.mxu0 }
 0x171   : > { %7011 = vst [vmem:[#allocation28_spill] sm:$0xff] %v5528_v16  ;;  %v734_v59 = vmax.f32 %v677_v62, 0.0  ;;  %v4989_v62 = vld [vmem:[%s6954_s3 + $0x58] sm:$0xff] }
 0x172   : > { %v934_v29 = vld [vmem:[#allocation2 + $0x1a9] sm:$0xff]  ;;  %2816 = vmatpush.bf16.msra.mxu2 %v4989_v62  ;;  %v1866_v16 = vld [vmem:[#allocation2 + $0x97] sm:$0xff] }
 0x173   : > { %v5536_v11 = vld [vmem:[#allocation2 + $0x1b0] sm:$0xff]  ;;  %790 = vst.msk [vmem:[#allocation2 + $0x1b8] sm:$0xff] %vm445_vm0, %v734_v59  ;;  %4674 = vmatmul.msk.bf16.gmra.mxu2 %vm445_vm0, %v857_v17  ;;  %4746 = vmatmul.msk.bf16.gmra.mxu0 %vm445_vm0, %v1912_v56  ;;  %v963_v20 = vpack.c.bf16 %v934_v29, %v933_v30  ;;  %v4991_v59 = vld [vmem:[%s6954_s3 + $0x68] sm:$0xff] }
 0x174   : > { %7013 = vst [vmem:[#allocation30_spill] sm:$0xff] %v5536_v11  ;;  %v5546_v18 = vpop.f32.mrf.mxu1  ;;  %3205 = vmatpush.bf16.msra.mxu3 %v4991_v59  ;;  %v907_v56 = vld [vmem:[#allocation2 + $0xd1] sm:$0xff]  ;;  %v908_v30 = vld [vmem:[#allocation2 + $0xd9] sm:$0xff]  ;;  %v4995_v59 = vld [vmem:[%s6954_s3 + $0x88] sm:$0xff] }
 0x175   : > { %7014 = vst [vmem:[#allocation31_spill] sm:$0xff] %v5546_v18  ;;  %4656 = vmatmul.msk.bf16.gmra.mxu3 %vm445_vm0, %v963_v20  ;;  %v4993_v20 = vld [vmem:[%s6954_s3 + $0x78] sm:$0xff]  ;;  %v950_v62 = vpack.c.bf16 %v908_v30, %v907_v56  ;;  %v858_v56 = vpack.c.bf16 %v5412_v52, %v5385_v3  ;;  %3983 = vmatpush.bf16.msra.mxu1 %v4995_v59 }
 0x176   : > { %v5552_v17 = vpop.f32.mrf.mxu2  ;;  %v1867_v11 = vld [vmem:[#allocation2 + $0x9f] sm:$0xff]  ;;  %3594 = vmatpush.bf16.msra.mxu0 %v4993_v20  ;;  %v7021_v59 = vpack.c.bf16 %v5164_v53, %v5161_v50 }
 0x177   : > { %v1913_v30 = vpack.c.bf16 %v1867_v11, %v1866_v16  ;;  %v1868_v11 = vld [vmem:[#allocation2 + $0xa7] sm:$0xff]  ;;  %v1869_v16 = vld [vmem:[#allocation2 + $0xaf] sm:$0xff] }
 0x178   : > { %v5554_v58 = vpop.f32.mrf.mxu3  ;;  %v5556_v8 = vpop.f32.mrf.mxu0 }
 0x179   : > { %7015 = vst [vmem:[#allocation32_spill] sm:$0xff] %v5554_v58 }
 0x17a   : > { %v935_v31 = vld [vmem:[#allocation2 + $0x1b1] sm:$0xff]  ;;  %v936_v28 = vld [vmem:[#allocation2 + $0x1b9] sm:$0xff] }
 0x17b   : > { %v964_v20 = vpack.c.bf16 %v936_v28, %v935_v31 }
 0x17c   : > { %v5558_v29 = vpop.f32.mrf.mxu1 }
 0x17d   : > { %7016 = vst [vmem:[#allocation33_spill] sm:$0xff] %v5558_v29 }
 0x17e   : > { %v5563_v47 = vpop.f32.mrf.mxu2 }
 0x17f   : > { %4643 = vmatmul.msk.bf16.gmra.mxu1 %vm445_vm0, %v950_v62 }
 0x180   : > { %v5569_v58 = vpop.f32.mrf.mxu3  ;;  %v5571_v63 = vpop.f32.mrf.mxu0 }
 0x181   : > { %7017 = vst [vmem:[#allocation34_spill] sm:$0xff] %v5569_v58 }
 0x183   : > { %4675 = vmatmul.msk.bf16.gmra.mxu2 %vm445_vm0, %v858_v56  ;;  %4747 = vmatmul.msk.bf16.gmra.mxu0 %vm445_vm0, %v1913_v30  ;;  %v1459_v56 = vld [vmem:[#allocation2 + $0x2] sm:$0xff]  ;;  %v1460_v30 = vld [vmem:[#allocation2 + $0xa] sm:$0xff] }
 0x184   : > { %v5577_v62 = vpop.f32.mrf.mxu1 }
 0x185   : > { %7018 = vst [vmem:[#allocation35_spill] sm:$0xff] %v5577_v62  ;;  %4657 = vmatmul.msk.bf16.gmra.mxu3 %vm445_vm0, %v964_v20  ;;  %v859_v20 = vpack.c.bf16 %v5446_v2, %v5417_v35 }
 0x186   : > { %v5580_v5 = vpop.f32.mrf.mxu2 }
 0x188   : > { %v5582_v58 = vpop.f32.mrf.mxu3  ;;  %v5584_v23 = vpop.f32.mrf.mxu0 }
 0x189   : > { %7019 = vst [vmem:[#allocation36_spill] sm:$0xff] %v5582_v58  ;;  %v1914_v58 = vpack.c.bf16 %v1869_v16, %v1868_v11  ;;  %v1870_v11 = vld [vmem:[#allocation2 + $0xb7] sm:$0xff]  ;;  %v1871_v16 = vld [vmem:[#allocation2 + $0xbf] sm:$0xff] }
 0x18c   : > { %v5586_v4 = vpop.f32.mrf.mxu1 }
 0x18d   : > { %7020 = vst [vmem:[#allocation37_spill] sm:$0xff] %v5586_v4  ;;  %v1515_v4 = vpack.c.bf16 %v1460_v30, %v1459_v56  ;;  %v1461_v30 = vld [vmem:[#allocation2 + $0x12] sm:$0xff] }
 0x18e   : > { %v5588_v1 = vpop.f32.mrf.mxu2 }
 0x18f   : > { %4774 = vmatmul.msk.bf16.vlgmr.msrb.gmra.mxu1 %vm445_vm0, %v7021_v59 }
 0x190   : > { %v5594_v28 = vpop.f32.mrf.mxu3  ;;  %v5596_v31 = vpop.f32.mrf.mxu0 }
 0x191   : > { %7022 = vst [vmem:[#allocation38_spill] sm:$0xff] %v5594_v28 }
 0x193   : > { %4676 = vmatmul.msk.bf16.gmra.mxu2 %vm445_vm0, %v859_v20  ;;  %4748 = vmatmul.msk.bf16.gmra.mxu0 %vm445_vm0, %v1914_v58  ;;  %v7026_v58 = vpack.c.bf16 %v5190_v15, %v5187_v12  ;;  %v1462_v20 = vld [vmem:[#allocation2 + $0x1a] sm:$0xff] }
 0x194   : > { %v5602_v62 = vpop.f32.mrf.mxu1 }
 0x195   : > { %7023 = vst [vmem:[#allocation39_spill] sm:$0xff] %v5602_v62  ;;  %4702 = vmatmul.msk.bf16.vlgmr.msrb.gmra.mxu3 %vm445_vm0, %v1515_v4  ;;  %v1915_v62 = vpack.c.bf16 %v1871_v16, %v1870_v11  ;;  %v1872_v11 = vld [vmem:[#allocation2 + $0xc7] sm:$0xff]  ;;  %v1873_v16 = vld [vmem:[#allocation2 + $0xcf] sm:$0xff] }
 0x196   : > { %v5605_v50 = vpop.f32.mrf.mxu2 }
 0x198   : > { %v5607_v53 = vpop.f32.mrf.mxu3  ;;  %v5609_v59 = vpop.f32.mrf.mxu0 }
 0x199   : > { %7024 = vst [vmem:[#allocation40_spill] sm:$0xff] %v5607_v53  ;;  %v860_v53 = vpack.c.bf16 %v5482_v43, %v5451_v51 }
 0x19c   : > { %v5611_v28 = vpop.f32.mrf.mxu1 }
 0x19d   : > { %7025 = vst [vmem:[#allocation41_spill] sm:$0xff] %v5611_v28  ;;  %v1516_v28 = vpack.c.bf16 %v1462_v20, %v1461_v30  ;;  %v1463_v30 = vld [vmem:[#allocation2 + $0x22] sm:$0xff]  ;;  %v1464_v20 = vld [vmem:[#allocation2 + $0x2a] sm:$0xff] }
 0x19e   : > { %v5613_v29 = vpop.f32.mrf.mxu2 }
 0x19f   : > { %4775 = vmatmul.msk.bf16.gmra.mxu1 %vm445_vm0, %v7026_v58 }
 0x1a0   : > { %v5619_v56 = vpop.f32.mrf.mxu3  ;;  %v5621_v4 = vpop.f32.mrf.mxu0 }
 0x1a1   : > { %7027 = vst [vmem:[#allocation42_spill] sm:$0xff] %v5619_v56 }
 0x1a3   : > { %4677 = vmatmul.msk.bf16.gmra.mxu2 %vm445_vm0, %v860_v53  ;;  %4749 = vmatmul.msk.bf16.gmra.mxu0 %vm445_vm0, %v1915_v62  ;;  %v7031_v62 = vpack.c.bf16 %v5216_v42, %v5213_v39 }
 0x1a4   : > { %v5627_v38 = vpop.f32.mrf.mxu1 }
 0x1a5   : > { %7028 = vst [vmem:[#allocation43_spill] sm:$0xff] %v5627_v38  ;;  %4703 = vmatmul.msk.bf16.gmra.mxu3 %vm445_vm0, %v1516_v28  ;;  %v1916_v38 = vpack.c.bf16 %v1873_v16, %v1872_v11  ;;  %v1874_v11 = vld [vmem:[#allocation2 + $0xd7] sm:$0xff]  ;;  %v1875_v16 = vld [vmem:[#allocation2 + $0xdf] sm:$0xff] }
 0x1a6   : > { %v5630_v12 = vpop.f32.mrf.mxu2 }
 0x1a8   : > { %v5632_v15 = vpop.f32.mrf.mxu3  ;;  %v5634_v58 = vpop.f32.mrf.mxu0 }
 0x1a9   : > { %7029 = vst [vmem:[#allocation44_spill] sm:$0xff] %v5632_v15  ;;  %v861_v15 = vpack.c.bf16 %v5516_v10, %v5487_v49 }
 0x1ac   : > { %v5636_v56 = vpop.f32.mrf.mxu1 }
 0x1ad   : > { %7030 = vst [vmem:[#allocation45_spill] sm:$0xff] %v5636_v56  ;;  %v1517_v56 = vpack.c.bf16 %v1464_v20, %v1463_v30  ;;  %v5673_v30 = vld [vmem:[#allocation2 + $0xd8] sm:$0xff] }
 0x1ae   : > { %v5638_v61 = vpop.f32.mrf.mxu2  ;;  %v1465_v20 = vld [vmem:[#allocation2 + $0x32] sm:$0xff] }
 0x1af   : > { %4776 = vmatmul.msk.bf16.gmra.mxu1 %vm445_vm0, %v7031_v62 }
 0x1b0   : > { %v5644_v53 = vpop.f32.mrf.mxu3  ;;  %v5646_v28 = vpop.f32.mrf.mxu0 }
 0x1b1   : > { %7032 = vst [vmem:[#allocation46_spill] sm:$0xff] %v5644_v53 }
 0x1b2   : > { %7033 = vst [vmem:[#allocation47_spill] sm:$0xff] %v5646_v28 }
 0x1b3   : > { %4678 = vmatmul.msk.bf16.gmra.mxu2 %vm445_vm0, %v861_v15  ;;  %4750 = vmatmul.msk.bf16.gmra.mxu0 %vm445_vm0, %v1916_v38  ;;  %v7039_v38 = vpack.c.bf16 %v5248_v13, %v5245_v9 }
 0x1b4   : > { %v5652_v18 = vpop.f32.mrf.mxu1 }
 0x1b5   : > { %7034 = vst [vmem:[#allocation48_spill] sm:$0xff] %v5652_v18  ;;  %4704 = vmatmul.msk.bf16.gmra.mxu3 %vm445_vm0, %v1517_v56  ;;  %v1917_v18 = vpack.c.bf16 %v1875_v16, %v1874_v11  ;;  %v1877_v11 = vld [vmem:[#allocation2 + $0xef] sm:$0xff]  ;;  %v1876_v16 = vld [vmem:[#allocation2 + $0xe7] sm:$0xff] }
 0x1b6   : > { %v5655_v39 = vpop.f32.mrf.mxu2 }
 0x1b8   : > { %v5657_v42 = vpop.f32.mrf.mxu3  ;;  %v5659_v62 = vpop.f32.mrf.mxu0 }
 0x1b9   : > { %7035 = vst [vmem:[#allocation49_spill] sm:$0xff] %v5657_v42  ;;  %v1466_v42 = vld [vmem:[#allocation2 + $0x3a] sm:$0xff] }
 0x1ba   : > { %7036 = vst [vmem:[#allocation50_spill] sm:$0xff] %v5659_v62  ;;  %v1518_v62 = vpack.c.bf16 %v1466_v42, %v1465_v20  ;;  %v1467_v20 = vld [vmem:[#allocation2 + $0x42] sm:$0xff] }
 0x1bc   : > { %v5661_v53 = vpop.f32.mrf.mxu1 }
 0x1bd   : > { %7037 = vst [vmem:[#allocation51_spill] sm:$0xff] %v5661_v53  ;;  %v862_v53 = vpack.c.bf16 %v5673_v30, %v5521_v55 }
 0x1be   : > { %v5663_v28 = vpop.f32.mrf.mxu2 }
 0x1bf   : > { %7038 = vst [vmem:[#allocation52_spill] sm:$0xff] %v5663_v28  ;;  %4777 = vmatmul.msk.bf16.gmra.mxu1 %vm445_vm0, %v7039_v38 }
 0x1c0   : > { %v5669_v15 = vpop.f32.mrf.mxu3  ;;  %v5671_v56 = vpop.f32.mrf.mxu0 }
 0x1c1   : > { %7040 = vst [vmem:[#allocation53_spill] sm:$0xff] %v5669_v15 }
 0x1c2   : > { %7041 = vst [vmem:[#allocation54_spill] sm:$0xff] %v5671_v56 }
 0x1c3   : > { %4679 = vmatmul.msk.bf16.gmra.mxu2 %vm445_vm0, %v862_v53  ;;  %4751 = vmatmul.msk.bf16.gmra.mxu0 %vm445_vm0, %v1917_v18  ;;  %v7048_v53 = vpack.c.bf16 %v5274_v48, %v5271_v45  ;;  %v5696_v18 = vld [vmem:[#allocation2 + $0xe0] sm:$0xff] }
 0x1c4   : > { %v5679_v9 = vpop.f32.mrf.mxu1 }
 0x1c5   : > { %7042 = vst [vmem:[#allocation55_spill] sm:$0xff] %v5679_v9  ;;  %4705 = vmatmul.msk.bf16.gmra.mxu3 %vm445_vm0, %v1518_v62  ;;  %v5011_v9 = vld [vmem:[#allocation2 + $0xe8] sm:$0xff] }
 0x1c6   : > { %v5682_v13 = vpop.f32.mrf.mxu2 }
 0x1c7   : > { %7043 = vst [vmem:[#allocation56_spill] sm:$0xff] %v5682_v13 }
 0x1c8   : > { %v5684_v38 = vpop.f32.mrf.mxu3  ;;  %v5686_v15 = vpop.f32.mrf.mxu0 }
 0x1c9   : > { %7044 = vst [vmem:[#allocation57_spill] sm:$0xff] %v5684_v38  ;;  %v1468_v38 = vld [vmem:[#allocation2 + $0x4a] sm:$0xff] }
 0x1ca   : > { %7045 = vst [vmem:[#allocation58_spill] sm:$0xff] %v5686_v15  ;;  %v1918_v15 = vpack.c.bf16 %v1877_v11, %v1876_v16  ;;  %v1519_v45 = vpack.c.bf16 %v1468_v38, %v1467_v20  ;;  %v1878_v11 = vld [vmem:[#allocation2 + $0xf7] sm:$0xff] }
 0x1cb   : > { %v1469_v16 = vld [vmem:[#allocation2 + $0x52] sm:$0xff]  ;;  %v1470_v20 = vld [vmem:[#allocation2 + $0x5a] sm:$0xff] }
 0x1cc   : > { %v5688_v56 = vpop.f32.mrf.mxu1 }
 0x1cd   : > { %7046 = vst [vmem:[#allocation59_spill] sm:$0xff] %v5688_v56  ;;  %v863_v56 = vpack.c.bf16 %v5011_v9, %v5696_v18  ;;  %v1879_v9 = vld [vmem:[#allocation2 + $0xff] sm:$0xff] }
 0x1ce   : > { %v5690_v28 = vpop.f32.mrf.mxu2 }
 0x1cf   : > { %7047 = vst [vmem:[#allocation60_spill] sm:$0xff] %v5690_v28  ;;  %4778 = vmatmul.msk.bf16.gmra.mxu1 %vm445_vm0, %v7048_v53 }
 0x1d0   : > { %v5698_v42 = vpop.f32.mrf.mxu3  ;;  %v5700_v62 = vpop.f32.mrf.mxu0 }
 0x1d1   : > { %7049 = vst [vmem:[#allocation61_spill] sm:$0xff] %v5698_v42 }
 0x1d2   : > { %7050 = vst [vmem:[#allocation62_spill] sm:$0xff] %v5700_v62 }
 0x1d3   : > { %4680 = vmatmul.msk.bf16.gmra.mxu2 %vm445_vm0, %v863_v56  ;;  %4752 = vmatmul.msk.bf16.gmra.mxu0 %vm445_vm0, %v1918_v15  ;;  %v7056_v56 = vpack.c.bf16 %v5299_v33, %v5296_v26 }
 0x1d4   : > { %v5705_v48 = vpop.f32.mrf.mxu1 }
 0x1d5   : > { %7051 = vst [vmem:[#allocation63_spill] sm:$0xff] %v5705_v48  ;;  %4706 = vmatmul.msk.bf16.gmra.mxu3 %vm445_vm0, %v1519_v45  ;;  %v5012_v45 = vld [vmem:[#allocation2 + $0xf0] sm:$0xff] }
 0x1d6   : > { %v5708_v53 = vpop.f32.mrf.mxu2 }
 0x1d8   : > { %v5710_v42 = vpop.f32.mrf.mxu3  ;;  %v5712_v62 = vpop.f32.mrf.mxu0 }
 0x1d9   : > { %7052 = vst [vmem:[#allocation64_spill] sm:$0xff] %v5710_v42  ;;  %v5013_v42 = vld [vmem:[#allocation2 + $0xf8] sm:$0xff] }
 0x1da   : > { %7053 = vst [vmem:[#allocation65_spill] sm:$0xff] %v5712_v62  ;;  %v864_v48 = vpack.c.bf16 %v5013_v42, %v5012_v45  ;;  %v1919_v62 = vpack.c.bf16 %v1879_v9, %v1878_v11  ;;  %v1881_v42 = vld [vmem:[#allocation2 + $0x10f] sm:$0xff]  ;;  %v1471_v11 = vld [vmem:[#allocation2 + $0x62] sm:$0xff] }
 0x1db   : > { %v5015_v45 = vld [vmem:[#allocation2 + $0x108] sm:$0xff] }
 0x1dc   : > { %v5714_v28 = vpop.f32.mrf.mxu1 }
 0x1dd   : > { %7054 = vst [vmem:[#allocation66_spill] sm:$0xff] %v5714_v28  ;;  %v1520_v28 = vpack.c.bf16 %v1470_v20, %v1469_v16  ;;  %v1472_v16 = vld [vmem:[#allocation2 + $0x6a] sm:$0xff]  ;;  %v5014_v20 = vld [vmem:[#allocation2 + $0x100] sm:$0xff] }
 0x1de   : > { %v5716_v13 = vpop.f32.mrf.mxu2 }
 0x1df   : > { %7055 = vst [vmem:[#allocation67_spill] sm:$0xff] %v5716_v13  ;;  %4779 = vmatmul.msk.bf16.gmra.mxu1 %vm445_vm0, %v7056_v56 }
 0x1e0   : > { %v5722_v15 = vpop.f32.mrf.mxu3  ;;  %v5724_v38 = vpop.f32.mrf.mxu0 }
 0x1e1   : > { %7057 = vst [vmem:[#allocation68_spill] sm:$0xff] %v5722_v15 }
 0x1e2   : > { %7058 = vst [vmem:[#allocation69_spill] sm:$0xff] %v5724_v38 }
 0x1e3   : > { %4681 = vmatmul.msk.bf16.gmra.mxu2 %vm445_vm0, %v864_v48  ;;  %4753 = vmatmul.msk.bf16.gmra.mxu0 %vm445_vm0, %v1919_v62  ;;  %v7063_v48 = vpack.c.bf16 %v5328_v25, %v5325_v22 }
 0x1e4   : > { %v5728_v13 = vpop.f32.mrf.mxu1 }
 0x1e5   : > { %7059 = vst [vmem:[#allocation70_spill] sm:$0xff] %v5728_v13  ;;  %4707 = vmatmul.msk.bf16.gmra.mxu3 %vm445_vm0, %v1520_v28  ;;  %v1880_v28 = vld [vmem:[#allocation2 + $0x107] sm:$0xff] }
 0x1e6   : > { %v5731_v26 = vpop.f32.mrf.mxu2  ;;  %v1920_v13 = vpack.c.bf16 %v1881_v42, %v1880_v28  ;;  %v1883_v42 = vld [vmem:[#allocation2 + $0x11f] sm:$0xff] }
 0x1e8   : > { %v5733_v33 = vpop.f32.mrf.mxu3  ;;  %v5735_v56 = vpop.f32.mrf.mxu0 }
 0x1e9   : > { %7060 = vst [vmem:[#allocation71_spill] sm:$0xff] %v5733_v33  ;;  %v865_v33 = vpack.c.bf16 %v5015_v45, %v5014_v20  ;;  %v5016_v20 = vld [vmem:[#allocation2 + $0x110] sm:$0xff]  ;;  %v5017_v45 = vld [vmem:[#allocation2 + $0x118] sm:$0xff] }
 0x1ea   : > { %7061 = vst [vmem:[#allocation72_spill] sm:$0xff] %v5735_v56 }
 0x1ec   : > { %v5737_v15 = vpop.f32.mrf.mxu1 }
 0x1ed   : > { %7062 = vst [vmem:[#allocation73_spill] sm:$0xff] %v5737_v15  ;;  %v1521_v15 = vpack.c.bf16 %v1472_v16, %v1471_v11  ;;  %v1473_v11 = vld [vmem:[#allocation2 + $0x72] sm:$0xff]  ;;  %v1474_v16 = vld [vmem:[#allocation2 + $0x7a] sm:$0xff] }
 0x1ee   : > { %v5739_v38 = vpop.f32.mrf.mxu2 }
 0x1ef   : > { %4780 = vmatmul.msk.bf16.gmra.mxu1 %vm445_vm0, %v7063_v48 }
 0x1f0   : > { %v5745_v62 = vpop.f32.mrf.mxu3  ;;  %v5747_v9 = vpop.f32.mrf.mxu0 }
 0x1f1   : > { %7064 = vst [vmem:[#allocation74_spill] sm:$0xff] %v5745_v62 }
 0x1f2   : > { %7065 = vst [vmem:[#allocation75_spill] sm:$0xff] %v5747_v9 }
 0x1f3   : > { %4682 = vmatmul.msk.bf16.gmra.mxu2 %vm445_vm0, %v865_v33  ;;  %4754 = vmatmul.msk.bf16.gmra.mxu0 %vm445_vm0, %v1920_v13  ;;  %v7070_v33 = vpack.c.bf16 %v5357_v40, %v5354_v27 }
 0x1f4   : > { %v5751_v56 = vpop.f32.mrf.mxu1 }
 0x1f5   : > { %7066 = vst [vmem:[#allocation76_spill] sm:$0xff] %v5751_v56  ;;  %4708 = vmatmul.msk.bf16.gmra.mxu3 %vm445_vm0, %v1521_v15  ;;  %v1882_v15 = vld [vmem:[#allocation2 + $0x117] sm:$0xff] }
 0x1f6   : > { %v5754_v22 = vpop.f32.mrf.mxu2  ;;  %v1921_v56 = vpack.c.bf16 %v1883_v42, %v1882_v15  ;;  %v1475_v15 = vld [vmem:[#allocation2 + $0x82] sm:$0xff] }
 0x1f8   : > { %v5756_v25 = vpop.f32.mrf.mxu3  ;;  %v5758_v48 = vpop.f32.mrf.mxu0 }
 0x1f9   : > { %7067 = vst [vmem:[#allocation77_spill] sm:$0xff] %v5756_v25  ;;  %v866_v25 = vpack.c.bf16 %v5017_v45, %v5016_v20  ;;  %v1885_v20 = vld [vmem:[#allocation2 + $0x12f] sm:$0xff] }
 0x1fa   : > { %7068 = vst [vmem:[#allocation78_spill] sm:$0xff] %v5758_v48 }
 0x1fc   : > { %v5760_v62 = vpop.f32.mrf.mxu1 }
 0x1fd   : > { %7069 = vst [vmem:[#allocation79_spill] sm:$0xff] %v5760_v62  ;;  %v1522_v62 = vpack.c.bf16 %v1474_v16, %v1473_v11  ;;  %v1476_v11 = vld [vmem:[#allocation2 + $0x8a] sm:$0xff]  ;;  %v5018_v16 = vld [vmem:[#allocation2 + $0x120] sm:$0xff] }
 0x1fe   : > { %v5762_v9 = vpop.f32.mrf.mxu2  ;;  %v867_v45 = vpack.c.bf16 %v5288_v14, %v5018_v16 }
 0x1ff   : > { %4781 = vmatmul.msk.bf16.gmra.mxu1 %vm445_vm0, %v7070_v33 }
 0x200   : > { %v5768_v13 = vpop.f32.mrf.mxu3  ;;  %v5770_v28 = vpop.f32.mrf.mxu0 }
 0x201   : > { %7071 = vst [vmem:[#allocation80_spill] sm:$0xff] %v5768_v13 }
 0x202   : > { %7072 = vst [vmem:[#allocation81_spill] sm:$0xff] %v5770_v28 }
 0x203   : > { %4683 = vmatmul.msk.bf16.gmra.mxu2 %vm445_vm0, %v866_v25  ;;  %4755 = vmatmul.msk.bf16.gmra.mxu0 %vm445_vm0, %v1921_v56  ;;  %v7076_v25 = vpack.c.bf16 %v5385_v3, %v5380_v54  ;;  %v1320_v3 = vadd.f32 %v5552_v17, %v5383_v60 }
 0x204   : > { %v5774_v48 = vpop.f32.mrf.mxu1 }
 0x205   : > { %7073 = vst [vmem:[#allocation82_spill] sm:$0xff] %v5774_v48  ;;  %4709 = vmatmul.msk.bf16.gmra.mxu3 %vm445_vm0, %v1522_v62  ;;  %v1884_v62 = vld [vmem:[#allocation2 + $0x127] sm:$0xff]  ;;  %v1523_v48 = vpack.c.bf16 %v1476_v11, %v1475_v15  ;;  %v7080_v15 = vpack.c.bf16 %v5417_v35, %v5412_v52  ;;  %v1886_v11 = vld [vmem:[#allocation2 + $0x137] sm:$0xff] }
 0x206   : > { %v5777_v27 = vpop.f32.mrf.mxu2 }
 0x208   : > { %v5779_v40 = vpop.f32.mrf.mxu3  ;;  %v5781_v33 = vpop.f32.mrf.mxu0 }
 0x209   : > { %7074 = vst [vmem:[#allocation83_spill] sm:$0xff] %v5779_v40  ;;  %v1922_v40 = vpack.c.bf16 %v1885_v20, %v1884_v62 }
 0x20a   : > { %7075 = vst [vmem:[#allocation84_spill] sm:$0xff] %v5781_v33 }
 0x20c   : > { %v2430_v13 = vpop.f32.mrf.mxu1 }
 0x20e   : > { %v5783_v28 = vpop.f32.mrf.mxu2 }
 0x20f   : > { %4782 = vmatmul.msk.bf16.gmra.mxu1 %vm445_vm0, %v7076_v25 }
 0x210   : > { %v5789_v56 = vpop.f32.mrf.mxu3  ;;  %v5791_v42 = vpop.f32.mrf.mxu0 }
 0x211   : > { %7077 = vst [vmem:[#allocation85_spill] sm:$0xff] %v5789_v56 }
 0x212   : > { %7078 = vst [vmem:[#allocation86_spill] sm:$0xff] %v5791_v42 }
 0x213   : > { %4684 = vmatmul.msk.bf16.gmra.mxu2 %vm445_vm0, %v867_v45  ;;  %4756 = vmatmul.msk.bf16.gmra.mxu0 %vm445_vm0, %v1922_v40  ;;  %v1887_v40 = vld [vmem:[#allocation2 + $0x13f] sm:$0xff] }
 0x214   : > { %v2432_v33 = vpop.f32.mrf.mxu1 }
 0x215   : > { %4710 = vmatmul.msk.bf16.gmra.mxu3 %vm445_vm0, %v1523_v48  ;;  %v1322_v48 = vadd.f32 %v5563_v47, %v5402_v41 }
 0x216   : > { %v5797_v54 = vpop.f32.mrf.mxu2 }
 0x218   : > { %v1652_v25 = vpop.f32.mrf.mxu3  ;;  %v5801_v56 = vpop.f32.mrf.mxu0 }
 0x219   : > { %v1792_v42 = vadd.f32 %v1652_v25, %v1320_v3  ;;  %v1477_v3 = vld [vmem:[#allocation2 + $0x92] sm:$0xff] }
 0x21b   : > { %v2181_v16 = vadd.f32 %v5530_v34, %v1792_v42  ;;  %v1478_v34 = vld [vmem:[#allocation2 + $0x9a] sm:$0xff] }
 0x21c   : > { %v2435_v20 = vpop.f32.mrf.mxu1  ;;  %v1524_v35 = vpack.c.bf16 %v1478_v34, %v1477_v3  ;;  %v1889_v34 = vld [vmem:[#allocation2 + $0x14f] sm:$0xff] }
 0x21d   : > { %v5804_v62 = vadd.f32 %v2430_v13, %v2181_v16  ;;  %v5019_v13 = vld [vmem:[#allocation2 + $0x130] sm:$0xff]  ;;  %v1923_v16 = vpack.c.bf16 %v1887_v40, %v1886_v11 }
 0x21e   : > { %v5806_v45 = vpop.f32.mrf.mxu2  ;;  %v868_v25 = vpack.c.bf16 %v5314_v0, %v5019_v13  ;;  %v1888_v13 = vld [vmem:[#allocation2 + $0x147] sm:$0xff] }
 0x21f   : > { %7079 = vst [vmem:[#allocation87_spill] sm:$0xff] %v5804_v62  ;;  %4783 = vmatmul.msk.bf16.gmra.mxu1 %vm445_vm0, %v7080_v15 }
 0x220   : > { %v1654_v60 = vpop.f32.mrf.mxu3  ;;  %v5814_v17 = vpop.f32.mrf.mxu0 }
 0x221   : > { %v1793_v42 = vadd.f32 %v1654_v60, %v1322_v48  ;;  %v1325_v48 = vadd.f32 %v5580_v5, %v5415_v46 }
 0x223   : > { %v2182_v62 = vadd.f32 %v5556_v8, %v1793_v42  ;;  %4685 = vmatmul.msk.bf16.gmra.mxu2 %vm445_vm0, %v868_v25  ;;  %4757 = vmatmul.msk.bf16.gmra.mxu0 %vm445_vm0, %v1923_v16  ;;  %v1479_v25 = vld [vmem:[#allocation2 + $0xa2] sm:$0xff] }
 0x224   : > { %v2437_v41 = vpop.f32.mrf.mxu1 }
 0x225   : > { %4711 = vmatmul.msk.bf16.gmra.mxu3 %vm445_vm0, %v1524_v35  ;;  %v5821_v52 = vadd.f32 %v2432_v33, %v2182_v62  ;;  %v1327_v33 = vadd.f32 %v5588_v1, %v5436_v32  ;;  %v7083_v62 = vpack.c.bf16 %v5451_v51, %v5446_v2 }
 0x226   : > { %v5823_v47 = vpop.f32.mrf.mxu2 }
 0x227   : > { %7081 = vst [vmem:[#allocation88_spill] sm:$0xff] %v5821_v52 }
 0x228   : > { %v1657_v15 = vpop.f32.mrf.mxu3  ;;  %v5827_v60 = vpop.f32.mrf.mxu0 }
 0x229   : > { %v1794_v40 = vadd.f32 %v1657_v15, %v1325_v48  ;;  %v1924_v48 = vpack.c.bf16 %v1889_v34, %v1888_v13 }
 0x22b   : > { %v2183_v8 = vadd.f32 %v5571_v63, %v1794_v40  ;;  %v1480_v63 = vld [vmem:[#allocation2 + $0xaa] sm:$0xff]  ;;  %v1330_v40 = vadd.f32 %v5605_v50, %v5449_v36 }
 0x22c   : > { %v2440_v11 = vpop.f32.mrf.mxu1  ;;  %v1525_v1 = vpack.c.bf16 %v1480_v63, %v1479_v25  ;;  %v1891_v25 = vld [vmem:[#allocation2 + $0x15f] sm:$0xff]  ;;  %v7086_v63 = vpack.c.bf16 %v5487_v49, %v5482_v43 }
 0x22d   : > { %v5830_v42 = vadd.f32 %v2435_v20, %v2183_v8  ;;  %v5020_v20 = vld [vmem:[#allocation2 + $0x140] sm:$0xff] }
 0x22e   : > { %v5832_v3 = vpop.f32.mrf.mxu2  ;;  %v869_v35 = vpack.c.bf16 %v5346_v6, %v5020_v20  ;;  %v1481_v20 = vld [vmem:[#allocation2 + $0xb2] sm:$0xff] }
 0x22f   : > { %7082 = vst [vmem:[#allocation89_spill] sm:$0xff] %v5830_v42  ;;  %4784 = vmatmul.msk.bf16.gmra.mxu1 %vm445_vm0, %v7083_v62  ;;  %v7123_v42 = vld [vmem:[#allocation65_spill] sm:$0xff] }
 0x230   : > { %v1659_v46 = vpop.f32.mrf.mxu3  ;;  %v5840_v5 = vpop.f32.mrf.mxu0 }
 0x231   : > { %v1795_v16 = vadd.f32 %v1659_v46, %v1327_v33 }
 0x233   : > { %v2184_v15 = vadd.f32 %v5584_v23, %v1795_v16  ;;  %4686 = vmatmul.msk.bf16.gmra.mxu2 %vm445_vm0, %v869_v35  ;;  %4758 = vmatmul.msk.bf16.gmra.mxu0 %vm445_vm0, %v1924_v48  ;;  %v1890_v16 = vld [vmem:[#allocation2 + $0x157] sm:$0xff] }
 0x234   : > { %v2442_v51 = vpop.f32.mrf.mxu1 }
 0x235   : > { %4712 = vmatmul.msk.bf16.gmra.mxu3 %vm445_vm0, %v1525_v1  ;;  %v5847_v32 = vadd.f32 %v2437_v41, %v2184_v15  ;;  %v1332_v41 = vadd.f32 %v5613_v29, %v5470_v44  ;;  %v1925_v15 = vpack.c.bf16 %v1891_v25, %v1890_v16  ;;  %v7089_v16 = vpack.c.bf16 %v5521_v55, %v5516_v10  ;;  %v4988_v55 = vld [vmem:[%s6954_s3 + $0x50] sm:$0xff]  ;;  %v4990_v10 = vld [vmem:[%s6954_s3 + $0x60] sm:$0xff] }
 0x236   : > { %v5849_v2 = vpop.f32.mrf.mxu2  ;;  %2817 = vmatpush.bf16.msra.mxu2 %v4988_v55  ;;  %3206 = vmatpush.bf16.msra.mxu3 %v4990_v10 }
 0x237   : > { %7084 = vst [vmem:[#allocation90_spill] sm:$0xff] %v5847_v32  ;;  %v1489_v32 = vld [vmem:[#allocation2 + $0xf2] sm:$0xff] }
 0x238   : > { %v1662_v8 = vpop.f32.mrf.mxu3  ;;  %v5853_v33 = vpop.f32.mrf.mxu0 }
 0x239   : > { %v1796_v34 = vadd.f32 %v1662_v8, %v1330_v40  ;;  %v1335_v40 = vadd.f32 %v5630_v12, %v5485_v7 }
 0x23b   : > { %v2185_v23 = vadd.f32 %v5596_v31, %v1796_v34  ;;  %v1482_v31 = vld [vmem:[#allocation2 + $0xba] sm:$0xff] }
 0x23c   : > { %v2445_v62 = vpop.f32.mrf.mxu1  ;;  %v1526_v49 = vpack.c.bf16 %v1482_v31, %v1481_v20  ;;  %v1892_v20 = vld [vmem:[#allocation2 + $0x167] sm:$0xff] }
 0x23d   : > { %v5856_v46 = vadd.f32 %v2440_v11, %v2185_v23  ;;  %v5021_v11 = vld [vmem:[#allocation2 + $0x150] sm:$0xff]  ;;  %v1483_v31 = vld [vmem:[#allocation2 + $0xc2] sm:$0xff] }
 0x23e   : > { %v5858_v13 = vpop.f32.mrf.mxu2  ;;  %v870_v48 = vpack.c.bf16 %v5372_v24, %v5021_v11 }
 0x23f   : > { %7085 = vst [vmem:[#allocation91_spill] sm:$0xff] %v5856_v46  ;;  %4785 = vmatmul.msk.bf16.gmra.mxu1 %vm445_vm0, %v7086_v63 }
 0x240   : > { %v1664_v36 = vpop.f32.mrf.mxu3  ;;  %v5866_v50 = vpop.f32.mrf.mxu0 }
 0x241   : > { %v1797_v35 = vadd.f32 %v1664_v36, %v1332_v41  ;;  %v1893_v36 = vld [vmem:[#allocation2 + $0x16f] sm:$0xff] }
 0x242   : > { %v1926_v11 = vpack.c.bf16 %v1893_v36, %v1892_v20  ;;  %v7094_v20 = vld [vmem:[#allocation52_spill] sm:$0xff] }
 0x243   : > { %v2186_v1 = vadd.f32 %v5609_v59, %v1797_v35  ;;  %4687 = vmatmul.msk.bf16.gmra.mxu2 %vm445_vm0, %v870_v48  ;;  %4759 = vmatmul.msk.bf16.gmra.mxu0 %vm445_vm0, %v1925_v15 }
 0x244   : > { %v2447_v43 = vpop.f32.mrf.mxu1 }
 0x245   : > { %4713 = vmatmul.msk.bf16.gmra.mxu3 %vm445_vm0, %v1526_v49  ;;  %v5873_v44 = vadd.f32 %v2442_v51, %v2186_v1  ;;  %v1337_v51 = vadd.f32 %v5638_v61, %v5506_v57  ;;  %v1340_v1 = vadd.f32 %v5655_v39, %v5519_v37  ;;  %v1895_v37 = vld [vmem:[#allocation2 + $0x17f] sm:$0xff]  ;;  %v7093_v39 = vld [vmem:[#allocation31_spill] sm:$0xff] }
 0x246   : > { %v5875_v29 = vpop.f32.mrf.mxu2 }
 0x247   : > { %7087 = vst [vmem:[#allocation92_spill] sm:$0xff] %v5873_v44 }
 0x248   : > { %v1667_v8 = vpop.f32.mrf.mxu3  ;;  %v5879_v34 = vpop.f32.mrf.mxu0 }
 0x249   : > { %v1798_v23 = vadd.f32 %v1667_v8, %v1335_v40 }
 0x24b   : > { %v2187_v59 = vadd.f32 %v5621_v4, %v1798_v23  ;;  %v1484_v4 = vld [vmem:[#allocation2 + $0xca] sm:$0xff] }
 0x24c   : > { %v2450_v25 = vpop.f32.mrf.mxu1  ;;  %v1527_v61 = vpack.c.bf16 %v1484_v4, %v1483_v31  ;;  %v7091_v23 = vld [vmem:[#allocation47_spill] sm:$0xff]  ;;  %v1342_v31 = vadd.f32 %v7094_v20, %v7093_v39  ;;  %v4994_v4 = vld [vmem:[%s6954_s3 + $0x80] sm:$0xff]  ;;  %v7100_v39 = vld [vmem:[#allocation56_spill] sm:$0xff] }
 0x24d   : > { %v5882_v41 = vadd.f32 %v2445_v62, %v2187_v59  ;;  %v871_v62 = vpack.c.bf16 %v5400_v21, %v5367_v19  ;;  %3984 = vmatpush.bf16.msra.mxu1 %v4994_v4 }
 0x24e   : > { %v5884_v63 = vpop.f32.mrf.mxu2 }
 0x24f   : > { %7088 = vst [vmem:[#allocation93_spill] sm:$0xff] %v5882_v41  ;;  %4786 = vmatmul.msk.bf16.gmra.mxu1 %vm445_vm0, %v7089_v16 }
 0x250   : > { %v1669_v7 = vpop.f32.mrf.mxu3  ;;  %v5892_v12 = vpop.f32.mrf.mxu0 }
 0x251   : > { %v1799_v35 = vadd.f32 %v1669_v7, %v1337_v51  ;;  %v4992_v51 = vld [vmem:[%s6954_s3 + $0x70] sm:$0xff] }
 0x252   : > { %3595 = vmatpush.bf16.msra.mxu0 %v4992_v51 }
 0x253   : > { %v2188_v48 = vadd.f32 %v5634_v58, %v1799_v35  ;;  %4688 = vmatmul.msk.bf16.gmra.mxu2 %vm445_vm0, %v871_v62  ;;  %4760 = vmatmul.msk.bf16.gmra.mxu0 %vm445_vm0, %v1926_v11  ;;  %v1894_v11 = vld [vmem:[#allocation2 + $0x177] sm:$0xff] }
 0x254   : > { %v2452_v57 = vpop.f32.mrf.mxu1  ;;  %v1927_v10 = vpack.c.bf16 %v1895_v37, %v1894_v11 }
 0x255   : > { %4714 = vmatmul.msk.bf16.gmra.mxu3 %vm445_vm0, %v1527_v61  ;;  %v5906_v15 = vadd.f32 %v2447_v43, %v2188_v48  ;;  %v2306_v43 = vpack.c.bf16 %v5696_v18, %v5673_v30  ;;  %v1485_v30 = vld [vmem:[#allocation2 + $0xd2] sm:$0xff]  ;;  %v1486_v18 = vld [vmem:[#allocation2 + $0xda] sm:$0xff]  ;;  %v7095_v48 = vld [vmem:[#allocation14_spill] sm:$0xff] }
 0x256   : > { %v5908_v58 = vpop.f32.mrf.mxu2  ;;  %v7096_v61 = vld [vmem:[#allocation18_spill] sm:$0xff] }
 0x257   : > { %7090 = vst [vmem:[#allocation94_spill] sm:$0xff] %v5906_v15  ;;  %v872_v55 = vpack.c.bf16 %v7096_v61, %v7095_v48  ;;  %v7110_v15 = vld [vmem:[#allocation58_spill] sm:$0xff] }
 0x258   : > { %v1672_v49 = vpop.f32.mrf.mxu3  ;;  %v5912_v40 = vpop.f32.mrf.mxu0 }
 0x259   : > { %v1800_v8 = vadd.f32 %v1672_v49, %v1340_v1  ;;  %v7097_v1 = vld [vmem:[#allocation50_spill] sm:$0xff] }
 0x25b   : > { %v2189_v59 = vadd.f32 %v7091_v23, %v1800_v8  ;;  %v1528_v8 = vpack.c.bf16 %v1486_v18, %v1485_v30  ;;  %v1897_v18 = vld [vmem:[#allocation2 + $0x18f] sm:$0xff] }
 0x25c   : > { %v2455_v36 = vpop.f32.mrf.mxu1 }
 0x25d   : > { %v5920_v16 = vadd.f32 %v2450_v25, %v2189_v59 }
 0x25e   : > { %v5922_v7 = vpop.f32.mrf.mxu2 }
 0x25f   : > { %7092 = vst [vmem:[#allocation47_spill] sm:$0xff] %v5920_v16  ;;  %4787 = vmatmul.msk.bf16.gmra.mxu1 %vm445_vm0, %v2306_v43  ;;  %v7099_v43 = vld [vmem:[#allocation33_spill] sm:$0xff] }
 0x260   : > { %v1674_v35 = vpop.f32.mrf.mxu3  ;;  %v5930_v62 = vpop.f32.mrf.mxu0  ;;  %v1345_v20 = vadd.f32 %v7100_v39, %v7099_v43  ;;  %v1487_v16 = vld [vmem:[#allocation2 + $0xe2] sm:$0xff] }
 0x261   : > { %v1801_v25 = vadd.f32 %v1674_v35, %v1342_v31  ;;  %v7101_v35 = vld [vmem:[#allocation54_spill] sm:$0xff] }
 0x263   : > { %v2190_v49 = vadd.f32 %v7097_v1, %v1801_v25  ;;  %4689 = vmatmul.msk.bf16.gmra.mxu2 %vm445_vm0, %v872_v55  ;;  %4761 = vmatmul.msk.bf16.gmra.mxu0 %vm445_vm0, %v1927_v10  ;;  %v7103_v10 = vld [vmem:[#allocation35_spill] sm:$0xff] }
 0x264   : > { %v2457_v23 = vpop.f32.mrf.mxu1 }
 0x265   : > { %4715 = vmatmul.msk.bf16.gmra.mxu3 %vm445_vm0, %v1528_v8  ;;  %v5938_v59 = vadd.f32 %v2452_v57, %v2190_v49  ;;  %v7104_v57 = vld [vmem:[#allocation60_spill] sm:$0xff]  ;;  %v7105_v49 = vld [vmem:[#allocation3_spill] sm:$0xff] }
 0x266   : > { %v5940_v51 = vpop.f32.mrf.mxu2  ;;  %v1347_v1 = vadd.f32 %v7104_v57, %v7103_v10  ;;  %v7106_v8 = vld [vmem:[#allocation4_spill] sm:$0xff] }
 0x267   : > { %7098 = vst [vmem:[#allocation31_spill] sm:$0xff] %v5938_v59  ;;  %v7107_v59 = vpack.c.bf16 %v7105_v49, %v7106_v8 }
 0x268   : > { %v1677_v31 = vpop.f32.mrf.mxu3  ;;  %v5944_v37 = vpop.f32.mrf.mxu0 }
 0x269   : > { %v1802_v4 = vadd.f32 %v1677_v31, %v1345_v20  ;;  %v1896_v20 = vld [vmem:[#allocation2 + $0x187] sm:$0xff] }
 0x26a   : > { %v1488_v31 = vld [vmem:[#allocation2 + $0xea] sm:$0xff] }
 0x26b   : > { %v2191_v11 = vadd.f32 %v7101_v35, %v1802_v4  ;;  %v7108_v35 = vld [vmem:[#allocation17_spill] sm:$0xff]  ;;  %v1529_v10 = vpack.c.bf16 %v1488_v31, %v1487_v16  ;;  %v7115_v31 = vld [vmem:[#allocation39_spill] sm:$0xff] }
 0x26c   : > { %v2460_v25 = vpop.f32.mrf.mxu1 }
 0x26d   : > { %v5947_v55 = vadd.f32 %v2455_v36, %v2191_v11  ;;  %v7109_v36 = vld [vmem:[#allocation22_spill] sm:$0xff] }
 0x26e   : > { %v5949_v30 = vpop.f32.mrf.mxu2  ;;  %v873_v11 = vpack.c.bf16 %v7109_v36, %v7108_v35 }
 0x26f   : > { %7102 = vst [vmem:[#allocation52_spill] sm:$0xff] %v5947_v55  ;;  %4788 = vmatmul.msk.bf16.gmra.mxu1 %vm445_vm0, %v7107_v59  ;;  %v1928_v55 = vpack.c.bf16 %v1897_v18, %v1896_v20 }
 0x270   : > { %v1679_v43 = vpop.f32.mrf.mxu3  ;;  %v5957_v39 = vpop.f32.mrf.mxu0 }
 0x271   : > { %v1803_v4 = vadd.f32 %v1679_v43, %v1347_v1  ;;  %v7112_v1 = vld [vmem:[#allocation37_spill] sm:$0xff] }
 0x272   : > { %v1350_v8 = vadd.f32 %v5708_v53, %v7112_v1 }
 0x273   : > { %v2192_v41 = vadd.f32 %v7110_v15, %v1803_v4  ;;  %4690 = vmatmul.msk.bf16.gmra.mxu2 %vm445_vm0, %v873_v11  ;;  %4762 = vmatmul.msk.bf16.gmra.mxu0 %vm445_vm0, %v1928_v55  ;;  %v7113_v15 = vld [vmem:[#allocation62_spill] sm:$0xff]  ;;  %v1899_v55 = vld [vmem:[#allocation2 + $0x19f] sm:$0xff] }
 0x274   : > { %v2462_v57 = vpop.f32.mrf.mxu1 }
 0x275   : > { %4716 = vmatmul.msk.bf16.gmra.mxu3 %vm445_vm0, %v1529_v10  ;;  %v5965_v59 = vadd.f32 %v2457_v23, %v2192_v41  ;;  %v7116_v41 = vld [vmem:[#allocation67_spill] sm:$0xff]  ;;  %v7117_v10 = vld [vmem:[#allocation5_spill] sm:$0xff] }
 0x276   : > { %v5967_v49 = vpop.f32.mrf.mxu2  ;;  %v1352_v23 = vadd.f32 %v7116_v41, %v7115_v31 }
 0x277   : > { %7111 = vst [vmem:[#allocation14_spill] sm:$0xff] %v5965_v59  ;;  %v7118_v59 = vld [vmem:[#allocation6_spill] sm:$0xff] }
 0x278   : > { %v1682_v43 = vpop.f32.mrf.mxu3  ;;  %v5971_v18 = vpop.f32.mrf.mxu0  ;;  %v7119_v46 = vpack.c.bf16 %v7117_v10, %v7118_v59 }
 0x279   : > { %v1804_v20 = vadd.f32 %v1682_v43, %v1350_v8  ;;  %v1898_v8 = vld [vmem:[#allocation2 + $0x197] sm:$0xff] }
 0x27a   : > { %v1490_v43 = vld [vmem:[#allocation2 + $0xfa] sm:$0xff] }
 0x27b   : > { %v2193_v4 = vadd.f32 %v7113_v15, %v1804_v20  ;;  %v7121_v15 = vld [vmem:[#allocation21_spill] sm:$0xff]  ;;  %v1530_v59 = vpack.c.bf16 %v1490_v43, %v1489_v32  ;;  %v7131_v43 = vld [vmem:[#allocation43_spill] sm:$0xff] }
 0x27c   : > { %v2465_v11 = vpop.f32.mrf.mxu1 }
 0x27d   : > { %v5974_v44 = vadd.f32 %v2460_v25, %v2193_v4  ;;  %v7122_v25 = vld [vmem:[#allocation26_spill] sm:$0xff] }
 0x27e   : > { %v5976_v16 = vpop.f32.mrf.mxu2  ;;  %v874_v4 = vpack.c.bf16 %v7122_v25, %v7121_v15 }
 0x27f   : > { %7114 = vst [vmem:[#allocation18_spill] sm:$0xff] %v5974_v44  ;;  %4789 = vmatmul.msk.bf16.gmra.mxu1 %vm445_vm0, %v7119_v46  ;;  %v1929_v44 = vpack.c.bf16 %v1899_v55, %v1898_v8 }
 0x280   : > { %v1684_v53 = vpop.f32.mrf.mxu3  ;;  %v5984_v1 = vpop.f32.mrf.mxu0 }
 0x281   : > { %7120 = vst [vmem:[#allocation50_spill] sm:$0xff] %v5984_v1  ;;  %v1805_v20 = vadd.f32 %v1684_v53, %v1352_v23  ;;  %v7126_v23 = vld [vmem:[#allocation41_spill] sm:$0xff] }
 0x282   : > { %v1355_v10 = vadd.f32 %v5731_v26, %v7126_v23 }
 0x283   : > { %v2194_v52 = vadd.f32 %v7123_v42, %v1805_v20  ;;  %4691 = vmatmul.msk.bf16.gmra.mxu2 %vm445_vm0, %v874_v4  ;;  %4763 = vmatmul.msk.bf16.gmra.mxu0 %vm445_vm0, %v1929_v44  ;;  %v7128_v42 = vld [vmem:[#allocation69_spill] sm:$0xff]  ;;  %v1901_v44 = vld [vmem:[#allocation2 + $0x1af] sm:$0xff] }
 0x284   : > { %v2467_v31 = vpop.f32.mrf.mxu1 }
 0x285   : > { %4717 = vmatmul.msk.bf16.gmra.mxu3 %vm445_vm0, %v1530_v59  ;;  %v5992_v46 = vadd.f32 %v2462_v57, %v2194_v52  ;;  %v1357_v52 = vadd.f32 %v5739_v38, %v7131_v43  ;;  %v7132_v57 = vld [vmem:[#allocation7_spill] sm:$0xff]  ;;  %v7133_v59 = vld [vmem:[#allocation8_spill] sm:$0xff] }
 0x286   : > { %v5994_v41 = vpop.f32.mrf.mxu2 }
 0x287   : > { %7124 = vst [vmem:[#allocation33_spill] sm:$0xff] %v5992_v46  ;;  %v7134_v46 = vpack.c.bf16 %v7132_v57, %v7133_v59 }
 0x288   : > { %7125 = vst [vmem:[#allocation56_spill] sm:$0xff] %v5994_v41  ;;  %v1687_v53 = vpop.f32.mrf.mxu3  ;;  %v5998_v55 = vpop.f32.mrf.mxu0 }
 0x289   : > { %7127 = vst [vmem:[#allocation54_spill] sm:$0xff] %v5998_v55  ;;  %v1806_v8 = vadd.f32 %v1687_v53, %v1355_v10  ;;  %v1900_v10 = vld [vmem:[#allocation2 + $0x1a7] sm:$0xff] }
 0x28a   : > { %v1492_v53 = vld [vmem:[#allocation2 + $0x10a] sm:$0xff]  ;;  %v1491_v55 = vld [vmem:[#allocation2 + $0x102] sm:$0xff] }
 0x28b   : > { %v2195_v20 = vadd.f32 %v7128_v42, %v1806_v8  ;;  %v7136_v42 = vld [vmem:[#allocation25_spill] sm:$0xff]  ;;  %v1531_v38 = vpack.c.bf16 %v1492_v53, %v1491_v55  ;;  %v6032_v55 = vld [vmem:[#allocation2 + $0x1b8] sm:$0xff] }
 0x28c   : > { %v2470_v4 = vpop.f32.mrf.mxu1  ;;  %v7146_v53 = vld [vmem:[#allocation48_spill] sm:$0xff] }
 0x28d   : > { %v6001_v1 = vadd.f32 %v2465_v11, %v2195_v20  ;;  %v7137_v11 = vld [vmem:[#allocation29_spill] sm:$0xff] }
 0x28e   : > { %v6003_v32 = vpop.f32.mrf.mxu2  ;;  %v875_v20 = vpack.c.bf16 %v7137_v11, %v7136_v42 }
 0x28f   : > { %7129 = vst [vmem:[#allocation35_spill] sm:$0xff] %v6001_v1  ;;  %4790 = vmatmul.msk.bf16.gmra.mxu1 %vm445_vm0, %v7134_v46  ;;  %v1930_v1 = vpack.c.bf16 %v1901_v44, %v1900_v10 }
 0x290   : > { %7130 = vst [vmem:[#allocation60_spill] sm:$0xff] %v6003_v32  ;;  %v1689_v26 = vpop.f32.mrf.mxu3  ;;  %v6011_v23 = vpop.f32.mrf.mxu0  ;;  %v7138_v32 = vld [vmem:[#allocation72_spill] sm:$0xff] }
 0x291   : > { %7135 = vst [vmem:[#allocation3_spill] sm:$0xff] %v6011_v23  ;;  %v1807_v8 = vadd.f32 %v1689_v26, %v1357_v52  ;;  %v7141_v52 = vld [vmem:[#allocation45_spill] sm:$0xff] }
 0x292   : > { %v1360_v59 = vadd.f32 %v5754_v22, %v7141_v52  ;;  %v7148_v22 = vld [vmem:[#allocation10_spill] sm:$0xff] }
 0x293   : > { %v2196_v41 = vadd.f32 %v7138_v32, %v1807_v8  ;;  %4692 = vmatmul.msk.bf16.gmra.mxu2 %vm445_vm0, %v875_v20  ;;  %4764 = vmatmul.msk.bf16.gmra.mxu0 %vm445_vm0, %v1930_v1  ;;  %v7143_v32 = vld [vmem:[#allocation75_spill] sm:$0xff] }
 0x294   : > { %v2472_v43 = vpop.f32.mrf.mxu1 }
 0x295   : > { %4718 = vmatmul.msk.bf16.gmra.mxu3 %vm445_vm0, %v1531_v38  ;;  %v6019_v46 = vadd.f32 %v2467_v31, %v2196_v41  ;;  %v1902_v31 = vld [vmem:[#allocation2 + $0x1b7] sm:$0xff]  ;;  %v1903_v41 = vld [vmem:[#allocation2 + $0x1bf] sm:$0xff]  ;;  %v1362_v38 = vadd.f32 %v5762_v9, %v7146_v53 }
 0x296   : > { %v6021_v57 = vpop.f32.mrf.mxu2 }
 0x297   : > { %7139 = vst [vmem:[#allocation4_spill] sm:$0xff] %v6019_v46  ;;  %v7147_v46 = vld [vmem:[#allocation9_spill] sm:$0xff] }
 0x298   : > { %7140 = vst [vmem:[#allocation17_spill] sm:$0xff] %v6021_v57  ;;  %v1692_v26 = vpop.f32.mrf.mxu3  ;;  %v6025_v44 = vpop.f32.mrf.mxu0  ;;  %v7149_v52 = vpack.c.bf16 %v7147_v46, %v7148_v22 }
 0x299   : > { %7142 = vst [vmem:[#allocation22_spill] sm:$0xff] %v6025_v44  ;;  %v1808_v10 = vadd.f32 %v1692_v26, %v1360_v59  ;;  %v1493_v44 = vld [vmem:[#allocation2 + $0x112] sm:$0xff] }
 0x29b   : > { %v2197_v8 = vadd.f32 %v7143_v32, %v1808_v10  ;;  %v1494_v10 = vld [vmem:[#allocation2 + $0x11a] sm:$0xff]  ;;  %v7151_v32 = vld [vmem:[#allocation30_spill] sm:$0xff] }
 0x29c   : > { %v2475_v20 = vpop.f32.mrf.mxu1  ;;  %v1532_v9 = vpack.c.bf16 %v1494_v10, %v1493_v44  ;;  %v2627_v44 = vld [vmem:[#allocation2 + $0x11] sm:$0xff] }
 0x29d   : > { %v6028_v23 = vadd.f32 %v2470_v4, %v2197_v8  ;;  %v876_v8 = vpack.c.bf16 %v6032_v55, %v7151_v32  ;;  %v3405_v10 = vld [vmem:[#allocation2 + $0x17] sm:$0xff] }
 0x29e   : > { %v6030_v1 = vpop.f32.mrf.mxu2 }
 0x29f   : > { %7144 = vst [vmem:[#allocation58_spill] sm:$0xff] %v6028_v23  ;;  %4791 = vmatmul.msk.bf16.gmra.mxu1 %vm445_vm0, %v7149_v52  ;;  %v1931_v23 = vpack.c.bf16 %v1903_v41, %v1902_v31 }
 0x2a0   : > { %7145 = vst [vmem:[#allocation37_spill] sm:$0xff] %v6030_v1  ;;  %v1694_v59 = vpop.f32.mrf.mxu3  ;;  %v6040_v26 = vpop.f32.mrf.mxu0  ;;  %v7152_v1 = vld [vmem:[#allocation78_spill] sm:$0xff] }
 0x2a1   : > { %7150 = vst [vmem:[#allocation62_spill] sm:$0xff] %v6040_v26  ;;  %v1809_v4 = vadd.f32 %v1694_v59, %v1362_v38  ;;  %v7154_v38 = vld [vmem:[#allocation51_spill] sm:$0xff] }
 0x2a2   : > { %v1365_v52 = vadd.f32 %v5777_v27, %v7154_v38 }
 0x2a3   : > { %v2198_v57 = vadd.f32 %v7152_v1, %v1809_v4  ;;  %4693 = vmatmul.msk.bf16.gmra.mxu2 %vm445_vm0, %v876_v8  ;;  %4765 = vmatmul.msk.bf16.gmra.mxu0 %vm445_vm0, %v1931_v23  ;;  %v7156_v1 = vld [vmem:[#allocation81_spill] sm:$0xff] }
 0x2a4   : > { %v2477_v46 = vpop.f32.mrf.mxu1 }
 0x2a5   : > { %4719 = vmatmul.msk.bf16.gmra.mxu3 %vm445_vm0, %v1532_v9  ;;  %v6048_v53 = vadd.f32 %v2472_v43, %v2198_v57  ;;  %v7159_v43 = vld [vmem:[#allocation55_spill] sm:$0xff] }
 0x2a6   : > { %v6050_v22 = vpop.f32.mrf.mxu2  ;;  %v1367_v57 = vadd.f32 %v5783_v28, %v7159_v43  ;;  %v7160_v9 = vld [vmem:[#allocation11_spill] sm:$0xff] }
 0x2a7   : > { %7153 = vst [vmem:[#allocation39_spill] sm:$0xff] %v6048_v53  ;;  %v7161_v53 = vpack.c.bf16 %v7160_v9, %v5288_v14  ;;  %v7164_v9 = vld [vmem:[#allocation59_spill] sm:$0xff] }
 0x2a8   : > { %v1697_v59 = vpop.f32.mrf.mxu3  ;;  %v6054_v31 = vpop.f32.mrf.mxu0 }
 0x2a9   : > { %7155 = vst [vmem:[#allocation67_spill] sm:$0xff] %v6054_v31  ;;  %v1810_v41 = vadd.f32 %v1697_v59, %v1365_v52  ;;  %v2626_v52 = vld [vmem:[#allocation2 + $0x9] sm:$0xff]  ;;  %v7162_v31 = vld [vmem:[#allocation84_spill] sm:$0xff] }
 0x2aa   : > { %v3404_v59 = vld [vmem:[#allocation2 + $0xf] sm:$0xff] }
 0x2ab   : > { %v2199_v4 = vadd.f32 %v7156_v1, %v1810_v41  ;;  %v1496_v41 = vld [vmem:[#allocation2 + $0x12a] sm:$0xff]  ;;  %v2682_v1 = vpack.c.bf16 %v2627_v44, %v2626_v52 }
 0x2ac   : > { %v2480_v8 = vpop.f32.mrf.mxu1 }
 0x2ad   : > { %v6057_v26 = vadd.f32 %v2475_v20, %v2199_v4  ;;  %v3460_v4 = vpack.c.bf16 %v3405_v10, %v3404_v59 }
 0x2ae   : > { %v6059_v23 = vpop.f32.mrf.mxu2 }
 0x2af   : > { %7157 = vst [vmem:[#allocation5_spill] sm:$0xff] %v6057_v26  ;;  %4792 = vmatmul.msk.bf16.gmra.mxu1 %vm445_vm0, %v7161_v53  ;;  %v1495_v26 = vld [vmem:[#allocation2 + $0x122] sm:$0xff] }
 0x2b0   : > { %7158 = vst [vmem:[#allocation6_spill] sm:$0xff] %v6059_v23  ;;  %v1699_v27 = vpop.f32.mrf.mxu3  ;;  %v6067_v38 = vpop.f32.mrf.mxu0  ;;  %v1533_v28 = vpack.c.bf16 %v1496_v41, %v1495_v26  ;;  %v2629_v41 = vld [vmem:[#allocation2 + $0x21] sm:$0xff] }
 0x2b1   : > { %v1811_v20 = vadd.f32 %v1699_v27, %v1367_v57  ;;  %v1370_v57 = vadd.f32 %v5797_v54, %v7164_v9 }
 0x2b3   : > { %v2200_v23 = vadd.f32 %v7162_v31, %v1811_v20  ;;  %4810 = vmatmul.msk.bf16.vlgmr.msra.gmra.mxu2 %vm445_vm0, %v2682_v1  ;;  %4882 = vmatmul.msk.bf16.vlgmr.msra.gmra.mxu0 %vm445_vm0, %v3460_v4  ;;  %v7165_v31 = vld [vmem:[#allocation86_spill] sm:$0xff]  ;;  %v7168_v4 = vld [vmem:[#allocation12_spill] sm:$0xff] }
 0x2b4   : > { %v2482_v14 = vpop.f32.mrf.mxu1  ;;  %v3407_v1 = vld [vmem:[#allocation2 + $0x27] sm:$0xff] }
 0x2b5   : > { %4720 = vmatmul.msk.bf16.gmra.mxu3 %vm445_vm0, %v1533_v28  ;;  %v6073_v53 = vadd.f32 %v2477_v46, %v2200_v23  ;;  %v7167_v46 = vld [vmem:[#allocation63_spill] sm:$0xff]  ;;  %v7169_v28 = vpack.c.bf16 %v7168_v4, %v5314_v0 }
 0x2b6   : > { %v6075_v43 = vpop.f32.mrf.mxu2  ;;  %v1372_v23 = vadd.f32 %v5806_v45, %v7167_v46 }
 0x2b7   : > { %7163 = vst [vmem:[#allocation21_spill] sm:$0xff] %v6073_v53 }
 0x2b8   : > { %v1702_v44 = vpop.f32.mrf.mxu3  ;;  %v6079_v10 = vpop.f32.mrf.mxu0 }
 0x2b9   : > { %v1812_v27 = vadd.f32 %v1702_v44, %v1370_v57  ;;  %v2628_v57 = vld [vmem:[#allocation2 + $0x19] sm:$0xff] }
 0x2ba   : > { %v3406_v44 = vld [vmem:[#allocation2 + $0x1f] sm:$0xff] }
 0x2bb   : > { %v2201_v52 = vadd.f32 %v7165_v31, %v1812_v27  ;;  %v1498_v27 = vld [vmem:[#allocation2 + $0x13a] sm:$0xff]  ;;  %v2683_v31 = vpack.c.bf16 %v2629_v41, %v2628_v57 }
 0x2bc   : > { %v2485_v59 = vpop.f32.mrf.mxu1 }
 0x2bd   : > { %v6082_v20 = vadd.f32 %v2480_v8, %v2201_v52  ;;  %v3461_v52 = vpack.c.bf16 %v3407_v1, %v3406_v44 }
 0x2be   : > { %v6084_v26 = vpop.f32.mrf.mxu2 }
 0x2bf   : > { %7166 = vst [vmem:[#allocation26_spill] sm:$0xff] %v6082_v20  ;;  %4793 = vmatmul.msk.bf16.gmra.mxu1 %vm445_vm0, %v7169_v28  ;;  %v1497_v20 = vld [vmem:[#allocation2 + $0x132] sm:$0xff]  ;;  %v7170_v28 = vld [vmem:[#allocation66_spill] sm:$0xff] }
 0x2c0   : > { %v1704_v54 = vpop.f32.mrf.mxu3  ;;  %v6092_v9 = vpop.f32.mrf.mxu0  ;;  %v1534_v45 = vpack.c.bf16 %v1498_v27, %v1497_v20  ;;  %v2631_v27 = vld [vmem:[#allocation2 + $0x31] sm:$0xff] }
 0x2c1   : > { %v1813_v8 = vadd.f32 %v1704_v54, %v1372_v23  ;;  %v1375_v23 = vadd.f32 %v5823_v47, %v7170_v28  ;;  %v2630_v28 = vld [vmem:[#allocation2 + $0x29] sm:$0xff] }
 0x2c3   : > { %v2202_v53 = vadd.f32 %v5801_v56, %v1813_v8  ;;  %4811 = vmatmul.msk.bf16.gmra.mxu2 %vm445_vm0, %v2683_v31  ;;  %4883 = vmatmul.msk.bf16.gmra.mxu0 %vm445_vm0, %v3461_v52  ;;  %v3409_v8 = vld [vmem:[#allocation2 + $0x37] sm:$0xff]  ;;  %v7173_v31 = vld [vmem:[#allocation13_spill] sm:$0xff] }
 0x2c4   : > { %v2487_v0 = vpop.f32.mrf.mxu1  ;;  %v7174_v52 = vpack.c.bf16 %v7173_v31, %v5346_v6 }
 0x2c5   : > { %4721 = vmatmul.msk.bf16.gmra.mxu3 %vm445_vm0, %v1534_v45  ;;  %v6098_v46 = vadd.f32 %v2482_v14, %v2202_v53  ;;  %v7172_v14 = vld [vmem:[#allocation70_spill] sm:$0xff] }
 0x2c6   : > { %v6100_v4 = vpop.f32.mrf.mxu2  ;;  %v1377_v53 = vadd.f32 %v5832_v3, %v7172_v14 }
 0x2c8   : > { %v1707_v41 = vpop.f32.mrf.mxu3  ;;  %v6104_v1 = vpop.f32.mrf.mxu0 }
 0x2c9   : > { %v1814_v54 = vadd.f32 %v1707_v41, %v1375_v23  ;;  %v1500_v23 = vld [vmem:[#allocation2 + $0x14a] sm:$0xff]  ;;  %v2684_v41 = vpack.c.bf16 %v2631_v27, %v2630_v28 }
 0x2cb   : > { %v2203_v56 = vadd.f32 %v5814_v17, %v1814_v54  ;;  %v3408_v17 = vld [vmem:[#allocation2 + $0x2f] sm:$0xff] }
 0x2cc   : > { %v2490_v57 = vpop.f32.mrf.mxu1  ;;  %v3462_v54 = vpack.c.bf16 %v3409_v8, %v3408_v17 }
 0x2cd   : > { %v6107_v44 = vadd.f32 %v2485_v59, %v2203_v56  ;;  %v1499_v56 = vld [vmem:[#allocation2 + $0x142] sm:$0xff] }
 0x2ce   : > { %v6109_v20 = vpop.f32.mrf.mxu2  ;;  %v1535_v3 = vpack.c.bf16 %v1500_v23, %v1499_v56 }
 0x2cf   : > { %7171 = vst [vmem:[#allocation65_spill] sm:$0xff] %v6107_v44  ;;  %4794 = vmatmul.msk.bf16.gmra.mxu1 %vm445_vm0, %v7174_v52  ;;  %v7175_v52 = vld [vmem:[#allocation73_spill] sm:$0xff] }
 0x2d0   : > { %v1709_v47 = vpop.f32.mrf.mxu3  ;;  %v6117_v45 = vpop.f32.mrf.mxu0 }
 0x2d1   : > { %v1815_v59 = vadd.f32 %v1709_v47, %v1377_v53  ;;  %v1380_v53 = vadd.f32 %v5849_v2, %v7175_v52  ;;  %v1502_v52 = vld [vmem:[#allocation2 + $0x15a] sm:$0xff] }
 0x2d3   : > { %v2204_v44 = vadd.f32 %v5827_v60, %v1815_v59  ;;  %4812 = vmatmul.msk.bf16.gmra.mxu2 %vm445_vm0, %v2684_v41  ;;  %4884 = vmatmul.msk.bf16.gmra.mxu0 %vm445_vm0, %v3462_v54  ;;  %v2633_v59 = vld [vmem:[#allocation2 + $0x41] sm:$0xff]  ;;  %v7177_v54 = vpack.c.bf16 %v5367_v19, %v5372_v24 }
 0x2d4   : > { %v2492_v6 = vpop.f32.mrf.mxu1  ;;  %v3411_v41 = vld [vmem:[#allocation2 + $0x47] sm:$0xff] }
 0x2d5   : > { %4722 = vmatmul.msk.bf16.gmra.mxu3 %vm445_vm0, %v1535_v3  ;;  %v6123_v14 = vadd.f32 %v2487_v0, %v2204_v44  ;;  %v7176_v0 = vld [vmem:[#allocation76_spill] sm:$0xff] }
 0x2d6   : > { %v6125_v31 = vpop.f32.mrf.mxu2  ;;  %v1382_v44 = vadd.f32 %v5858_v13, %v7176_v0  ;;  %v2632_v3 = vld [vmem:[#allocation2 + $0x39] sm:$0xff] }
 0x2d8   : > { %v1712_v27 = vpop.f32.mrf.mxu3  ;;  %v6129_v8 = vpop.f32.mrf.mxu0 }
 0x2d9   : > { %v1816_v47 = vadd.f32 %v1712_v27, %v1380_v53  ;;  %v2685_v53 = vpack.c.bf16 %v2633_v59, %v2632_v3 }
 0x2db   : > { %v2205_v60 = vadd.f32 %v5840_v5, %v1816_v47  ;;  %v3410_v5 = vld [vmem:[#allocation2 + $0x3f] sm:$0xff]  ;;  %v1501_v47 = vld [vmem:[#allocation2 + $0x152] sm:$0xff] }
 0x2dc   : > { %v2495_v28 = vpop.f32.mrf.mxu1  ;;  %v3463_v27 = vpack.c.bf16 %v3411_v41, %v3410_v5  ;;  %v1536_v13 = vpack.c.bf16 %v1502_v52, %v1501_v47  ;;  %v7182_v47 = vpack.c.bf16 %v7095_v48, %v5400_v21 }
 0x2dd   : > { %v6132_v17 = vadd.f32 %v2490_v57, %v2205_v60 }
 0x2de   : > { %v6134_v23 = vpop.f32.mrf.mxu2 }
 0x2df   : > { %4795 = vmatmul.msk.bf16.gmra.mxu1 %vm445_vm0, %v7177_v54  ;;  %v7179_v54 = vld [vmem:[#allocation79_spill] sm:$0xff] }
 0x2e0   : > { %v1714_v2 = vpop.f32.mrf.mxu3  ;;  %v6142_v56 = vpop.f32.mrf.mxu0 }
 0x2e1   : > { %v1817_v57 = vadd.f32 %v1714_v2, %v1382_v44  ;;  %v1385_v44 = vadd.f32 %v5875_v29, %v7179_v54  ;;  %v1504_v54 = vld [vmem:[#allocation2 + $0x16a] sm:$0xff] }
 0x2e3   : > { %v2206_v60 = vadd.f32 %v5853_v33, %v1817_v57  ;;  %4813 = vmatmul.msk.bf16.gmra.mxu2 %vm445_vm0, %v2685_v53  ;;  %4885 = vmatmul.msk.bf16.gmra.mxu0 %vm445_vm0, %v3463_v27  ;;  %v2635_v57 = vld [vmem:[#allocation2 + $0x51] sm:$0xff] }
 0x2e4   : > { %v2497_v19 = vpop.f32.mrf.mxu1  ;;  %v3413_v53 = vld [vmem:[#allocation2 + $0x57] sm:$0xff] }
 0x2e5   : > { %4723 = vmatmul.msk.bf16.gmra.mxu3 %vm445_vm0, %v1536_v13  ;;  %v6148_v24 = vadd.f32 %v2492_v6, %v2206_v60  ;;  %v7181_v6 = vld [vmem:[#allocation82_spill] sm:$0xff] }
 0x2e6   : > { %v6150_v0 = vpop.f32.mrf.mxu2  ;;  %v1387_v27 = vadd.f32 %v5884_v63, %v7181_v6  ;;  %v2634_v13 = vld [vmem:[#allocation2 + $0x49] sm:$0xff] }
 0x2e7   : > { %7178 = vst [vmem:[#allocation41_spill] sm:$0xff] %v6148_v24 }
 0x2e8   : > { %v1717_v59 = vpop.f32.mrf.mxu3  ;;  %v6154_v41 = vpop.f32.mrf.mxu0 }
 0x2e9   : > { %v1818_v2 = vadd.f32 %v1717_v59, %v1385_v44  ;;  %v2686_v44 = vpack.c.bf16 %v2635_v57, %v2634_v13 }
 0x2eb   : > { %v2207_v33 = vadd.f32 %v5866_v50, %v1818_v2  ;;  %v3412_v50 = vld [vmem:[#allocation2 + $0x4f] sm:$0xff]  ;;  %v1503_v2 = vld [vmem:[#allocation2 + $0x162] sm:$0xff] }
 0x2ec   : > { %v2500_v3 = vpop.f32.mrf.mxu1  ;;  %v3464_v59 = vpack.c.bf16 %v3413_v53, %v3412_v50  ;;  %v1537_v63 = vpack.c.bf16 %v1504_v54, %v1503_v2  ;;  %v7187_v2 = vpack.c.bf16 %v7108_v35, %v7096_v61 }
 0x2ed   : > { %v6157_v5 = vadd.f32 %v2495_v28, %v2207_v33 }
 0x2ee   : > { %v6159_v52 = vpop.f32.mrf.mxu2 }
 0x2ef   : > { %7180 = vst [vmem:[#allocation69_spill] sm:$0xff] %v6157_v5  ;;  %4796 = vmatmul.msk.bf16.gmra.mxu1 %vm445_vm0, %v7182_v47  ;;  %v7184_v47 = vld [vmem:[#allocation15_spill] sm:$0xff] }
 0x2f0   : > { %v1719_v29 = vpop.f32.mrf.mxu3  ;;  %v6167_v60 = vpop.f32.mrf.mxu0 }
 0x2f1   : > { %v1819_v28 = vadd.f32 %v1719_v29, %v1387_v27  ;;  %v1390_v27 = vadd.f32 %v5908_v58, %v7184_v47  ;;  %v1506_v47 = vld [vmem:[#allocation2 + $0x17a] sm:$0xff] }
 0x2f3   : > { %v2208_v33 = vadd.f32 %v5879_v34, %v1819_v28  ;;  %4814 = vmatmul.msk.bf16.gmra.mxu2 %vm445_vm0, %v2686_v44  ;;  %4886 = vmatmul.msk.bf16.gmra.mxu0 %vm445_vm0, %v3464_v59  ;;  %v2637_v28 = vld [vmem:[#allocation2 + $0x61] sm:$0xff] }
 0x2f4   : > { %v2502_v21 = vpop.f32.mrf.mxu1  ;;  %v3415_v44 = vld [vmem:[#allocation2 + $0x67] sm:$0xff] }
 0x2f5   : > { %4724 = vmatmul.msk.bf16.gmra.mxu3 %vm445_vm0, %v1537_v63  ;;  %v6173_v48 = vadd.f32 %v2497_v19, %v2208_v33  ;;  %v7186_v19 = vld [vmem:[#allocation16_spill] sm:$0xff] }
 0x2f6   : > { %v6175_v6 = vpop.f32.mrf.mxu2  ;;  %v1392_v59 = vadd.f32 %v5922_v7, %v7186_v19  ;;  %v2636_v63 = vld [vmem:[#allocation2 + $0x59] sm:$0xff] }
 0x2f7   : > { %7183 = vst [vmem:[#allocation43_spill] sm:$0xff] %v6173_v48 }
 0x2f8   : > { %v1722_v57 = vpop.f32.mrf.mxu3  ;;  %v6179_v53 = vpop.f32.mrf.mxu0 }
 0x2f9   : > { %v1820_v29 = vadd.f32 %v1722_v57, %v1390_v27  ;;  %v2687_v27 = vpack.c.bf16 %v2637_v28, %v2636_v63 }
 0x2fb   : > { %v2209_v34 = vadd.f32 %v5892_v12, %v1820_v29  ;;  %v3414_v12 = vld [vmem:[#allocation2 + $0x5f] sm:$0xff]  ;;  %v1505_v29 = vld [vmem:[#allocation2 + $0x172] sm:$0xff] }
 0x2fc   : > { %v2505_v13 = vpop.f32.mrf.mxu1  ;;  %v3465_v57 = vpack.c.bf16 %v3415_v44, %v3414_v12  ;;  %v1538_v7 = vpack.c.bf16 %v1506_v47, %v1505_v29  ;;  %v7192_v29 = vpack.c.bf16 %v7121_v15, %v7109_v36 }
 0x2fd   : > { %v6182_v50 = vadd.f32 %v2500_v3, %v2209_v34 }
 0x2fe   : > { %v6184_v54 = vpop.f32.mrf.mxu2 }
 0x2ff   : > { %7185 = vst [vmem:[#allocation7_spill] sm:$0xff] %v6182_v50  ;;  %4797 = vmatmul.msk.bf16.gmra.mxu1 %vm445_vm0, %v7187_v2  ;;  %v7189_v2 = vld [vmem:[#allocation19_spill] sm:$0xff] }
 0x300   : > { %v1724_v58 = vpop.f32.mrf.mxu3  ;;  %v6192_v33 = vpop.f32.mrf.mxu0 }
 0x301   : > { %v1821_v3 = vadd.f32 %v1724_v58, %v1392_v59  ;;  %v1395_v59 = vadd.f32 %v5940_v51, %v7189_v2  ;;  %v1508_v2 = vld [vmem:[#allocation2 + $0x18a] sm:$0xff] }
 0x303   : > { %v2210_v34 = vadd.f32 %v5912_v40, %v1821_v3  ;;  %4815 = vmatmul.msk.bf16.gmra.mxu2 %vm445_vm0, %v2687_v27  ;;  %4887 = vmatmul.msk.bf16.gmra.mxu0 %vm445_vm0, %v3465_v57  ;;  %v2639_v3 = vld [vmem:[#allocation2 + $0x71] sm:$0xff] }
 0x304   : > { %v2507_v61 = vpop.f32.mrf.mxu1  ;;  %v3417_v27 = vld [vmem:[#allocation2 + $0x77] sm:$0xff] }
 0x305   : > { %4725 = vmatmul.msk.bf16.gmra.mxu3 %vm445_vm0, %v1538_v7  ;;  %v6198_v35 = vadd.f32 %v2502_v21, %v2210_v34  ;;  %v7191_v21 = vld [vmem:[#allocation20_spill] sm:$0xff]  ;;  %v2638_v7 = vld [vmem:[#allocation2 + $0x69] sm:$0xff] }
 0x306   : > { %v6200_v19 = vpop.f32.mrf.mxu2  ;;  %v1397_v57 = vadd.f32 %v5949_v30, %v7191_v21 }
 0x307   : > { %7188 = vst [vmem:[#allocation8_spill] sm:$0xff] %v6198_v35 }
 0x308   : > { %v1727_v28 = vpop.f32.mrf.mxu3  ;;  %v6204_v44 = vpop.f32.mrf.mxu0 }
 0x309   : > { %v1822_v58 = vadd.f32 %v1727_v28, %v1395_v59  ;;  %v2688_v59 = vpack.c.bf16 %v2639_v3, %v2638_v7 }
 0x30b   : > { %v2211_v40 = vadd.f32 %v5930_v62, %v1822_v58  ;;  %v3416_v62 = vld [vmem:[#allocation2 + $0x6f] sm:$0xff]  ;;  %v1507_v58 = vld [vmem:[#allocation2 + $0x182] sm:$0xff] }
 0x30c   : > { %v2510_v63 = vpop.f32.mrf.mxu1  ;;  %v3466_v28 = vpack.c.bf16 %v3417_v27, %v3416_v62  ;;  %v1539_v30 = vpack.c.bf16 %v1508_v2, %v1507_v58  ;;  %v7197_v58 = vpack.c.bf16 %v7136_v42, %v7122_v25 }
 0x30d   : > { %v6207_v12 = vadd.f32 %v2505_v13, %v2211_v40 }
 0x30e   : > { %v6209_v47 = vpop.f32.mrf.mxu2 }
 0x30f   : > { %7190 = vst [vmem:[#allocation25_spill] sm:$0xff] %v6207_v12  ;;  %4798 = vmatmul.msk.bf16.gmra.mxu1 %vm445_vm0, %v7192_v29  ;;  %v7194_v29 = vld [vmem:[#allocation23_spill] sm:$0xff]  ;;  %v7209_v12 = vld [vmem:[#allocation17_spill] sm:$0xff] }
 0x310   : > { %v1729_v51 = vpop.f32.mrf.mxu3  ;;  %v6217_v34 = vpop.f32.mrf.mxu0 }
 0x311   : > { %v1823_v13 = vadd.f32 %v1729_v51, %v1397_v57  ;;  %v1400_v57 = vadd.f32 %v5967_v49, %v7194_v29  ;;  %v1510_v29 = vld [vmem:[#allocation2 + $0x19a] sm:$0xff] }
 0x313   : > { %v2212_v40 = vadd.f32 %v5944_v37, %v1823_v13  ;;  %4816 = vmatmul.msk.bf16.gmra.mxu2 %vm445_vm0, %v2688_v59  ;;  %4888 = vmatmul.msk.bf16.gmra.mxu0 %vm445_vm0, %v3466_v28  ;;  %v2641_v13 = vld [vmem:[#allocation2 + $0x81] sm:$0xff] }
 0x314   : > { %v2512_v36 = vpop.f32.mrf.mxu1  ;;  %v3419_v59 = vld [vmem:[#allocation2 + $0x87] sm:$0xff] }
 0x315   : > { %4726 = vmatmul.msk.bf16.gmra.mxu3 %vm445_vm0, %v1539_v30  ;;  %v6223_v15 = vadd.f32 %v2507_v61, %v2212_v40  ;;  %v7196_v61 = vld [vmem:[#allocation24_spill] sm:$0xff] }
 0x316   : > { %v6225_v21 = vpop.f32.mrf.mxu2  ;;  %v1402_v28 = vadd.f32 %v5976_v16, %v7196_v61  ;;  %v2640_v30 = vld [vmem:[#allocation2 + $0x79] sm:$0xff] }
 0x317   : > { %7193 = vst [vmem:[#allocation29_spill] sm:$0xff] %v6223_v15 }
 0x318   : > { %v1732_v3 = vpop.f32.mrf.mxu3  ;;  %v6229_v27 = vpop.f32.mrf.mxu0 }
 0x319   : > { %v1824_v51 = vadd.f32 %v1732_v3, %v1400_v57  ;;  %v2689_v57 = vpack.c.bf16 %v2641_v13, %v2640_v30 }
 0x31b   : > { %v2213_v37 = vadd.f32 %v5957_v39, %v1824_v51  ;;  %v3418_v39 = vld [vmem:[#allocation2 + $0x7f] sm:$0xff]  ;;  %v1509_v51 = vld [vmem:[#allocation2 + $0x192] sm:$0xff] }
 0x31c   : > { %v2515_v7 = vpop.f32.mrf.mxu1  ;;  %v3467_v3 = vpack.c.bf16 %v3419_v59, %v3418_v39  ;;  %v1540_v16 = vpack.c.bf16 %v1510_v29, %v1509_v51  ;;  %v7204_v51 = vld [vmem:[#allocation60_spill] sm:$0xff] }
 0x31d   : > { %v6232_v62 = vadd.f32 %v2510_v63, %v2213_v37 }
 0x31e   : > { %v6234_v2 = vpop.f32.mrf.mxu2 }
 0x31f   : > { %7195 = vst [vmem:[#allocation72_spill] sm:$0xff] %v6232_v62  ;;  %4799 = vmatmul.msk.bf16.gmra.mxu1 %vm445_vm0, %v7197_v58  ;;  %v7199_v58 = vld [vmem:[#allocation27_spill] sm:$0xff]  ;;  %v7200_v62 = vld [vmem:[#allocation56_spill] sm:$0xff] }
 0x320   : > { %v1734_v49 = vpop.f32.mrf.mxu3  ;;  %v6242_v40 = vpop.f32.mrf.mxu0 }
 0x321   : > { %v1825_v63 = vadd.f32 %v1734_v49, %v1402_v28  ;;  %v1405_v28 = vadd.f32 %v7200_v62, %v7199_v58 }
 0x323   : > { %v2214_v37 = vadd.f32 %v5971_v18, %v1825_v63  ;;  %4817 = vmatmul.msk.bf16.gmra.mxu2 %vm445_vm0, %v2689_v57  ;;  %4889 = vmatmul.msk.bf16.gmra.mxu0 %vm445_vm0, %v3467_v3  ;;  %v7201_v18 = vld [vmem:[#allocation50_spill] sm:$0xff]  ;;  %v2643_v57 = vld [vmem:[#allocation2 + $0x91] sm:$0xff] }
 0x324   : > { %v2517_v25 = vpop.f32.mrf.mxu1  ;;  %v3421_v3 = vld [vmem:[#allocation2 + $0x97] sm:$0xff] }
 0x325   : > { %4727 = vmatmul.msk.bf16.gmra.mxu3 %vm445_vm0, %v1540_v16  ;;  %v6248_v42 = vadd.f32 %v2512_v36, %v2214_v37  ;;  %v7203_v36 = vld [vmem:[#allocation28_spill] sm:$0xff]  ;;  %v7205_v16 = vpack.c.bf16 %v7151_v32, %v7137_v11 }
 0x326   : > { %v6250_v61 = vpop.f32.mrf.mxu2  ;;  %v1407_v37 = vadd.f32 %v7204_v51, %v7203_v36 }
 0x327   : > { %7198 = vst [vmem:[#allocation45_spill] sm:$0xff] %v6248_v42  ;;  %v7206_v42 = vld [vmem:[#allocation54_spill] sm:$0xff] }
 0x328   : > { %v1737_v13 = vpop.f32.mrf.mxu3  ;;  %v6254_v59 = vpop.f32.mrf.mxu0 }
 0x329   : > { %v1826_v49 = vadd.f32 %v1737_v13, %v1405_v28  ;;  %v2642_v28 = vld [vmem:[#allocation2 + $0x89] sm:$0xff] }
 0x32a   : > { %v3420_v13 = vld [vmem:[#allocation2 + $0x8f] sm:$0xff] }
 0x32b   : > { %v2215_v30 = vadd.f32 %v7201_v18, %v1826_v49  ;;  %v1512_v49 = vld [vmem:[#allocation2 + $0x1aa] sm:$0xff]  ;;  %v2690_v18 = vpack.c.bf16 %v2643_v57, %v2642_v28  ;;  %v2292_v28 = vld [vmem:[#allocation2 + $0x1c0] sm:$0xff] }
 0x32c   : > { %v2520_v39 = vpop.f32.mrf.mxu1 }
 0x32d   : > { %v6257_v63 = vadd.f32 %v2515_v7, %v2215_v30  ;;  %v3468_v30 = vpack.c.bf16 %v3421_v3, %v3420_v13  ;;  %v7211_v13 = vld [vmem:[#allocation3_spill] sm:$0xff] }
 0x32e   : > { %v6259_v29 = vpop.f32.mrf.mxu2 }
 0x32f   : > { %7202 = vst [vmem:[#allocation75_spill] sm:$0xff] %v6257_v63  ;;  %4800 = vmatmul.msk.bf16.gmra.mxu1 %vm445_vm0, %v7205_v16  ;;  %v1511_v63 = vld [vmem:[#allocation2 + $0x1a2] sm:$0xff]  ;;  %v7208_v16 = vld [vmem:[#allocation32_spill] sm:$0xff] }
 0x330   : > { %v1739_v62 = vpop.f32.mrf.mxu3  ;;  %v6267_v58 = vpop.f32.mrf.mxu0  ;;  %v1541_v36 = vpack.c.bf16 %v1512_v49, %v1511_v63  ;;  %v1410_v35 = vadd.f32 %v7209_v12, %v7208_v16  ;;  %v2320_v49 = vpack.c.bf16 %v2292_v28, %v6032_v55  ;;  %v7214_v12 = vld [vmem:[#allocation37_spill] sm:$0xff] }
 0x331   : > { %v1827_v7 = vadd.f32 %v1739_v62, %v1407_v37  ;;  %v7210_v37 = vld [vmem:[#allocation87_spill] sm:$0xff] }
 0x333   : > { %v2216_v15 = vadd.f32 %v7206_v42, %v1827_v7  ;;  %4818 = vmatmul.msk.bf16.gmra.mxu2 %vm445_vm0, %v2690_v18  ;;  %4890 = vmatmul.msk.bf16.gmra.mxu0 %vm445_vm0, %v3468_v30  ;;  %v3423_v30 = vld [vmem:[#allocation2 + $0xa7] sm:$0xff] }
 0x334   : > { %v2522_v11 = vpop.f32.mrf.mxu1 }
 0x335   : > { %4728 = vmatmul.msk.bf16.gmra.mxu3 %vm445_vm0, %v1541_v36  ;;  %v6273_v32 = vadd.f32 %v2517_v25, %v2216_v15  ;;  %v2645_v25 = vld [vmem:[#allocation2 + $0xa1] sm:$0xff] }
 0x336   : > { %v2819_v51 = vpop.f32.mrf.mxu2  ;;  %v7213_v36 = vld [vmem:[#allocation34_spill] sm:$0xff] }
 0x337   : > { %7207 = vst [vmem:[#allocation48_spill] sm:$0xff] %v6273_v32  ;;  %v6278_v57 = vadd.f32 %v2819_v51, %v7210_v37  ;;  %v1412_v16 = vadd.f32 %v7214_v12, %v7213_v36  ;;  %v7215_v51 = vld [vmem:[#allocation88_spill] sm:$0xff] }
 0x338   : > { %v1742_v3 = vpop.f32.mrf.mxu3  ;;  %v6280_v62 = vpop.f32.mrf.mxu0  ;;  %v3422_v32 = vld [vmem:[#allocation2 + $0x9f] sm:$0xff] }
 0x339   : > { %v1828_v42 = vadd.f32 %v1742_v3, %v1410_v35  ;;  %v2644_v35 = vld [vmem:[#allocation2 + $0x99] sm:$0xff]  ;;  %v3469_v28 = vpack.c.bf16 %v3423_v30, %v3422_v32 }
 0x33a   : > { %v3794_v30 = vld [vmem:[#allocation2 + $0x18] sm:$0xff] }
 0x33b   : > { %v2217_v7 = vadd.f32 %v7211_v13, %v1828_v42  ;;  %v1513_v42 = vld [vmem:[#allocation2 + $0x1b2] sm:$0xff]  ;;  %v1514_v13 = vld [vmem:[#allocation2 + $0x1ba] sm:$0xff] }
 0x33c   : > { %v2525_v63 = vpop.f32.mrf.mxu1 }
 0x33d   : > { %v6284_v18 = vadd.f32 %v2520_v39, %v2217_v7  ;;  %v2691_v39 = vpack.c.bf16 %v2645_v25, %v2644_v35  ;;  %v7216_v7 = vld [vmem:[#allocation22_spill] sm:$0xff] }
 0x33e   : > { %v2821_v15 = vpop.f32.mrf.mxu2  ;;  %v7220_v35 = vld [vmem:[#allocation62_spill] sm:$0xff] }
 0x33f   : > { %7212 = vst [vmem:[#allocation9_spill] sm:$0xff] %v6284_v18  ;;  %v6289_v37 = vadd.f32 %v2821_v15, %v7215_v51  ;;  %4801 = vmatmul.msk.bf16.gmra.mxu1 %vm445_vm0, %v2320_v49  ;;  %v1542_v15 = vpack.c.bf16 %v1514_v13, %v1513_v42  ;;  %v7218_v51 = vld [vmem:[#allocation36_spill] sm:$0xff] }
 0x340   : > { %v1744_v3 = vpop.f32.mrf.mxu3  ;;  %v6292_v55 = vpop.f32.mrf.mxu0 }
 0x341   : > { %v1829_v50 = vadd.f32 %v1744_v3, %v1412_v16  ;;  %v1415_v16 = vadd.f32 %v6050_v22, %v7218_v51  ;;  %v7219_v3 = vld [vmem:[#allocation89_spill] sm:$0xff]  ;;  %v7223_v22 = vld [vmem:[#allocation6_spill] sm:$0xff] }
 0x343   : > { %v2218_v18 = vadd.f32 %v7216_v7, %v1829_v50  ;;  %4819 = vmatmul.msk.bf16.gmra.mxu2 %vm445_vm0, %v2691_v39  ;;  %4891 = vmatmul.msk.bf16.gmra.mxu0 %vm445_vm0, %v3469_v28  ;;  %v3793_v50 = vld [vmem:[#allocation2 + $0x10] sm:$0xff] }
 0x344   : > { %v2527_v36 = vpop.f32.mrf.mxu1  ;;  %v3849_v13 = vpack.c.bf16 %v3794_v30, %v3793_v50  ;;  %v7225_v30 = vld [vmem:[#allocation67_spill] sm:$0xff] }
 0x345   : > { %4729 = vmatmul.msk.bf16.gmra.mxu3 %vm445_vm0, %v1542_v15  ;;  %v6298_v49 = vadd.f32 %v2522_v11, %v2218_v18  ;;  %v2647_v18 = vld [vmem:[#allocation2 + $0xb1] sm:$0xff] }
 0x346   : > { %v2824_v12 = vpop.f32.mrf.mxu2  ;;  %v3425_v15 = vld [vmem:[#allocation2 + $0xb7] sm:$0xff] }
 0x347   : > { %7217 = vst [vmem:[#allocation10_spill] sm:$0xff] %v6298_v49  ;;  %v6303_v48 = vadd.f32 %v2824_v12, %v7219_v3  ;;  %v7222_v49 = vld [vmem:[#allocation38_spill] sm:$0xff] }
 0x348   : > { %v1747_v32 = vpop.f32.mrf.mxu3  ;;  %v6306_v28 = vpop.f32.mrf.mxu0  ;;  %v1417_v51 = vadd.f32 %v7223_v22, %v7222_v49  ;;  %v7224_v12 = vld [vmem:[#allocation90_spill] sm:$0xff] }
 0x349   : > { %v1830_v25 = vadd.f32 %v1747_v32, %v1415_v16  ;;  %v2646_v32 = vld [vmem:[#allocation2 + $0xa9] sm:$0xff] }
 0x34a   : > { %v2692_v24 = vpack.c.bf16 %v2647_v18, %v2646_v32  ;;  %v3796_v32 = vld [vmem:[#allocation2 + $0x28] sm:$0xff] }
 0x34b   : > { %v2219_v39 = vadd.f32 %v7220_v35, %v1830_v25  ;;  %v3424_v25 = vld [vmem:[#allocation2 + $0xaf] sm:$0xff] }
 0x34c   : > { %v2530_v42 = vpop.f32.mrf.mxu1  ;;  %v3016_v35 = vld [vmem:[#allocation2 + $0x16] sm:$0xff]  ;;  %v3470_v50 = vpack.c.bf16 %v3425_v15, %v3424_v25 }
 0x34d   : > { %v6308_v7 = vadd.f32 %v2525_v63, %v2219_v39  ;;  %v3015_v63 = vld [vmem:[#allocation2 + $0xe] sm:$0xff] }
 0x34e   : > { %v2826_v11 = vpop.f32.mrf.mxu2  ;;  %v3071_v49 = vpack.c.bf16 %v3016_v35, %v3015_v63  ;;  %v7228_v15 = vld [vmem:[#allocation91_spill] sm:$0xff] }
 0x34f   : > { %7221 = vst [vmem:[#allocation30_spill] sm:$0xff] %v6308_v7  ;;  %v6313_v3 = vadd.f32 %v2826_v11, %v7224_v12  ;;  %4918 = vmatmul.msk.bf16.vlgmr.msra.gmra.mxu1 %vm445_vm0, %v3849_v13  ;;  %v7227_v7 = vld [vmem:[#allocation40_spill] sm:$0xff] }
 0x350   : > { %v1749_v16 = vpop.f32.mrf.mxu3  ;;  %v6319_v11 = vpop.f32.mrf.mxu0  ;;  %v1420_v18 = vadd.f32 %v6075_v43, %v7227_v7  ;;  %v7231_v7 = vld [vmem:[#allocation92_spill] sm:$0xff] }
 0x351   : > { %v1831_v5 = vadd.f32 %v1749_v16, %v1417_v51 }
 0x353   : > { %v2220_v39 = vadd.f32 %v7225_v30, %v1831_v5  ;;  %4820 = vmatmul.msk.bf16.gmra.mxu2 %vm445_vm0, %v2692_v24  ;;  %4892 = vmatmul.msk.bf16.gmra.mxu0 %vm445_vm0, %v3470_v50  ;;  %v3795_v24 = vld [vmem:[#allocation2 + $0x20] sm:$0xff] }
 0x354   : > { %v2532_v22 = vpop.f32.mrf.mxu1  ;;  %v3850_v50 = vpack.c.bf16 %v3796_v32, %v3795_v24  ;;  %v3017_v32 = vld [vmem:[#allocation2 + $0x1e] sm:$0xff] }
 0x355   : > { %4846 = vmatmul.msk.bf16.vlgmr.msra.gmra.mxu3 %vm445_vm0, %v3071_v49  ;;  %v6322_v13 = vadd.f32 %v2527_v36, %v2220_v39  ;;  %v2649_v36 = vld [vmem:[#allocation2 + $0xc1] sm:$0xff] }
 0x356   : > { %v2829_v12 = vpop.f32.mrf.mxu2  ;;  %v3427_v39 = vld [vmem:[#allocation2 + $0xc7] sm:$0xff] }
 0x357   : > { %7226 = vst [vmem:[#allocation78_spill] sm:$0xff] %v6322_v13  ;;  %v6327_v51 = vadd.f32 %v2829_v12, %v7228_v15  ;;  %v7230_v49 = vld [vmem:[#allocation42_spill] sm:$0xff]  ;;  %v2648_v15 = vld [vmem:[#allocation2 + $0xb9] sm:$0xff] }
 0x358   : > { %v1752_v5 = vpop.f32.mrf.mxu3  ;;  %v1422_v13 = vadd.f32 %v6084_v26, %v7230_v49  ;;  %v6334_v43 = vpop.f32.mrf.mxu0 }
 0x359   : > { %v1832_v16 = vadd.f32 %v1752_v5, %v1420_v18  ;;  %v3018_v5 = vld [vmem:[#allocation2 + $0x26] sm:$0xff] }
 0x35a   : > { %v3072_v26 = vpack.c.bf16 %v3018_v5, %v3017_v32  ;;  %v2651_v32 = vld [vmem:[#allocation2 + $0xd1] sm:$0xff] }
 0x35b   : > { %v2221_v25 = vadd.f32 %v6067_v38, %v1832_v16  ;;  %v3426_v38 = vld [vmem:[#allocation2 + $0xbf] sm:$0xff] }
 0x35c   : > { %v2535_v35 = vpop.f32.mrf.mxu1  ;;  %v3471_v24 = vpack.c.bf16 %v3427_v39, %v3426_v38  ;;  %v3798_v38 = vld [vmem:[#allocation2 + $0x38] sm:$0xff] }
 0x35d   : > { %v6330_v63 = vadd.f32 %v2530_v42, %v2221_v25  ;;  %v2693_v42 = vpack.c.bf16 %v2649_v36, %v2648_v15  ;;  %v3797_v15 = vld [vmem:[#allocation2 + $0x30] sm:$0xff] }
 0x35e   : > { %v2831_v30 = vpop.f32.mrf.mxu2 }
 0x35f   : > { %7229 = vst [vmem:[#allocation51_spill] sm:$0xff] %v6330_v63  ;;  %v6337_v12 = vadd.f32 %v2831_v30, %v7231_v7  ;;  %4919 = vmatmul.msk.bf16.gmra.mxu1 %vm445_vm0, %v3850_v50  ;;  %v7233_v7 = vld [vmem:[#allocation44_spill] sm:$0xff] }
 0x360   : > { %v1754_v18 = vpop.f32.mrf.mxu3  ;;  %v1425_v63 = vadd.f32 %v6100_v4, %v7233_v7 }
 0x361   : > { %v1833_v16 = vadd.f32 %v1754_v18, %v1422_v13  ;;  %v7234_v13 = vld [vmem:[#allocation93_spill] sm:$0xff]  ;;  %v6351_v18 = vpop.f32.mrf.mxu0 }
 0x363   : > { %v2222_v25 = vadd.f32 %v6079_v10, %v1833_v16  ;;  %4821 = vmatmul.msk.bf16.gmra.mxu2 %vm445_vm0, %v2693_v42  ;;  %4893 = vmatmul.msk.bf16.gmra.mxu0 %vm445_vm0, %v3471_v24  ;;  %v3851_v42 = vpack.c.bf16 %v3798_v38, %v3797_v15 }
 0x364   : > { %v2537_v49 = vpop.f32.mrf.mxu1 }
 0x365   : > { %4847 = vmatmul.msk.bf16.gmra.mxu3 %vm445_vm0, %v3072_v26  ;;  %v6344_v30 = vadd.f32 %v2532_v22, %v2222_v25  ;;  %v3429_v25 = vld [vmem:[#allocation2 + $0xd7] sm:$0xff]  ;;  %v7236_v26 = vld [vmem:[#allocation46_spill] sm:$0xff] }
 0x366   : > { %v2834_v50 = vpop.f32.mrf.mxu2  ;;  %v1427_v4 = vadd.f32 %v6109_v20, %v7236_v26 }
 0x367   : > { %7232 = vst [vmem:[#allocation81_spill] sm:$0xff] %v6344_v30  ;;  %v6349_v36 = vadd.f32 %v2834_v50, %v7234_v13  ;;  %v7237_v50 = vld [vmem:[#allocation94_spill] sm:$0xff]  ;;  %v3020_v30 = vld [vmem:[#allocation2 + $0x36] sm:$0xff] }
 0x368   : > { %v1757_v39 = vpop.f32.mrf.mxu3  ;;  %v2650_v13 = vld [vmem:[#allocation2 + $0xc9] sm:$0xff] }
 0x369   : > { %v1834_v10 = vadd.f32 %v1757_v39, %v1425_v63  ;;  %v3428_v39 = vld [vmem:[#allocation2 + $0xcf] sm:$0xff]  ;;  %v6362_v38 = vpop.f32.mrf.mxu0 }
 0x36a   : > { %v3472_v15 = vpack.c.bf16 %v3429_v25, %v3428_v39  ;;  %v7240_v25 = vld [vmem:[#allocation47_spill] sm:$0xff]  ;;  %v3800_v39 = vld [vmem:[#allocation2 + $0x48] sm:$0xff] }
 0x36b   : > { %v2223_v5 = vadd.f32 %v6092_v9, %v1834_v10  ;;  %v2694_v10 = vpack.c.bf16 %v2651_v32, %v2650_v13 }
 0x36c   : > { %v2540_v16 = vpop.f32.mrf.mxu1 }
 0x36d   : > { %v6354_v24 = vadd.f32 %v2535_v35, %v2223_v5  ;;  %v3019_v35 = vld [vmem:[#allocation2 + $0x2e] sm:$0xff] }
 0x36e   : > { %v2836_v22 = vpop.f32.mrf.mxu2  ;;  %v3073_v20 = vpack.c.bf16 %v3020_v30, %v3019_v35 }
 0x36f   : > { %7235 = vst [vmem:[#allocation55_spill] sm:$0xff] %v6354_v24  ;;  %v6359_v7 = vadd.f32 %v2836_v22, %v7237_v50  ;;  %4920 = vmatmul.msk.bf16.gmra.mxu1 %vm445_vm0, %v3851_v42  ;;  %v7239_v50 = vld [vmem:[#allocation49_spill] sm:$0xff] }
 0x370   : > { %v1759_v63 = vpop.f32.mrf.mxu3  ;;  %v1430_v32 = vadd.f32 %v6125_v31, %v7239_v50 }
 0x371   : > { %v1835_v9 = vadd.f32 %v1759_v63, %v1427_v4  ;;  %v6376_v30 = vpop.f32.mrf.mxu0 }
 0x373   : > { %v2224_v5 = vadd.f32 %v6104_v1, %v1835_v9  ;;  %4822 = vmatmul.msk.bf16.gmra.mxu2 %vm445_vm0, %v2694_v10  ;;  %4894 = vmatmul.msk.bf16.gmra.mxu0 %vm445_vm0, %v3472_v15  ;;  %v3799_v1 = vld [vmem:[#allocation2 + $0x40] sm:$0xff] }
 0x374   : > { %v2542_v22 = vpop.f32.mrf.mxu1  ;;  %v3852_v15 = vpack.c.bf16 %v3800_v39, %v3799_v1 }
 0x375   : > { %4848 = vmatmul.msk.bf16.gmra.mxu3 %vm445_vm0, %v3073_v20  ;;  %v6368_v42 = vadd.f32 %v2537_v49, %v2224_v5  ;;  %v2652_v5 = vld [vmem:[#allocation2 + $0xd9] sm:$0xff] }
 0x376   : > { %v2839_v26 = vpop.f32.mrf.mxu2  ;;  %v3430_v20 = vld [vmem:[#allocation2 + $0xdf] sm:$0xff] }
 0x377   : > { %7238 = vst [vmem:[#allocation11_spill] sm:$0xff] %v6368_v42  ;;  %v6373_v4 = vadd.f32 %v2839_v26, %v7240_v25  ;;  %v7241_v42 = vld [vmem:[#allocation53_spill] sm:$0xff]  ;;  %v7242_v26 = vld [vmem:[#allocation31_spill] sm:$0xff] }
 0x378   : > { %v1762_v63 = vpop.f32.mrf.mxu3  ;;  %v1432_v31 = vadd.f32 %v6134_v23, %v7241_v42  ;;  %v2653_v25 = vld [vmem:[#allocation2 + $0xe1] sm:$0xff] }
 0x379   : > { %v1836_v13 = vadd.f32 %v1762_v63, %v1430_v32  ;;  %v3022_v63 = vld [vmem:[#allocation2 + $0x46] sm:$0xff]  ;;  %v2695_v24 = vpack.c.bf16 %v2653_v25, %v2652_v5  ;;  %v7245_v5 = vld [vmem:[#allocation52_spill] sm:$0xff] }
 0x37a   : > { %v3802_v25 = vld [vmem:[#allocation2 + $0x58] sm:$0xff] }
 0x37b   : > { %v2225_v9 = vadd.f32 %v6117_v45, %v1836_v13  ;;  %v3431_v45 = vld [vmem:[#allocation2 + $0xe7] sm:$0xff] }
 0x37c   : > { %v2545_v10 = vpop.f32.mrf.mxu1  ;;  %v3473_v1 = vpack.c.bf16 %v3431_v45, %v3430_v20 }
 0x37d   : > { %v6378_v35 = vadd.f32 %v2540_v16, %v2225_v9  ;;  %v3021_v16 = vld [vmem:[#allocation2 + $0x3e] sm:$0xff] }
 0x37e   : > { %v2841_v49 = vpop.f32.mrf.mxu2  ;;  %v3074_v23 = vpack.c.bf16 %v3022_v63, %v3021_v16  ;;  %v2655_v16 = vld [vmem:[#allocation2 + $0xf1] sm:$0xff] }
 0x37f   : > { %v6383_v50 = vadd.f32 %v2841_v49, %v7242_v26  ;;  %4921 = vmatmul.msk.bf16.gmra.mxu1 %vm445_vm0, %v3852_v15  ;;  %v7244_v49 = vld [vmem:[#allocation57_spill] sm:$0xff] }
 0x380   : > { %v1764_v32 = vpop.f32.mrf.mxu3  ;;  %v1435_v26 = vadd.f32 %v6150_v0, %v7244_v49  ;;  %v7248_v49 = vld [vmem:[#allocation14_spill] sm:$0xff] }
 0x381   : > { %v1837_v13 = vadd.f32 %v1764_v32, %v1432_v31  ;;  %v6394_v31 = vpop.f32.mrf.mxu0 }
 0x383   : > { %v2226_v39 = vadd.f32 %v6129_v8, %v1837_v13  ;;  %4823 = vmatmul.msk.bf16.gmra.mxu2 %vm445_vm0, %v2695_v24  ;;  %4895 = vmatmul.msk.bf16.gmra.mxu0 %vm445_vm0, %v3473_v1  ;;  %v3801_v24 = vld [vmem:[#allocation2 + $0x50] sm:$0xff] }
 0x384   : > { %v2547_v42 = vpop.f32.mrf.mxu1  ;;  %v3853_v13 = vpack.c.bf16 %v3802_v25, %v3801_v24  ;;  %v3023_v25 = vld [vmem:[#allocation2 + $0x4e] sm:$0xff] }
 0x385   : > { %4849 = vmatmul.msk.bf16.gmra.mxu3 %vm445_vm0, %v3074_v23  ;;  %v6390_v9 = vadd.f32 %v2542_v22, %v2226_v39  ;;  %v3433_v39 = vld [vmem:[#allocation2 + $0xf7] sm:$0xff]  ;;  %v7247_v23 = vld [vmem:[#allocation61_spill] sm:$0xff] }
 0x386   : > { %v2844_v15 = vpop.f32.mrf.mxu2  ;;  %v1437_v0 = vadd.f32 %v6159_v52, %v7247_v23 }
 0x387   : > { %7243 = vst [vmem:[#allocation84_spill] sm:$0xff] %v6390_v9  ;;  %v6397_v20 = vadd.f32 %v2844_v15, %v7245_v5  ;;  %v3432_v5 = vld [vmem:[#allocation2 + $0xef] sm:$0xff] }
 0x388   : > { %v1767_v8 = vpop.f32.mrf.mxu3  ;;  %v3474_v24 = vpack.c.bf16 %v3433_v39, %v3432_v5 }
 0x389   : > { %v1838_v32 = vadd.f32 %v1767_v8, %v1435_v26  ;;  %v2654_v26 = vld [vmem:[#allocation2 + $0xe9] sm:$0xff]  ;;  %v3024_v8 = vld [vmem:[#allocation2 + $0x56] sm:$0xff] }
 0x38a   : > { %v3075_v52 = vpack.c.bf16 %v3024_v8, %v3023_v25  ;;  %v2657_v25 = vld [vmem:[#allocation2 + $0x101] sm:$0xff] }
 0x38b   : > { %v2227_v45 = vadd.f32 %v6142_v56, %v1838_v32  ;;  %v6408_v56 = vpop.f32.mrf.mxu0 }
 0x38c   : > { %v2550_v63 = vpop.f32.mrf.mxu1 }
 0x38d   : > { %v6400_v1 = vadd.f32 %v2545_v10, %v2227_v45  ;;  %v2696_v10 = vpack.c.bf16 %v2655_v16, %v2654_v26  ;;  %v3804_v26 = vld [vmem:[#allocation2 + $0x68] sm:$0xff] }
 0x38e   : > { %v2846_v22 = vpop.f32.mrf.mxu2 }
 0x38f   : > { %7246 = vst [vmem:[#allocation59_spill] sm:$0xff] %v6400_v1  ;;  %v6405_v9 = vadd.f32 %v2846_v22, %v7248_v49  ;;  %4922 = vmatmul.msk.bf16.gmra.mxu1 %vm445_vm0, %v3853_v13  ;;  %v7250_v49 = vld [vmem:[#allocation64_spill] sm:$0xff] }
 0x390   : > { %v1769_v15 = vpop.f32.mrf.mxu3  ;;  %v1440_v1 = vadd.f32 %v6175_v6, %v7250_v49 }
 0x391   : > { %v1839_v32 = vadd.f32 %v1769_v15, %v1437_v0  ;;  %v7251_v0 = vld [vmem:[#allocation18_spill] sm:$0xff] }
 0x393   : > { %v2228_v45 = vadd.f32 %v6154_v41, %v1839_v32  ;;  %4824 = vmatmul.msk.bf16.gmra.mxu2 %vm445_vm0, %v2696_v10  ;;  %4896 = vmatmul.msk.bf16.gmra.mxu0 %vm445_vm0, %v3474_v24  ;;  %v3803_v41 = vld [vmem:[#allocation2 + $0x60] sm:$0xff]  ;;  %v6421_v5 = vpop.f32.mrf.mxu0 }
 0x394   : > { %v2552_v22 = vpop.f32.mrf.mxu1  ;;  %v3854_v10 = vpack.c.bf16 %v3804_v26, %v3803_v41 }
 0x395   : > { %4850 = vmatmul.msk.bf16.gmra.mxu3 %vm445_vm0, %v3075_v52  ;;  %v6414_v13 = vadd.f32 %v2547_v42, %v2228_v45  ;;  %v3435_v45 = vld [vmem:[#allocation2 + $0x107] sm:$0xff]  ;;  %v7252_v52 = vld [vmem:[#allocation68_spill] sm:$0xff] }
 0x396   : > { %v2849_v23 = vpop.f32.mrf.mxu2  ;;  %v1442_v6 = vadd.f32 %v6184_v54, %v7252_v52 }
 0x397   : > { %7249 = vst [vmem:[#allocation86_spill] sm:$0xff] %v6414_v13  ;;  %v6419_v16 = vadd.f32 %v2849_v23, %v7251_v0  ;;  %v7253_v23 = vld [vmem:[#allocation33_spill] sm:$0xff] }
 0x398   : > { %v1772_v39 = vpop.f32.mrf.mxu3  ;;  %v2656_v0 = vld [vmem:[#allocation2 + $0xf9] sm:$0xff]  ;;  %v3026_v13 = vld [vmem:[#allocation2 + $0x66] sm:$0xff] }
 0x399   : > { %v1840_v15 = vadd.f32 %v1772_v39, %v1440_v1  ;;  %v3434_v39 = vld [vmem:[#allocation2 + $0xff] sm:$0xff] }
 0x39a   : > { %v3475_v41 = vpack.c.bf16 %v3435_v45, %v3434_v39  ;;  %v7256_v45 = vld [vmem:[#allocation35_spill] sm:$0xff]  ;;  %v3806_v39 = vld [vmem:[#allocation2 + $0x78] sm:$0xff] }
 0x39b   : > { %v2229_v8 = vadd.f32 %v6167_v60, %v1840_v15  ;;  %v2697_v15 = vpack.c.bf16 %v2657_v25, %v2656_v0  ;;  %v3805_v0 = vld [vmem:[#allocation2 + $0x70] sm:$0xff] }
 0x39c   : > { %v2555_v32 = vpop.f32.mrf.mxu1 }
 0x39d   : > { %v6424_v24 = vadd.f32 %v2550_v63, %v2229_v8  ;;  %v3025_v63 = vld [vmem:[#allocation2 + $0x5e] sm:$0xff] }
 0x39e   : > { %v2851_v42 = vpop.f32.mrf.mxu2  ;;  %v3076_v54 = vpack.c.bf16 %v3026_v13, %v3025_v63 }
 0x39f   : > { %v6429_v49 = vadd.f32 %v2851_v42, %v7253_v23  ;;  %4923 = vmatmul.msk.bf16.gmra.mxu1 %vm445_vm0, %v3854_v10  ;;  %v6435_v42 = vpop.f32.mrf.mxu0  ;;  %v7255_v23 = vld [vmem:[#allocation71_spill] sm:$0xff] }
 0x3a0   : > { %v1774_v1 = vpop.f32.mrf.mxu3  ;;  %v1445_v25 = vadd.f32 %v6200_v19, %v7255_v23 }
 0x3a1   : > { %v1841_v60 = vadd.f32 %v1774_v1, %v1442_v6 }
 0x3a3   : > { %v2230_v26 = vadd.f32 %v6179_v53, %v1841_v60  ;;  %4825 = vmatmul.msk.bf16.gmra.mxu2 %vm445_vm0, %v2697_v15  ;;  %4897 = vmatmul.msk.bf16.gmra.mxu0 %vm445_vm0, %v3475_v41  ;;  %v3855_v15 = vpack.c.bf16 %v3806_v39, %v3805_v0  ;;  %v3027_v39 = vld [vmem:[#allocation2 + $0x6e] sm:$0xff] }
 0x3a4   : > { %v2557_v8 = vpop.f32.mrf.mxu1 }
 0x3a5   : > { %4851 = vmatmul.msk.bf16.gmra.mxu3 %vm445_vm0, %v3076_v54  ;;  %v6438_v10 = vadd.f32 %v2552_v22, %v2230_v26  ;;  %v2659_v22 = vld [vmem:[#allocation2 + $0x111] sm:$0xff]  ;;  %v7258_v54 = vld [vmem:[#allocation74_spill] sm:$0xff] }
 0x3a6   : > { %v2854_v52 = vpop.f32.mrf.mxu2  ;;  %v3437_v26 = vld [vmem:[#allocation2 + $0x117] sm:$0xff] }
 0x3a7   : > { %7254 = vst [vmem:[#allocation63_spill] sm:$0xff] %v6438_v10  ;;  %v6443_v6 = vadd.f32 %v2854_v52, %v7256_v45  ;;  %v1447_v10 = vadd.f32 %v6209_v47, %v7258_v54  ;;  %v6450_v19 = vpop.f32.mrf.mxu0  ;;  %v7259_v52 = vld [vmem:[#allocation4_spill] sm:$0xff]  ;;  %v2658_v45 = vld [vmem:[#allocation2 + $0x109] sm:$0xff] }
 0x3a8   : > { %v1777_v53 = vpop.f32.mrf.mxu3 }
 0x3a9   : > { %v1842_v1 = vadd.f32 %v1777_v53, %v1445_v25  ;;  %v3028_v53 = vld [vmem:[#allocation2 + $0x76] sm:$0xff] }
 0x3aa   : > { %v3077_v47 = vpack.c.bf16 %v3028_v53, %v3027_v39  ;;  %v2661_v39 = vld [vmem:[#allocation2 + $0x121] sm:$0xff] }
 0x3ab   : > { %v2231_v13 = vadd.f32 %v6192_v33, %v1842_v1  ;;  %v3436_v33 = vld [vmem:[#allocation2 + $0x10f] sm:$0xff] }
 0x3ac   : > { %v2560_v60 = vpop.f32.mrf.mxu1  ;;  %v3476_v0 = vpack.c.bf16 %v3437_v26, %v3436_v33  ;;  %v3808_v33 = vld [vmem:[#allocation2 + $0x88] sm:$0xff] }
 0x3ad   : > { %v6446_v41 = vadd.f32 %v2555_v32, %v2231_v13  ;;  %v2698_v32 = vpack.c.bf16 %v2659_v22, %v2658_v45  ;;  %v3807_v45 = vld [vmem:[#allocation2 + $0x80] sm:$0xff] }
 0x3ae   : > { %v2856_v63 = vpop.f32.mrf.mxu2 }
 0x3af   : > { %7257 = vst [vmem:[#allocation12_spill] sm:$0xff] %v6446_v41  ;;  %v6453_v23 = vadd.f32 %v2856_v63, %v7259_v52  ;;  %4924 = vmatmul.msk.bf16.gmra.mxu1 %vm445_vm0, %v3855_v15  ;;  %v7261_v52 = vld [vmem:[#allocation77_spill] sm:$0xff] }
 0x3b0   : > { %v1779_v25 = vpop.f32.mrf.mxu3  ;;  %v1450_v41 = vadd.f32 %v6225_v21, %v7261_v52 }
 0x3b1   : > { %v1843_v1 = vadd.f32 %v1779_v25, %v1447_v10  ;;  %v7262_v10 = vld [vmem:[#allocation58_spill] sm:$0xff]  ;;  %v6467_v25 = vpop.f32.mrf.mxu0 }
 0x3b3   : > { %v2232_v13 = vadd.f32 %v6204_v44, %v1843_v1  ;;  %4826 = vmatmul.msk.bf16.gmra.mxu2 %vm445_vm0, %v2698_v32  ;;  %4898 = vmatmul.msk.bf16.gmra.mxu0 %vm445_vm0, %v3476_v0  ;;  %v3856_v32 = vpack.c.bf16 %v3808_v33, %v3807_v45 }
 0x3b4   : > { %v2562_v54 = vpop.f32.mrf.mxu1 }
 0x3b5   : > { %4852 = vmatmul.msk.bf16.gmra.mxu3 %vm445_vm0, %v3077_v47  ;;  %v6460_v63 = vadd.f32 %v2557_v8, %v2232_v13  ;;  %v3439_v13 = vld [vmem:[#allocation2 + $0x127] sm:$0xff]  ;;  %v7264_v47 = vld [vmem:[#allocation80_spill] sm:$0xff] }
 0x3b6   : > { %v2859_v15 = vpop.f32.mrf.mxu2  ;;  %v1452_v21 = vadd.f32 %v6234_v2, %v7264_v47 }
 0x3b7   : > { %7260 = vst [vmem:[#allocation66_spill] sm:$0xff] %v6460_v63  ;;  %v6465_v22 = vadd.f32 %v2859_v15, %v7262_v10  ;;  %v7265_v15 = vld [vmem:[#allocation39_spill] sm:$0xff]  ;;  %v2660_v10 = vld [vmem:[#allocation2 + $0x119] sm:$0xff]  ;;  %v3030_v63 = vld [vmem:[#allocation2 + $0x86] sm:$0xff] }
 0x3b8   : > { %v1782_v26 = vpop.f32.mrf.mxu3 }
 0x3b9   : > { %v1844_v44 = vadd.f32 %v1782_v26, %v1450_v41  ;;  %v3438_v26 = vld [vmem:[#allocation2 + $0x11f] sm:$0xff]  ;;  %v6478_v33 = vpop.f32.mrf.mxu0 }
 0x3ba   : > { %v3477_v45 = vpack.c.bf16 %v3439_v13, %v3438_v26  ;;  %v7268_v13 = vld [vmem:[#allocation5_spill] sm:$0xff]  ;;  %v3810_v26 = vld [vmem:[#allocation2 + $0x98] sm:$0xff] }
 0x3bb   : > { %v2233_v53 = vadd.f32 %v6217_v34, %v1844_v44  ;;  %v2699_v44 = vpack.c.bf16 %v2661_v39, %v2660_v10 }
 0x3bc   : > { %v2565_v1 = vpop.f32.mrf.mxu1 }
 0x3bd   : > { %v6470_v0 = vadd.f32 %v2560_v60, %v2233_v53  ;;  %v3029_v60 = vld [vmem:[#allocation2 + $0x7e] sm:$0xff] }
 0x3be   : > { %v2861_v8 = vpop.f32.mrf.mxu2  ;;  %v3078_v2 = vpack.c.bf16 %v3030_v63, %v3029_v60 }
 0x3bf   : > { %7263 = vst [vmem:[#allocation70_spill] sm:$0xff] %v6470_v0  ;;  %v6475_v52 = vadd.f32 %v2861_v8, %v7265_v15  ;;  %4925 = vmatmul.msk.bf16.gmra.mxu1 %vm445_vm0, %v3856_v32  ;;  %v7267_v15 = vld [vmem:[#allocation83_spill] sm:$0xff] }
 0x3c0   : > { %v1784_v41 = vpop.f32.mrf.mxu3  ;;  %v1455_v39 = vadd.f32 %v6250_v61, %v7267_v15 }
 0x3c1   : > { %v1845_v34 = vadd.f32 %v1784_v41, %v1452_v21  ;;  %v6492_v63 = vpop.f32.mrf.mxu0 }
 0x3c3   : > { %v2234_v53 = vadd.f32 %v6229_v27, %v1845_v34  ;;  %4827 = vmatmul.msk.bf16.gmra.mxu2 %vm445_vm0, %v2699_v44  ;;  %4899 = vmatmul.msk.bf16.gmra.mxu0 %vm445_vm0, %v3477_v45  ;;  %v3809_v27 = vld [vmem:[#allocation2 + $0x90] sm:$0xff] }
 0x3c4   : > { %v2567_v8 = vpop.f32.mrf.mxu1  ;;  %v3857_v45 = vpack.c.bf16 %v3810_v26, %v3809_v27 }
 0x3c5   : > { %4853 = vmatmul.msk.bf16.gmra.mxu3 %vm445_vm0, %v3078_v2  ;;  %v6484_v32 = vadd.f32 %v2562_v54, %v2234_v53  ;;  %v2663_v53 = vld [vmem:[#allocation2 + $0x131] sm:$0xff] }
 0x3c6   : > { %v2864_v47 = vpop.f32.mrf.mxu2  ;;  %v3441_v2 = vld [vmem:[#allocation2 + $0x137] sm:$0xff] }
 0x3c7   : > { %7266 = vst [vmem:[#allocation13_spill] sm:$0xff] %v6484_v32  ;;  %v6489_v21 = vadd.f32 %v2864_v47, %v7268_v13  ;;  %v7269_v32 = vld [vmem:[#allocation85_spill] sm:$0xff]  ;;  %v2662_v13 = vld [vmem:[#allocation2 + $0x129] sm:$0xff] }
 0x3c8   : > { %v1787_v41 = vpop.f32.mrf.mxu3  ;;  %v1457_v61 = vadd.f32 %v6259_v29, %v7269_v32  ;;  %v7270_v47 = vld [vmem:[#allocation21_spill] sm:$0xff]  ;;  %v2700_v0 = vpack.c.bf16 %v2663_v53, %v2662_v13 }
 0x3c9   : > { %v1846_v10 = vadd.f32 %v1787_v41, %v1455_v39  ;;  %v3032_v41 = vld [vmem:[#allocation2 + $0x96] sm:$0xff]  ;;  %v6518_v13 = vld [vmem:[%s6955_s4] ss:$0 sm:$0xff] }
 0x3cb   : > { %v2235_v34 = vadd.f32 %v6242_v40, %v1846_v10  ;;  %v3440_v40 = vld [vmem:[#allocation2 + $0x12f] sm:$0xff] }
 0x3cc   : > { %v3986_v44 = vpop.f32.mrf.mxu1  ;;  %v3478_v27 = vpack.c.bf16 %v3441_v2, %v3440_v40 }
 0x3cd   : > { %v6494_v60 = vadd.f32 %v2565_v1, %v2235_v34  ;;  %v3031_v1 = vld [vmem:[#allocation2 + $0x8e] sm:$0xff] }
 0x3ce   : > { %v2866_v54 = vpop.f32.mrf.mxu2  ;;  %v3079_v29 = vpack.c.bf16 %v3032_v41, %v3031_v1  ;;  %v3443_v1 = vld [vmem:[#allocation2 + $0x147] sm:$0xff] }
 0x3cf   : > { %v6499_v15 = vadd.f32 %v2866_v54, %v7270_v47  ;;  %4926 = vmatmul.msk.bf16.gmra.mxu1 %vm445_vm0, %v3857_v45  ;;  %v6508_v54 = vpop.f32.mrf.mxu0  ;;  %v7271_v47 = vld [vmem:[#allocation26_spill] sm:$0xff] }
 0x3d0   : > { %v1789_v39 = vpop.f32.mrf.mxu3 }
 0x3d1   : > { %v1847_v10 = vadd.f32 %v1789_v39, %v1457_v61  ;;  %v3812_v39 = vld [vmem:[#allocation2 + $0xa8] sm:$0xff] }
 0x3d3   : > { %v2236_v26 = vadd.f32 %v6254_v59, %v1847_v10  ;;  %4828 = vmatmul.msk.bf16.gmra.mxu2 %vm445_vm0, %v2700_v0  ;;  %4900 = vmatmul.msk.bf16.gmra.mxu0 %vm445_vm0, %v3478_v27  ;;  %v3811_v59 = vld [vmem:[#allocation2 + $0xa0] sm:$0xff] }
 0x3d4   : > { %v3988_v32 = vpop.f32.mrf.mxu1  ;;  %v3858_v41 = vpack.c.bf16 %v3812_v39, %v3811_v59  ;;  %v2665_v27 = vld [vmem:[#allocation2 + $0x141] sm:$0xff] }
 0x3d5   : > { %4854 = vmatmul.msk.bf16.gmra.mxu3 %vm445_vm0, %v3079_v29  ;;  %v6506_v34 = vadd.f32 %v2567_v8, %v2236_v26  ;;  %v2664_v29 = vld [vmem:[#allocation2 + $0x139] sm:$0xff] }
 0x3d6   : > { %v2869_v45 = vpop.f32.mrf.mxu2  ;;  %v2701_v59 = vpack.c.bf16 %v2665_v27, %v2664_v29 }
 0x3d7   : > { %v6511_v61 = vadd.f32 %v2869_v45, %v7271_v47  ;;  %v3442_v45 = vld [vmem:[#allocation2 + $0x13f] sm:$0xff] }
 0x3d8   : > { %v3208_v53 = vpop.f32.mrf.mxu3  ;;  %v3034_v47 = vld [vmem:[#allocation2 + $0xa6] sm:$0xff]  ;;  %v3479_v39 = vpack.c.bf16 %v3443_v1, %v3442_v45 }
 0x3d9   : > { %v3348_v2 = vadd.f32 %v3208_v53, %v6278_v57  ;;  %v6525_v53 = vpop.f32.mrf.mxu0 }
 0x3db   : > { %v3737_v0 = vadd.f32 %v6267_v58, %v3348_v2 }
 0x3dc   : > { %v3991_v8 = vpop.f32.mrf.mxu1 }
 0x3dd   : > { %v4126_v40 = vadd.f32 %v3986_v44, %v3737_v0 }
 0x3de   : > { %v2871_v10 = vpop.f32.mrf.mxu2 }
 0x3df   : > { %v4186_v26 = vadd.f32 %v6518_v13, %v4126_v40  ;;  %v6522_v57 = vadd.f32 %v2871_v10, %v6098_v46  ;;  %4927 = vmatmul.msk.bf16.gmra.mxu1 %vm445_vm0, %v3858_v41  ;;  %v3033_v46 = vld [vmem:[#allocation2 + $0x9e] sm:$0xff] }
 0x3e0   : > { %v3210_v58 = vpop.f32.mrf.mxu3  ;;  %v3080_v41 = vpack.c.bf16 %v3034_v47, %v3033_v46 }
 0x3e1   : > { %v4242_v2 = vmax.f32 %v4186_v26, 0.0  ;;  %v3349_v44 = vadd.f32 %v3210_v58, %v6289_v37  ;;  %v7272_v26 = vld [vmem:[#allocation65_spill] sm:$0xff]  ;;  %v6546_v47 = vpop.f32.mrf.mxu0 }
 0x3e3   : > { %v4298_v0 = vpack.c.bf16 %v4242_v2, %v4242_v2  ;;  %v3738_v40 = vadd.f32 %v6280_v62, %v3349_v44  ;;  %4829 = vmatmul.msk.bf16.gmra.mxu2 %vm445_vm0, %v2701_v59  ;;  %4901 = vmatmul.msk.bf16.gmra.mxu0 %vm445_vm0, %v3479_v39  ;;  %v3813_v2 = vld [vmem:[#allocation2 + $0xb0] sm:$0xff]  ;;  %v3814_v44 = vld [vmem:[#allocation2 + $0xb8] sm:$0xff] }
 0x3e4   : > { %v3993_v37 = vpop.f32.mrf.mxu1 }
 0x3e5   : > { %4355 = vst.msk [vmem:[%s6533_s27] sm:$0xf] %vm4354_vm1, %v4298_v0  ;;  %v4127_v10 = vadd.f32 %v3988_v32, %v3738_v40  ;;  %4855 = vmatmul.msk.bf16.gmra.mxu3 %vm445_vm0, %v3080_v41  ;;  %v3859_v0 = vpack.c.bf16 %v3814_v44, %v3813_v2  ;;  %v2667_v41 = vld [vmem:[#allocation2 + $0x151] sm:$0xff] }
 0x3e6   : > { %v2874_v27 = vpop.f32.mrf.mxu2  ;;  %v3035_v44 = vld [vmem:[#allocation2 + $0xae] sm:$0xff] }
 0x3e7   : > { %v4187_v1 = vadd.f32 %v6518_v13, %v4127_v10  ;;  %v6543_v58 = vadd.f32 %v2874_v27, %v7272_v26  ;;  %v3445_v10 = vld [vmem:[#allocation2 + $0x157] sm:$0xff]  ;;  %v2666_v26 = vld [vmem:[#allocation2 + $0x149] sm:$0xff] }
 0x3e8   : > { %v3213_v29 = vpop.f32.mrf.mxu3 }
 0x3e9   : > { %v4243_v62 = vmax.f32 %v4187_v1, 0.0  ;;  %v3350_v45 = vadd.f32 %v3213_v29, %v6303_v48  ;;  %v3444_v29 = vld [vmem:[#allocation2 + $0x14f] sm:$0xff] }
 0x3ea   : > { %v3480_v2 = vpack.c.bf16 %v3445_v10, %v3444_v29  ;;  %v3816_v29 = vld [vmem:[#allocation2 + $0xc8] sm:$0xff] }
 0x3eb   : > { %v4299_v59 = vpack.c.bf16 %v4243_v62, %v4243_v62  ;;  %v3739_v39 = vadd.f32 %v6292_v55, %v3350_v45  ;;  %v3036_v55 = vld [vmem:[#allocation2 + $0xb6] sm:$0xff] }
 0x3ec   : > { %v3996_v32 = vpop.f32.mrf.mxu1 }
 0x3ed   : > { %4356 = vst.msk [vmem:[%s6533_s27 + $0x4] sm:$0xf] %vm4354_vm1, %v4299_v59  ;;  %v4128_v46 = vadd.f32 %v3991_v8, %v3739_v39  ;;  %v2702_v8 = vpack.c.bf16 %v2667_v41, %v2666_v26  ;;  %v3815_v26 = vld [vmem:[#allocation2 + $0xc0] sm:$0xff] }
 0x3ee   : > { %v2876_v40 = vpop.f32.mrf.mxu2 }
 0x3ef   : > { %v4188_v27 = vadd.f32 %v6518_v13, %v4128_v46  ;;  %v6553_v1 = vadd.f32 %v2876_v40, %v6123_v14  ;;  %4928 = vmatmul.msk.bf16.gmra.mxu1 %vm445_vm0, %v3859_v0  ;;  %v3081_v14 = vpack.c.bf16 %v3036_v55, %v3035_v44  ;;  %v6560_v0 = vpop.f32.mrf.mxu0  ;;  %v2669_v44 = vld [vmem:[#allocation2 + $0x161] sm:$0xff] }
 0x3f0   : > { %v3215_v48 = vpop.f32.mrf.mxu3 }
 0x3f1   : > { %v4244_v62 = vmax.f32 %v4188_v27, 0.0  ;;  %v3351_v45 = vadd.f32 %v3215_v48, %v6313_v3 }
 0x3f3   : > { %v4300_v59 = vpack.c.bf16 %v4244_v62, %v4244_v62  ;;  %v3740_v39 = vadd.f32 %v6306_v28, %v3351_v45  ;;  %4830 = vmatmul.msk.bf16.gmra.mxu2 %vm445_vm0, %v2702_v8  ;;  %4902 = vmatmul.msk.bf16.gmra.mxu0 %vm445_vm0, %v3480_v2  ;;  %v3860_v8 = vpack.c.bf16 %v3816_v29, %v3815_v26  ;;  %v3037_v26 = vld [vmem:[#allocation2 + $0xbe] sm:$0xff] }
 0x3f4   : > { %v3998_v46 = vpop.f32.mrf.mxu1 }
 0x3f5   : > { %4357 = vst.msk [vmem:[%s6533_s27 + $0x8] sm:$0xf] %vm4354_vm1, %v4300_v59  ;;  %v4129_v40 = vadd.f32 %v3993_v37, %v3740_v39  ;;  %4856 = vmatmul.msk.bf16.gmra.mxu3 %vm445_vm0, %v3081_v14  ;;  %v3447_v59 = vld [vmem:[#allocation2 + $0x167] sm:$0xff] }
 0x3f6   : > { %v2879_v3 = vpop.f32.mrf.mxu2  ;;  %v7273_v14 = vld [vmem:[#allocation41_spill] sm:$0xff] }
 0x3f7   : > { %v4189_v41 = vadd.f32 %v6518_v13, %v4129_v40  ;;  %v6567_v10 = vadd.f32 %v2879_v3, %v6132_v17  ;;  %v6573_v39 = vpop.f32.mrf.mxu0  ;;  %v3446_v3 = vld [vmem:[#allocation2 + $0x15f] sm:$0xff] }
 0x3f8   : > { %v3218_v28 = vpop.f32.mrf.mxu3 }
 0x3f9   : > { %v4245_v27 = vmax.f32 %v4189_v41, 0.0  ;;  %v3352_v48 = vadd.f32 %v3218_v28, %v6327_v51  ;;  %v3038_v41 = vld [vmem:[#allocation2 + $0xc6] sm:$0xff] }
 0x3fb   : > { %v4301_v55 = vpack.c.bf16 %v4245_v27, %v4245_v27  ;;  %v3741_v62 = vadd.f32 %v6319_v11, %v3352_v48  ;;  %v2668_v11 = vld [vmem:[#allocation2 + $0x159] sm:$0xff]  ;;  %v3481_v48 = vpack.c.bf16 %v3447_v59, %v3446_v3 }
 0x3fc   : > { %v4001_v45 = vpop.f32.mrf.mxu1  ;;  %v2703_v27 = vpack.c.bf16 %v2669_v44, %v2668_v11  ;;  %v7274_v44 = vld [vmem:[#allocation69_spill] sm:$0xff]  ;;  %v3817_v11 = vld [vmem:[#allocation2 + $0xd0] sm:$0xff]  ;;  %v3818_v3 = vld [vmem:[#allocation2 + $0xd8] sm:$0xff] }
 0x3fd   : > { %4358 = vst.msk [vmem:[%s6533_s27 + $0xc] sm:$0xf] %vm4354_vm1, %v4301_v55  ;;  %v4130_v37 = vadd.f32 %v3996_v32, %v3741_v62  ;;  %v3082_v62 = vpack.c.bf16 %v3038_v41, %v3037_v26  ;;  %v2671_v26 = vld [vmem:[#allocation2 + $0x171] sm:$0xff] }
 0x3fe   : > { %v2881_v2 = vpop.f32.mrf.mxu2 }
 0x3ff   : > { %v4190_v17 = vadd.f32 %v6518_v13, %v4130_v37  ;;  %v6577_v40 = vadd.f32 %v2881_v2, %v7273_v14  ;;  %4929 = vmatmul.msk.bf16.gmra.mxu1 %vm445_vm0, %v3860_v8 }
 0x400   : > { %v3220_v51 = vpop.f32.mrf.mxu3 }
 0x401   : > { %v4246_v28 = vmax.f32 %v4190_v17, 0.0  ;;  %v3353_v32 = vadd.f32 %v3220_v51, %v6337_v12 }
 0x403   : > { %v4302_v29 = vpack.c.bf16 %v4246_v28, %v4246_v28  ;;  %v3742_v55 = vadd.f32 %v6334_v43, %v3353_v32  ;;  %4831 = vmatmul.msk.bf16.gmra.mxu2 %vm445_vm0, %v2703_v27  ;;  %4903 = vmatmul.msk.bf16.gmra.mxu0 %vm445_vm0, %v3481_v48  ;;  %v6591_v43 = vpop.f32.mrf.mxu0  ;;  %v3861_v27 = vpack.c.bf16 %v3818_v3, %v3817_v11 }
 0x404   : > { %v4003_v37 = vpop.f32.mrf.mxu1 }
 0x405   : > { %4359 = vst.msk [vmem:[%s6533_s27 + $0x10] sm:$0xf] %vm4354_vm1, %v4302_v29  ;;  %v4131_v8 = vadd.f32 %v3998_v46, %v3742_v55  ;;  %4857 = vmatmul.msk.bf16.gmra.mxu3 %vm445_vm0, %v3082_v62  ;;  %v3449_v29 = vld [vmem:[#allocation2 + $0x177] sm:$0xff] }
 0x406   : > { %v2884_v2 = vpop.f32.mrf.mxu2  ;;  %v7275_v62 = vld [vmem:[#allocation43_spill] sm:$0xff] }
 0x407   : > { %v4191_v12 = vadd.f32 %v6518_v13, %v4131_v8  ;;  %v6589_v59 = vadd.f32 %v2884_v2, %v7274_v44  ;;  %v2670_v2 = vld [vmem:[#allocation2 + $0x169] sm:$0xff] }
 0x408   : > { %v3223_v17 = vpop.f32.mrf.mxu3 }
 0x409   : > { %v4247_v14 = vmax.f32 %v4191_v12, 0.0  ;;  %v3354_v51 = vadd.f32 %v3223_v17, %v6349_v36  ;;  %v3448_v12 = vld [vmem:[#allocation2 + $0x16f] sm:$0xff] }
 0x40b   : > { %v4303_v41 = vpack.c.bf16 %v4247_v14, %v4247_v14  ;;  %v3743_v28 = vadd.f32 %v6351_v18, %v3354_v51  ;;  %v3040_v18 = vld [vmem:[#allocation2 + $0xd6] sm:$0xff]  ;;  %v3482_v14 = vpack.c.bf16 %v3449_v29, %v3448_v12  ;;  %v3039_v51 = vld [vmem:[#allocation2 + $0xce] sm:$0xff]  ;;  %v6603_v11 = vpop.f32.mrf.mxu0 }
 0x40c   : > { %v4006_v46 = vpop.f32.mrf.mxu1 }
 0x40d   : > { %4360 = vst.msk [vmem:[%s6533_s27 + $0x14] sm:$0xf] %vm4354_vm1, %v4303_v41  ;;  %v4132_v32 = vadd.f32 %v4001_v45, %v3743_v28  ;;  %v2704_v45 = vpack.c.bf16 %v2671_v26, %v2670_v2  ;;  %v3083_v28 = vpack.c.bf16 %v3040_v18, %v3039_v51  ;;  %v7276_v26 = vld [vmem:[#allocation7_spill] sm:$0xff]  ;;  %v2673_v51 = vld [vmem:[#allocation2 + $0x181] sm:$0xff] }
 0x40e   : > { %v2886_v48 = vpop.f32.mrf.mxu2 }
 0x40f   : > { %v4192_v55 = vadd.f32 %v6518_v13, %v4132_v32  ;;  %v6599_v8 = vadd.f32 %v2886_v48, %v7275_v62  ;;  %4930 = vmatmul.msk.bf16.gmra.mxu1 %vm445_vm0, %v3861_v27 }
 0x410   : > { %v3225_v36 = vpop.f32.mrf.mxu3 }
 0x411   : > { %v4248_v44 = vmax.f32 %v4192_v55, 0.0  ;;  %v3355_v17 = vadd.f32 %v3225_v36, %v6359_v7  ;;  %v3820_v36 = vld [vmem:[#allocation2 + $0xe8] sm:$0xff] }
 0x413   : > { %v4304_v3 = vpack.c.bf16 %v4248_v44, %v4248_v44  ;;  %v3744_v41 = vadd.f32 %v6362_v38, %v3355_v17  ;;  %4832 = vmatmul.msk.bf16.gmra.mxu2 %vm445_vm0, %v2704_v45  ;;  %4904 = vmatmul.msk.bf16.gmra.mxu0 %vm445_vm0, %v3482_v14  ;;  %v3819_v44 = vld [vmem:[#allocation2 + $0xe0] sm:$0xff]  ;;  %v6617_v17 = vpop.f32.mrf.mxu0 }
 0x414   : > { %v4008_v32 = vpop.f32.mrf.mxu1  ;;  %v3862_v45 = vpack.c.bf16 %v3820_v36, %v3819_v44 }
 0x415   : > { %4361 = vst.msk [vmem:[%s6533_s27 + $0x18] sm:$0xf] %vm4354_vm1, %v4304_v3  ;;  %v4133_v27 = vadd.f32 %v4003_v37, %v3744_v41  ;;  %4858 = vmatmul.msk.bf16.gmra.mxu3 %vm445_vm0, %v3083_v28  ;;  %v3451_v3 = vld [vmem:[#allocation2 + $0x187] sm:$0xff]  ;;  %v7277_v28 = vld [vmem:[#allocation8_spill] sm:$0xff] }
 0x416   : > { %v2889_v7 = vpop.f32.mrf.mxu2 }
 0x417   : > { %v4193_v48 = vadd.f32 %v6518_v13, %v4133_v27  ;;  %v6613_v29 = vadd.f32 %v2889_v7, %v7276_v26  ;;  %v3450_v7 = vld [vmem:[#allocation2 + $0x17f] sm:$0xff] }
 0x418   : > { %v3228_v55 = vpop.f32.mrf.mxu3 }
 0x419   : > { %v4249_v38 = vmax.f32 %v4193_v48, 0.0  ;;  %v3356_v62 = vadd.f32 %v3228_v55, %v6373_v4  ;;  %v3041_v48 = vld [vmem:[#allocation2 + $0xde] sm:$0xff] }
 0x41b   : > { %v4305_v2 = vpack.c.bf16 %v4249_v38, %v4249_v38  ;;  %v3745_v12 = vadd.f32 %v6376_v30, %v3356_v62  ;;  %v2672_v30 = vld [vmem:[#allocation2 + $0x179] sm:$0xff]  ;;  %v3483_v38 = vpack.c.bf16 %v3451_v3, %v3450_v7  ;;  %v3042_v62 = vld [vmem:[#allocation2 + $0xe6] sm:$0xff] }
 0x41c   : > { %v4011_v18 = vpop.f32.mrf.mxu1 }
 0x41d   : > { %4362 = vst.msk [vmem:[%s6533_s27 + $0x1c] sm:$0xf] %vm4354_vm1, %v4305_v2  ;;  %v4134_v37 = vadd.f32 %v4006_v46, %v3745_v12  ;;  %v2705_v46 = vpack.c.bf16 %v2673_v51, %v2672_v30  ;;  %v3084_v12 = vpack.c.bf16 %v3042_v62, %v3041_v48  ;;  %v7278_v51 = vld [vmem:[#allocation25_spill] sm:$0xff]  ;;  %v3453_v62 = vld [vmem:[#allocation2 + $0x197] sm:$0xff] }
 0x41e   : > { %v2891_v14 = vpop.f32.mrf.mxu2 }
 0x41f   : > { %v4194_v41 = vadd.f32 %v6518_v13, %v4134_v37  ;;  %v6623_v27 = vadd.f32 %v2891_v14, %v7277_v28  ;;  %4931 = vmatmul.msk.bf16.gmra.mxu1 %vm445_vm0, %v3862_v45 }
 0x420   : > { %v3230_v4 = vpop.f32.mrf.mxu3 }
 0x421   : > { %v4250_v26 = vmax.f32 %v4194_v41, 0.0  ;;  %v3357_v55 = vadd.f32 %v3230_v4, %v6383_v50  ;;  %v6633_v50 = vpop.f32.mrf.mxu0  ;;  %v3822_v4 = vld [vmem:[#allocation2 + $0xf8] sm:$0xff] }
 0x423   : > { %v4306_v36 = vpack.c.bf16 %v4250_v26, %v4250_v26  ;;  %v3746_v2 = vadd.f32 %v6394_v31, %v3357_v55  ;;  %4833 = vmatmul.msk.bf16.gmra.mxu2 %vm445_vm0, %v2705_v46  ;;  %4905 = vmatmul.msk.bf16.gmra.mxu0 %vm445_vm0, %v3483_v38  ;;  %v2675_v38 = vld [vmem:[#allocation2 + $0x191] sm:$0xff] }
 0x424   : > { %v4013_v44 = vpop.f32.mrf.mxu1 }
 0x425   : > { %4363 = vst.msk [vmem:[%s6533_s27 + $0x20] sm:$0xf] %vm4354_vm1, %v4306_v36  ;;  %v4135_v37 = vadd.f32 %v4008_v32, %v3746_v2  ;;  %4859 = vmatmul.msk.bf16.gmra.mxu3 %vm445_vm0, %v3084_v12  ;;  %v3821_v32 = vld [vmem:[#allocation2 + $0xf0] sm:$0xff]  ;;  %v7279_v2 = vld [vmem:[#allocation29_spill] sm:$0xff] }
 0x426   : > { %v2894_v45 = vpop.f32.mrf.mxu2  ;;  %v3863_v55 = vpack.c.bf16 %v3822_v4, %v3821_v32 }
 0x427   : > { %v4195_v14 = vadd.f32 %v6518_v13, %v4135_v37  ;;  %v6637_v3 = vadd.f32 %v2894_v45, %v7278_v51  ;;  %v2674_v37 = vld [vmem:[#allocation2 + $0x189] sm:$0xff]  ;;  %v3044_v45 = vld [vmem:[#allocation2 + $0xf6] sm:$0xff] }
 0x428   : > { %v3233_v31 = vpop.f32.mrf.mxu3 }
 0x429   : > { %v4251_v41 = vmax.f32 %v4195_v14, 0.0  ;;  %v3358_v28 = vadd.f32 %v3233_v31, %v6397_v20  ;;  %v6648_v14 = vpop.f32.mrf.mxu0  ;;  %v2706_v31 = vpack.c.bf16 %v2675_v38, %v2674_v37  ;;  %v3823_v37 = vld [vmem:[#allocation2 + $0x100] sm:$0xff] }
 0x42b   : > { %v4307_v30 = vpack.c.bf16 %v4251_v41, %v4251_v41  ;;  %v3747_v7 = vadd.f32 %v6408_v56, %v3358_v28  ;;  %v3452_v56 = vld [vmem:[#allocation2 + $0x18f] sm:$0xff] }
 0x42c   : > { %v4016_v48 = vpop.f32.mrf.mxu1  ;;  %v3484_v41 = vpack.c.bf16 %v3453_v62, %v3452_v56  ;;  %v3043_v28 = vld [vmem:[#allocation2 + $0xee] sm:$0xff] }
 0x42d   : > { %4364 = vst.msk [vmem:[%s6533_s27 + $0x24] sm:$0xf] %vm4354_vm1, %v4307_v30  ;;  %v4136_v26 = vadd.f32 %v4011_v18, %v3747_v7  ;;  %v3085_v7 = vpack.c.bf16 %v3044_v45, %v3043_v28  ;;  %v3824_v62 = vld [vmem:[#allocation2 + $0x108] sm:$0xff] }
 0x42e   : > { %v2896_v46 = vpop.f32.mrf.mxu2  ;;  %v2677_v45 = vld [vmem:[#allocation2 + $0x1a1] sm:$0xff] }
 0x42f   : > { %v4196_v36 = vadd.f32 %v6518_v13, %v4136_v26  ;;  %v6645_v12 = vadd.f32 %v2896_v46, %v7279_v2  ;;  %4932 = vmatmul.msk.bf16.gmra.mxu1 %vm445_vm0, %v3863_v55  ;;  %v3046_v28 = vld [vmem:[#allocation2 + $0x106] sm:$0xff] }
 0x430   : > { %v3235_v20 = vpop.f32.mrf.mxu3 }
 0x431   : > { %v4252_v51 = vmax.f32 %v4196_v36, 0.0  ;;  %v3359_v18 = vadd.f32 %v3235_v20, %v6405_v9 }
 0x433   : > { %v4308_v4 = vpack.c.bf16 %v4252_v51, %v4252_v51  ;;  %v3748_v30 = vadd.f32 %v6421_v5, %v3359_v18  ;;  %4834 = vmatmul.msk.bf16.gmra.mxu2 %vm445_vm0, %v2706_v31  ;;  %4906 = vmatmul.msk.bf16.gmra.mxu0 %vm445_vm0, %v3484_v41  ;;  %v6659_v5 = vpop.f32.mrf.mxu0  ;;  %v3455_v51 = vld [vmem:[#allocation2 + $0x1a7] sm:$0xff]  ;;  %v3454_v41 = vld [vmem:[#allocation2 + $0x19f] sm:$0xff] }
 0x434   : > { %v4018_v32 = vpop.f32.mrf.mxu1 }
 0x435   : > { %4365 = vst.msk [vmem:[%s6533_s27 + $0x28] sm:$0xf] %vm4354_vm1, %v4308_v4  ;;  %v4137_v26 = vadd.f32 %v4013_v44, %v3748_v30  ;;  %4860 = vmatmul.msk.bf16.gmra.mxu3 %vm445_vm0, %v3085_v7  ;;  %v3864_v44 = vpack.c.bf16 %v3824_v62, %v3823_v37  ;;  %v3485_v7 = vpack.c.bf16 %v3455_v51, %v3454_v41  ;;  %v3826_v37 = vld [vmem:[#allocation2 + $0x118] sm:$0xff]  ;;  %v3825_v51 = vld [vmem:[#allocation2 + $0x110] sm:$0xff] }
 0x437   : > { %v4197_v9 = vadd.f32 %v6518_v13, %v4137_v26  ;;  %v3045_v26 = vld [vmem:[#allocation2 + $0xfe] sm:$0xff] }
 0x438   : > { %v3238_v55 = vpop.f32.mrf.mxu3 }
 0x439   : > { %v4253_v46 = vmax.f32 %v4197_v9, 0.0  ;;  %v3360_v38 = vadd.f32 %v3238_v55, %v6419_v16  ;;  %v2676_v16 = vld [vmem:[#allocation2 + $0x199] sm:$0xff]  ;;  %v3086_v55 = vpack.c.bf16 %v3046_v28, %v3045_v26 }
 0x43a   : > { %v2707_v30 = vpack.c.bf16 %v2677_v45, %v2676_v16  ;;  %v2679_v16 = vld [vmem:[#allocation2 + $0x1b1] sm:$0xff] }
 0x43b   : > { %v4309_v36 = vpack.c.bf16 %v4253_v46, %v4253_v46  ;;  %v3749_v2 = vadd.f32 %v6435_v42, %v3360_v38  ;;  %v6670_v38 = vpop.f32.mrf.mxu0 }
 0x43c   : > { %v4021_v20 = vpop.f32.mrf.mxu1 }
 0x43d   : > { %4366 = vst.msk [vmem:[%s6533_s27 + $0x2c] sm:$0xf] %vm4354_vm1, %v4309_v36  ;;  %v4138_v56 = vadd.f32 %v4016_v48, %v3749_v2 }
 0x43f   : > { %v4198_v18 = vadd.f32 %v6518_v13, %v4138_v56  ;;  %4933 = vmatmul.msk.bf16.gmra.mxu1 %vm445_vm0, %v3864_v44 }
 0x440   : > { %v3240_v31 = vpop.f32.mrf.mxu3 }
 0x441   : > { %v4254_v4 = vmax.f32 %v4198_v18, 0.0  ;;  %v3361_v42 = vadd.f32 %v3240_v31, %v6429_v49  ;;  %v3865_v31 = vpack.c.bf16 %v3826_v37, %v3825_v51 }
 0x443   : > { %v4310_v9 = vpack.c.bf16 %v4254_v4, %v4254_v4  ;;  %v3750_v48 = vadd.f32 %v6450_v19, %v3361_v42  ;;  %4835 = vmatmul.msk.bf16.gmra.mxu2 %vm445_vm0, %v2707_v30  ;;  %4907 = vmatmul.msk.bf16.gmra.mxu0 %vm445_vm0, %v3485_v7  ;;  %v6680_v41 = vpop.f32.mrf.mxu0  ;;  %v2678_v4 = vld [vmem:[#allocation2 + $0x1a9] sm:$0xff]  ;;  %v3048_v30 = vld [vmem:[#allocation2 + $0x116] sm:$0xff] }
 0x444   : > { %v4023_v46 = vpop.f32.mrf.mxu1  ;;  %v3456_v42 = vld [vmem:[#allocation2 + $0x1af] sm:$0xff]  ;;  %v2708_v26 = vpack.c.bf16 %v2679_v16, %v2678_v4  ;;  %v3459_v4 = vld [vmem:[#allocation2 + $0x1c7] sm:$0xff] }
 0x445   : > { %4367 = vst.msk [vmem:[%s6533_s27 + $0x30] sm:$0xf] %vm4354_vm1, %v4310_v9  ;;  %v4139_v62 = vadd.f32 %v4018_v32, %v3750_v48  ;;  %4861 = vmatmul.msk.bf16.gmra.mxu3 %vm445_vm0, %v3086_v55  ;;  %v3457_v32 = vld [vmem:[#allocation2 + $0x1b7] sm:$0xff] }
 0x446   : > { %v3486_v9 = vpack.c.bf16 %v3457_v32, %v3456_v42  ;;  %v2681_v32 = vld [vmem:[#allocation2 + $0x1c1] sm:$0xff] }
 0x447   : > { %v4199_v49 = vadd.f32 %v6518_v13, %v4139_v62 }
 0x448   : > { %v3243_v36 = vpop.f32.mrf.mxu3 }
 0x449   : > { %v4255_v2 = vmax.f32 %v4199_v49, 0.0  ;;  %v3362_v19 = vadd.f32 %v3243_v36, %v6443_v6 }
 0x44b   : > { %v4311_v56 = vpack.c.bf16 %v4255_v2, %v4255_v2  ;;  %v3751_v44 = vadd.f32 %v6467_v25, %v3362_v19  ;;  %v6692_v19 = vpop.f32.mrf.mxu0 }
 0x44c   : > { %v4026_v45 = vpop.f32.mrf.mxu1 }
 0x44d   : > { %4368 = vst.msk [vmem:[%s6533_s27 + $0x34] sm:$0xf] %vm4354_vm1, %v4311_v56  ;;  %v4140_v18 = vadd.f32 %v4021_v20, %v3751_v44  ;;  %v3047_v20 = vld [vmem:[#allocation2 + $0x10e] sm:$0xff] }
 0x44e   : > { %v3087_v62 = vpack.c.bf16 %v3048_v30, %v3047_v20  ;;  %v3828_v56 = vld [vmem:[#allocation2 + $0x128] sm:$0xff] }
 0x44f   : > { %v4200_v28 = vadd.f32 %v6518_v13, %v4140_v18  ;;  %4934 = vmatmul.msk.bf16.gmra.mxu1 %vm445_vm0, %v3865_v31  ;;  %v3827_v31 = vld [vmem:[#allocation2 + $0x120] sm:$0xff] }
 0x450   : > { %v3245_v6 = vpop.f32.mrf.mxu3  ;;  %v3050_v30 = vld [vmem:[#allocation2 + $0x126] sm:$0xff] }
 0x451   : > { %v4256_v25 = vmax.f32 %v4200_v28, 0.0  ;;  %v3363_v7 = vadd.f32 %v3245_v6, %v6453_v23  ;;  %v2680_v28 = vld [vmem:[#allocation2 + $0x1b9] sm:$0xff] }
 0x452   : > { %v3458_v6 = vld [vmem:[#allocation2 + $0x1bf] sm:$0xff] }
 0x453   : > { %v4312_v48 = vpack.c.bf16 %v4256_v25, %v4256_v25  ;;  %v3752_v55 = vadd.f32 %v6478_v33, %v3363_v7  ;;  %4836 = vmatmul.msk.bf16.gmra.mxu2 %vm445_vm0, %v2708_v26  ;;  %4908 = vmatmul.msk.bf16.gmra.mxu0 %vm445_vm0, %v3486_v9  ;;  %v2709_v7 = vpack.c.bf16 %v2681_v32, %v2680_v28  ;;  %v3049_v9 = vld [vmem:[#allocation2 + $0x11e] sm:$0xff]  ;;  %v6701_v20 = vpop.f32.mrf.mxu0  ;;  %v3052_v32 = vld [vmem:[#allocation2 + $0x136] sm:$0xff] }
 0x454   : > { %v4028_v49 = vpop.f32.mrf.mxu1  ;;  %v3487_v26 = vpack.c.bf16 %v3459_v4, %v3458_v6  ;;  %v3051_v6 = vld [vmem:[#allocation2 + $0x12e] sm:$0xff] }
 0x455   : > { %4369 = vst.msk [vmem:[%s6533_s27 + $0x38] sm:$0xf] %vm4354_vm1, %v4312_v48  ;;  %v4141_v36 = vadd.f32 %v4023_v46, %v3752_v55  ;;  %4862 = vmatmul.msk.bf16.gmra.mxu3 %vm445_vm0, %v3087_v62  ;;  %v3866_v46 = vpack.c.bf16 %v3828_v56, %v3827_v31  ;;  %v3088_v55 = vpack.c.bf16 %v3050_v30, %v3049_v9 }
 0x457   : > { %v4201_v23 = vadd.f32 %v6518_v13, %v4141_v36 }
 0x458   : > { %v3248_v2 = vpop.f32.mrf.mxu3 }
 0x459   : > { %v4257_v37 = vmax.f32 %v4201_v23, 0.0  ;;  %v3364_v33 = vadd.f32 %v3248_v2, %v6465_v22 }
 0x45b   : > { %v4313_v44 = vpack.c.bf16 %v4257_v37, %v4257_v37  ;;  %v3753_v51 = vadd.f32 %v6492_v63, %v3364_v33  ;;  %v3830_v33 = vld [vmem:[#allocation2 + $0x138] sm:$0xff] }
 0x45c   : > { %v4031_v18 = vpop.f32.mrf.mxu1 }
 0x45d   : > { %4370 = vst.msk [vmem:[%s6533_s27 + $0x3c] sm:$0xf] %vm4354_vm1, %v4313_v44  ;;  %v4142_v16 = vadd.f32 %v4026_v45, %v3753_v51  ;;  %v3829_v51 = vld [vmem:[#allocation2 + $0x130] sm:$0xff] }
 0x45f   : > { %v4202_v42 = vadd.f32 %v6518_v13, %v4142_v16  ;;  %4935 = vmatmul.msk.bf16.gmra.mxu1 %vm445_vm0, %v3866_v46  ;;  %v3867_v16 = vpack.c.bf16 %v3830_v33, %v3829_v51 }
 0x460   : > { %v3250_v22 = vpop.f32.mrf.mxu3 }
 0x461   : > { %v4258_v25 = vmax.f32 %v4202_v42, 0.0  ;;  %v3365_v63 = vadd.f32 %v3250_v22, %v6475_v52  ;;  %v3089_v42 = vpack.c.bf16 %v3052_v32, %v3051_v6 }
 0x463   : > { %v4314_v45 = vpack.c.bf16 %v4258_v25, %v4258_v25  ;;  %v3754_v48 = vadd.f32 %v6508_v54, %v3365_v63  ;;  %4837 = vmatmul.msk.bf16.gmra.mxu2 %vm445_vm0, %v2709_v7  ;;  %4909 = vmatmul.msk.bf16.gmra.mxu0 %vm445_vm0, %v3487_v26  ;;  %v3832_v26 = vld [vmem:[#allocation2 + $0x148] sm:$0xff] }
 0x464   : > { %v4033_v62 = vpop.f32.mrf.mxu1 }
 0x465   : > { %4371 = vst.msk [vmem:[%s6533_s27 + $0x40] sm:$0xf] %vm4354_vm1, %v4314_v45  ;;  %v4143_v36 = vadd.f32 %v4028_v49, %v3754_v48  ;;  %4863 = vmatmul.msk.bf16.gmra.mxu3 %vm445_vm0, %v3088_v55 }
 0x467   : > { %v4203_v52 = vadd.f32 %v6518_v13, %v4143_v36 }
 0x468   : > { %v3253_v23 = vpop.f32.mrf.mxu3 }
 0x469   : > { %v4259_v2 = vmax.f32 %v4203_v52, 0.0  ;;  %v3366_v37 = vadd.f32 %v3253_v23, %v6489_v21  ;;  %v3054_v52 = vld [vmem:[#allocation2 + $0x146] sm:$0xff] }
 0x46b   : > { %v4315_v54 = vpack.c.bf16 %v4259_v2, %v4259_v2  ;;  %v3755_v56 = vadd.f32 %v6525_v53, %v3366_v37  ;;  %v3053_v2 = vld [vmem:[#allocation2 + $0x13e] sm:$0xff] }
 0x46c   : > { %v4036_v44 = vpop.f32.mrf.mxu1  ;;  %v3090_v33 = vpack.c.bf16 %v3054_v52, %v3053_v2  ;;  %v3057_v2 = vld [vmem:[#allocation2 + $0x15e] sm:$0xff] }
 0x46d   : > { %4372 = vst.msk [vmem:[%s6533_s27 + $0x44] sm:$0xf] %vm4354_vm1, %v4315_v54  ;;  %v4144_v31 = vadd.f32 %v4031_v18, %v3755_v56 }
 0x46f   : > { %v4204_v49 = vadd.f32 %v6518_v13, %v4144_v31  ;;  %4936 = vmatmul.msk.bf16.gmra.mxu1 %vm445_vm0, %v3867_v16 }
 0x470   : > { %v3255_v46 = vpop.f32.mrf.mxu3 }
 0x471   : > { %v4260_v28 = vmax.f32 %v4204_v49, 0.0  ;;  %v3367_v21 = vadd.f32 %v3255_v46, %v6499_v15  ;;  %v3834_v49 = vld [vmem:[#allocation2 + $0x158] sm:$0xff] }
 0x473   : > { %v4316_v4 = vpack.c.bf16 %v4260_v28, %v4260_v28  ;;  %v3756_v53 = vadd.f32 %v6546_v47, %v3367_v21  ;;  %v3831_v47 = vld [vmem:[#allocation2 + $0x140] sm:$0xff] }
 0x474   : > { %v4038_v22 = vpop.f32.mrf.mxu1  ;;  %v3868_v55 = vpack.c.bf16 %v3832_v26, %v3831_v47 }
 0x475   : > { %4373 = vst.msk [vmem:[%s6533_s27 + $0x48] sm:$0xf] %vm4354_vm1, %v4316_v4  ;;  %v4145_v18 = vadd.f32 %v4033_v62, %v3756_v53  ;;  %4864 = vmatmul.msk.bf16.gmra.mxu3 %vm445_vm0, %v3089_v42  ;;  %v3056_v53 = vld [vmem:[#allocation2 + $0x156] sm:$0xff] }
 0x477   : > { %v4205_v30 = vadd.f32 %v6518_v13, %v4145_v18 }
 0x478   : > { %v3258_v25 = vpop.f32.mrf.mxu3 }
 0x479   : > { %v4261_v63 = vmax.f32 %v4205_v30, 0.0  ;;  %v3368_v7 = vadd.f32 %v3258_v25, %v6511_v61 }
 0x47b   : > { %v4317_v15 = vpack.c.bf16 %v4261_v63, %v4261_v63  ;;  %v3757_v9 = vadd.f32 %v6560_v0, %v3368_v7 }
 0x47c   : > { %v4041_v45 = vpop.f32.mrf.mxu1 }
 0x47d   : > { %4374 = vst.msk [vmem:[%s6533_s27 + $0x4c] sm:$0xf] %vm4354_vm1, %v4317_v15  ;;  %v4146_v48 = vadd.f32 %v4036_v44, %v3757_v9 }
 0x47f   : > { %v4206_v62 = vadd.f32 %v6518_v13, %v4146_v48  ;;  %4937 = vmatmul.msk.bf16.gmra.mxu1 %vm445_vm0, %v3868_v55  ;;  %v3835_v55 = vld [vmem:[#allocation2 + $0x160] sm:$0xff] }
 0x480   : > { %v3260_v36 = vpop.f32.mrf.mxu3 }
 0x481   : > { %v4262_v23 = vmax.f32 %v4206_v62, 0.0  ;;  %v3369_v61 = vadd.f32 %v3260_v36, %v6522_v57 }
 0x483   : > { %v4318_v37 = vpack.c.bf16 %v4262_v23, %v4262_v23  ;;  %v3758_v0 = vadd.f32 %v6573_v39, %v3369_v61  ;;  %v3833_v39 = vld [vmem:[#allocation2 + $0x150] sm:$0xff]  ;;  %v3058_v23 = vld [vmem:[#allocation2 + $0x166] sm:$0xff] }
 0x484   : > { %v4043_v54 = vpop.f32.mrf.mxu1  ;;  %v3869_v21 = vpack.c.bf16 %v3834_v49, %v3833_v39 }
 0x485   : > { %4375 = vst.msk [vmem:[%s6533_s27 + $0x50] sm:$0xf] %vm4354_vm1, %v4318_v37  ;;  %v4147_v56 = vadd.f32 %v4038_v22, %v3758_v0  ;;  %4865 = vmatmul.msk.bf16.gmra.mxu3 %vm445_vm0, %v3090_v33  ;;  %v3055_v22 = vld [vmem:[#allocation2 + $0x14e] sm:$0xff]  ;;  %v3092_v0 = vpack.c.bf16 %v3058_v23, %v3057_v2 }
 0x486   : > { %v3091_v30 = vpack.c.bf16 %v3056_v53, %v3055_v22 }
 0x487   : > { %v4207_v44 = vadd.f32 %v6518_v13, %v4147_v56 }
 0x488   : > { %v3263_v51 = vpop.f32.mrf.mxu3 }
 0x489   : > { %v4263_v31 = vmax.f32 %v4207_v44, 0.0  ;;  %v3370_v16 = vadd.f32 %v3263_v51, %v6543_v58 }
 0x48b   : > { %v4319_v57 = vpack.c.bf16 %v4263_v31, %v4263_v31  ;;  %v3759_v46 = vadd.f32 %v6591_v43, %v3370_v16  ;;  %v3838_v16 = vld [vmem:[#allocation2 + $0x178] sm:$0xff] }
 0x48c   : > { %v4046_v32 = vpop.f32.mrf.mxu1 }
 0x48d   : > { %4376 = vst.msk [vmem:[%s6533_s27 + $0x54] sm:$0xf] %vm4354_vm1, %v4319_v57  ;;  %v4148_v28 = vadd.f32 %v4041_v45, %v3759_v46  ;;  %v3836_v45 = vld [vmem:[#allocation2 + $0x168] sm:$0xff]  ;;  %v6762_v57 = vpop.f32.mrf.mxu0 }
 0x48e   : > { %v3870_v62 = vpack.c.bf16 %v3836_v45, %v3835_v55 }
 0x48f   : > { %v4208_v6 = vadd.f32 %v6518_v13, %v4148_v28  ;;  %4938 = vmatmul.msk.bf16.gmra.mxu1 %vm445_vm0, %v3869_v21 }
 0x490   : > { %v3265_v4 = vpop.f32.mrf.mxu3 }
 0x491   : > { %v4264_v42 = vmax.f32 %v4208_v6, 0.0  ;;  %v3371_v58 = vadd.f32 %v3265_v4, %v6553_v1  ;;  %v3060_v4 = vld [vmem:[#allocation2 + $0x176] sm:$0xff] }
 0x493   : > { %v4320_v18 = vpack.c.bf16 %v4264_v42, %v4264_v42  ;;  %v3760_v43 = vadd.f32 %v6603_v11, %v3371_v58  ;;  %v3059_v42 = vld [vmem:[#allocation2 + $0x16e] sm:$0xff] }
 0x494   : > { %v4048_v25 = vpop.f32.mrf.mxu1 }
 0x495   : > { %4377 = vst.msk [vmem:[%s6533_s27 + $0x58] sm:$0xf] %vm4354_vm1, %v4320_v18  ;;  %v4149_v63 = vadd.f32 %v4043_v54, %v3760_v43  ;;  %4866 = vmatmul.msk.bf16.gmra.mxu3 %vm445_vm0, %v3091_v30  ;;  %v6754_v54 = vpop.f32.mrf.mxu2  ;;  %v3093_v18 = vpack.c.bf16 %v3060_v4, %v3059_v42 }
 0x497   : > { %v4209_v7 = vadd.f32 %v6518_v13, %v4149_v63 }
 0x498   : > { %v3268_v26 = vpop.f32.mrf.mxu3 }
 0x499   : > { %v4265_v15 = vmax.f32 %v4209_v7, 0.0  ;;  %v3372_v9 = vadd.f32 %v3268_v26, %v6567_v10 }
 0x49b   : > { %v4321_v1 = vpack.c.bf16 %v4265_v15, %v4265_v15  ;;  %v3761_v47 = vadd.f32 %v6617_v17, %v3372_v9  ;;  %v3840_v9 = vld [vmem:[#allocation2 + $0x188] sm:$0xff] }
 0x49c   : > { %v4051_v48 = vpop.f32.mrf.mxu1 }
 0x49d   : > { %4378 = vst.msk [vmem:[%s6533_s27 + $0x5c] sm:$0xf] %vm4354_vm1, %v4321_v1  ;;  %v4150_v11 = vadd.f32 %v4046_v32, %v3761_v47  ;;  %v3837_v32 = vld [vmem:[#allocation2 + $0x170] sm:$0xff]  ;;  %v6766_v21 = vpop.f32.mrf.mxu2  ;;  %v3839_v47 = vld [vmem:[#allocation2 + $0x180] sm:$0xff] }
 0x49e   : > { %v3871_v28 = vpack.c.bf16 %v3838_v16, %v3837_v32  ;;  %v3872_v55 = vpack.c.bf16 %v3840_v9, %v3839_v47 }
 0x49f   : > { %v4210_v36 = vadd.f32 %v6518_v13, %v4150_v11  ;;  %4939 = vmatmul.msk.bf16.gmra.mxu1 %vm445_vm0, %v3870_v62 }
 0x4a0   : > { %v3270_v52 = vpop.f32.mrf.mxu3 }
 0x4a1   : > { %v4266_v61 = vmax.f32 %v4210_v36, 0.0  ;;  %v3373_v10 = vadd.f32 %v3270_v52, %v6577_v40  ;;  %v3062_v52 = vld [vmem:[#allocation2 + $0x186] sm:$0xff] }
 0x4a3   : > { %v4322_v37 = vpack.c.bf16 %v4266_v61, %v4266_v61  ;;  %v3762_v17 = vadd.f32 %v6633_v50, %v3373_v10  ;;  %v3061_v61 = vld [vmem:[#allocation2 + $0x17e] sm:$0xff] }
 0x4a4   : > { %v4053_v33 = vpop.f32.mrf.mxu1 }
 0x4a5   : > { %4379 = vst.msk [vmem:[%s6533_s27 + $0x60] sm:$0xf] %vm4354_vm1, %v4322_v37  ;;  %v4151_v56 = vadd.f32 %v4048_v25, %v3762_v17  ;;  %4867 = vmatmul.msk.bf16.gmra.mxu3 %vm445_vm0, %v3092_v0  ;;  %v6775_v25 = vpop.f32.mrf.mxu0  ;;  %v6778_v26 = vpop.f32.mrf.mxu2  ;;  %v3094_v37 = vpack.c.bf16 %v3062_v52, %v3061_v61  ;;  %v3066_v52 = vld [vmem:[#allocation2 + $0x1a6] sm:$0xff]  ;;  %v3065_v61 = vld [vmem:[#allocation2 + $0x19e] sm:$0xff] }
 0x4a7   : > { %v4211_v44 = vadd.f32 %v6518_v13, %v4151_v56 }
 0x4a8   : > { %v3273_v51 = vpop.f32.mrf.mxu3 }
 0x4a9   : > { %v4267_v31 = vmax.f32 %v4211_v44, 0.0  ;;  %v3374_v40 = vadd.f32 %v3273_v51, %v6589_v59 }
 0x4ab   : > { %v4323_v49 = vpack.c.bf16 %v4267_v31, %v4267_v31  ;;  %v3763_v50 = vadd.f32 %v6648_v14, %v3374_v40  ;;  %v3842_v31 = vld [vmem:[#allocation2 + $0x198] sm:$0xff] }
 0x4ac   : > { %v4056_v46 = vpop.f32.mrf.mxu1 }
 0x4ad   : > { %4380 = vst.msk [vmem:[%s6533_s27 + $0x64] sm:$0xf] %vm4354_vm1, %v4323_v49  ;;  %v4152_v39 = vadd.f32 %v4051_v48, %v3763_v50  ;;  %v6786_v62 = vpop.f32.mrf.mxu0  ;;  %v3841_v49 = vld [vmem:[#allocation2 + $0x190] sm:$0xff] }
 0x4ae   : > { %v3873_v32 = vpack.c.bf16 %v3842_v31, %v3841_v49 }
 0x4af   : > { %v4212_v6 = vadd.f32 %v6518_v13, %v4152_v39  ;;  %4940 = vmatmul.msk.bf16.gmra.mxu1 %vm445_vm0, %v3871_v28 }
 0x4b0   : > { %v3275_v59 = vpop.f32.mrf.mxu3 }
 0x4b1   : > { %v4268_v53 = vmax.f32 %v4212_v6, 0.0  ;;  %v3375_v14 = vadd.f32 %v3275_v59, %v6599_v8  ;;  %v3063_v59 = vld [vmem:[#allocation2 + $0x18e] sm:$0xff] }
 0x4b3   : > { %v4324_v58 = vpack.c.bf16 %v4268_v53, %v4268_v53  ;;  %v3764_v22 = vadd.f32 %v6659_v5, %v3375_v14 }
 0x4b4   : > { %v4058_v43 = vpop.f32.mrf.mxu1 }
 0x4b5   : > { %4381 = vst.msk [vmem:[%s6533_s27 + $0x68] sm:$0xf] %vm4354_vm1, %v4324_v58  ;;  %v4153_v30 = vadd.f32 %v4053_v33, %v3764_v22  ;;  %4868 = vmatmul.msk.bf16.gmra.mxu3 %vm445_vm0, %v3093_v18  ;;  %v6797_v51 = vpop.f32.mrf.mxu0  ;;  %v7280_v18 = vld [vmem:[#allocation72_spill] sm:$0xff] }
 0x4b7   : > { %v4213_v63 = vadd.f32 %v6518_v13, %v4153_v30 }
 0x4b8   : > { %v3278_v7 = vpop.f32.mrf.mxu3 }
 0x4b9   : > { %v4269_v8 = vmax.f32 %v4213_v63, 0.0  ;;  %v3376_v15 = vadd.f32 %v3278_v7, %v6613_v29 }
 0x4bb   : > { %v4325_v5 = vpack.c.bf16 %v4269_v8, %v4269_v8  ;;  %v3765_v45 = vadd.f32 %v6670_v38, %v3376_v15  ;;  %v6789_v38 = vpop.f32.mrf.mxu2  ;;  %v3844_v8 = vld [vmem:[#allocation2 + $0x1a8] sm:$0xff] }
 0x4bc   : > { %v4061_v1 = vpop.f32.mrf.mxu1 }
 0x4bd   : > { %4382 = vst.msk [vmem:[%s6533_s27 + $0x6c] sm:$0xf] %vm4354_vm1, %v4325_v5  ;;  %v4154_v48 = vadd.f32 %v4056_v46, %v3765_v45  ;;  %v6813_v42 = vpop.f32.mrf.mxu0  ;;  %v3843_v45 = vld [vmem:[#allocation2 + $0x1a0] sm:$0xff] }
 0x4be   : > { %v3874_v47 = vpack.c.bf16 %v3844_v8, %v3843_v45 }
 0x4bf   : > { %v4214_v11 = vadd.f32 %v6518_v13, %v4154_v48  ;;  %4941 = vmatmul.msk.bf16.gmra.mxu1 %vm445_vm0, %v3872_v55 }
 0x4c0   : > { %v3280_v36 = vpop.f32.mrf.mxu3 }
 0x4c1   : > { %v4270_v29 = vmax.f32 %v4214_v11, 0.0  ;;  %v3377_v23 = vadd.f32 %v3280_v36, %v6623_v27 }
 0x4c3   : > { %v4326_v10 = vpack.c.bf16 %v4270_v29, %v4270_v29  ;;  %v3766_v2 = vadd.f32 %v6680_v41, %v3377_v23  ;;  %v6800_v50 = vpop.f32.mrf.mxu2 }
 0x4c4   : > { %v4063_v17 = vpop.f32.mrf.mxu1 }
 0x4c5   : > { %4383 = vst.msk [vmem:[%s6533_s27 + $0x70] sm:$0xf] %vm4354_vm1, %v4326_v10  ;;  %v4155_v0 = vadd.f32 %v4058_v43, %v3766_v2  ;;  %4869 = vmatmul.msk.bf16.gmra.mxu3 %vm445_vm0, %v3094_v37  ;;  %v2991_v43 = vadd.f32 %v6754_v54, %v7280_v18  ;;  %v6826_v48 = vpop.f32.mrf.mxu0  ;;  %v7281_v54 = vld [vmem:[#allocation45_spill] sm:$0xff]  ;;  %v3096_v37 = vpack.c.bf16 %v3066_v52, %v3065_v61 }
 0x4c6   : > { %v2992_v55 = vadd.f32 %v6766_v21, %v7281_v54  ;;  %v3069_v61 = vld [vmem:[#allocation2 + $0x1be] sm:$0xff] }
 0x4c7   : > { %v4215_v33 = vadd.f32 %v6518_v13, %v4155_v0  ;;  %v6807_v13 = vld [vmem:[%s6955_s4] ss:$0 sm:$0xff]  ;;  %v7282_v0 = vld [vmem:[#allocation75_spill] sm:$0xff] }
 0x4c8   : > { %v3283_v56 = vpop.f32.mrf.mxu3 }
 0x4c9   : > { %v4271_v44 = vmax.f32 %v4215_v33, 0.0  ;;  %v3378_v27 = vadd.f32 %v3283_v56, %v6637_v3  ;;  %v2993_v33 = vadd.f32 %v6778_v26, %v7282_v0 }
 0x4cb   : > { %v4327_v40 = vpack.c.bf16 %v4271_v44, %v4271_v44  ;;  %v3767_v41 = vadd.f32 %v6692_v19, %v3378_v27  ;;  %v3064_v19 = vld [vmem:[#allocation2 + $0x196] sm:$0xff]  ;;  %v6820_v30 = vpop.f32.mrf.mxu2 }
 0x4cc   : > { %v4066_v16 = vpop.f32.mrf.mxu1  ;;  %v3095_v14 = vpack.c.bf16 %v3064_v19, %v3063_v59  ;;  %v3068_v59 = vld [vmem:[#allocation2 + $0x1b6] sm:$0xff] }
 0x4cd   : > { %4384 = vst.msk [vmem:[%s6533_s27 + $0x74] sm:$0xf] %vm4354_vm1, %v4327_v40  ;;  %v4156_v46 = vadd.f32 %v4061_v1, %v3767_v41  ;;  %v6841_v44 = vpop.f32.mrf.mxu0  ;;  %v3846_v41 = vld [vmem:[#allocation2 + $0x1b8] sm:$0xff] }
 0x4cf   : > { %v4216_v3 = vadd.f32 %v6807_v13, %v4156_v46  ;;  %4942 = vmatmul.msk.bf16.gmra.mxu1 %vm445_vm0, %v3873_v32  ;;  %v3845_v32 = vld [vmem:[#allocation2 + $0x1b0] sm:$0xff] }
 0x4d0   : > { %v3285_v39 = vpop.f32.mrf.mxu3  ;;  %v3875_v26 = vpack.c.bf16 %v3846_v41, %v3845_v32 }
 0x4d1   : > { %v4272_v28 = vmax.f32 %v4216_v3, 0.0  ;;  %v3379_v6 = vadd.f32 %v3285_v39, %v6645_v12  ;;  %v7283_v39 = vld [vmem:[#allocation48_spill] sm:$0xff] }
 0x4d2   : > { %v2994_v19 = vadd.f32 %v6789_v38, %v7283_v39 }
 0x4d3   : > { %v4328_v4 = vpack.c.bf16 %v4272_v28, %v4272_v28  ;;  %v3768_v53 = vadd.f32 %v6701_v20, %v3379_v6  ;;  %v6832_v29 = vpop.f32.mrf.mxu2 }
 0x4d4   : > { %v4068_v58 = vpop.f32.mrf.mxu1 }
 0x4d5   : > { %4385 = vst.msk [vmem:[%s6533_s27 + $0x78] sm:$0xf] %vm4354_vm1, %v4328_v4  ;;  %v4157_v22 = vadd.f32 %v4063_v17, %v3768_v53  ;;  %4870 = vmatmul.msk.bf16.gmra.mxu3 %vm445_vm0, %v3095_v14  ;;  %v3694_v14 = vpop.f32.mrf.mxu0 }
 0x4d7   : > { %v4217_v12 = vadd.f32 %v6807_v13, %v4157_v22 }
 0x4d8   : > { %v3288_v63 = vpop.f32.mrf.mxu3 }
 0x4d9   : > { %v4273_v7 = vmax.f32 %v4217_v12, 0.0  ;;  %v3380_v20 = vadd.f32 %v3288_v63, %v2991_v43  ;;  %v7284_v63 = vld [vmem:[#allocation9_spill] sm:$0xff] }
 0x4db   : > { %v4329_v15 = vpack.c.bf16 %v4273_v7, %v4273_v7  ;;  %v3769_v9 = vadd.f32 %v6762_v57, %v3380_v20  ;;  %v2995_v7 = vadd.f32 %v6800_v50, %v7284_v63 }
 0x4dc   : > { %v4071_v5 = vpop.f32.mrf.mxu1 }
 0x4dd   : > { %4386 = vst.msk [vmem:[%s6533_s27 + $0x7c] sm:$0xf] %vm4354_vm1, %v4329_v15  ;;  %v4158_v1 = vadd.f32 %v4066_v16, %v3769_v9  ;;  %v3847_v15 = vld [vmem:[#allocation2 + $0x1c0] sm:$0xff]  ;;  %v3848_v9 = vld [vmem:[#allocation2 + $0x1c8] sm:$0xff]  ;;  %v3697_v54 = vpop.f32.mrf.mxu0 }
 0x4df   : > { %v4218_v11 = vadd.f32 %v6807_v13, %v4158_v1  ;;  %4943 = vmatmul.msk.bf16.gmra.mxu1 %vm445_vm0, %v3874_v47  ;;  %v3876_v47 = vpack.c.bf16 %v3848_v9, %v3847_v15 }
 0x4e0   : > { %v3290_v36 = vpop.f32.mrf.mxu3 }
 0x4e1   : > { %v4274_v57 = vmax.f32 %v4218_v11, 0.0  ;;  %v3381_v23 = vadd.f32 %v3290_v36, %v2992_v55  ;;  %v7285_v36 = vld [vmem:[#allocation10_spill] sm:$0xff] }
 0x4e2   : > { %v2996_v50 = vadd.f32 %v6820_v30, %v7285_v36 }
 0x4e3   : > { %v4330_v10 = vpack.c.bf16 %v4274_v57, %v4274_v57  ;;  %v3770_v2 = vadd.f32 %v6775_v25, %v3381_v23  ;;  %v6843_v25 = vpop.f32.mrf.mxu2 }
 0x4e4   : > { %v4073_v17 = vpop.f32.mrf.mxu1 }
 0x4e5   : > { %4387 = vst.msk [vmem:[%s6533_s27 + $0x80] sm:$0xf] %vm4354_vm1, %v4330_v10  ;;  %v4159_v21 = vadd.f32 %v4068_v58, %v3770_v2  ;;  %4871 = vmatmul.msk.bf16.gmra.mxu3 %vm445_vm0, %v3096_v37  ;;  %v3070_v10 = vld [vmem:[#allocation2 + $0x1c6] sm:$0xff]  ;;  %v3699_v30 = vpop.f32.mrf.mxu0 }
 0x4e7   : > { %v4219_v56 = vadd.f32 %v6807_v13, %v4159_v21  ;;  %v3098_v21 = vpack.c.bf16 %v3070_v10, %v3069_v61 }
 0x4e8   : > { %v3293_v27 = vpop.f32.mrf.mxu3 }
 0x4e9   : > { %v4275_v31 = vmax.f32 %v4219_v56, 0.0  ;;  %v3382_v40 = vadd.f32 %v3293_v27, %v2993_v33  ;;  %v7286_v56 = vld [vmem:[#allocation30_spill] sm:$0xff] }
 0x4ea   : > { %v2997_v27 = vadd.f32 %v6832_v29, %v7286_v56 }
 0x4eb   : > { %v4331_v16 = vpack.c.bf16 %v4275_v31, %v4275_v31  ;;  %v3771_v49 = vadd.f32 %v6786_v62, %v3382_v40  ;;  %v3067_v62 = vld [vmem:[#allocation2 + $0x1ae] sm:$0xff]  ;;  %v2919_v12 = vpop.f32.mrf.mxu2 }
 0x4ec   : > { %v4076_v46 = vpop.f32.mrf.mxu1  ;;  %v3097_v18 = vpack.c.bf16 %v3068_v59, %v3067_v62 }
 0x4ed   : > { %4388 = vst.msk [vmem:[%s6533_s27 + $0x84] sm:$0xf] %vm4354_vm1, %v4331_v16  ;;  %v4160_v3 = vadd.f32 %v4071_v5, %v3771_v49  ;;  %v3702_v29 = vpop.f32.mrf.mxu0 }
 0x4ef   : > { %v4220_v28 = vadd.f32 %v6807_v13, %v4160_v3  ;;  %4944 = vmatmul.msk.bf16.gmra.mxu1 %vm445_vm0, %v3875_v26  ;;  %v7287_v26 = vld [vmem:[#allocation78_spill] sm:$0xff] }
 0x4f0   : > { %v3295_v6 = vpop.f32.mrf.mxu3  ;;  %v2998_v39 = vadd.f32 %v6843_v25, %v7287_v26 }
 0x4f1   : > { %v4276_v4 = vmax.f32 %v4220_v28, 0.0  ;;  %v3383_v53 = vadd.f32 %v3295_v6, %v2994_v19 }
 0x4f3   : > { %v4332_v58 = vpack.c.bf16 %v4276_v4, %v4276_v4  ;;  %v3772_v22 = vadd.f32 %v6797_v51, %v3383_v53  ;;  %v2921_v52 = vpop.f32.mrf.mxu2 }
 0x4f4   : > { %v4078_v43 = vpop.f32.mrf.mxu1 }
 0x4f5   : > { %4389 = vst.msk [vmem:[%s6533_s27 + $0x88] sm:$0xf] %vm4354_vm1, %v4332_v58  ;;  %v4161_v38 = vadd.f32 %v4073_v17, %v3772_v22  ;;  %4872 = vmatmul.msk.bf16.gmra.mxu3 %vm445_vm0, %v3097_v18  ;;  %v7288_v22 = vld [vmem:[#allocation51_spill] sm:$0xff] }
 0x4f6   : > { %v2999_v18 = vadd.f32 %v2919_v12, %v7288_v22 }
 0x4f7   : > { %v4221_v20 = vadd.f32 %v6807_v13, %v4161_v38 }
 0x4f8   : > { %v3298_v8 = vpop.f32.mrf.mxu3 }
 0x4f9   : > { %v4277_v5 = vmax.f32 %v4221_v20, 0.0  ;;  %v3384_v45 = vadd.f32 %v3298_v8, %v2995_v7  ;;  %v3704_v7 = vpop.f32.mrf.mxu0 }
 0x4fb   : > { %v4333_v51 = vpack.c.bf16 %v4277_v5, %v4277_v5  ;;  %v3773_v1 = vadd.f32 %v6813_v42, %v3384_v45  ;;  %v2924_v41 = vpop.f32.mrf.mxu2  ;;  %v7289_v5 = vld [vmem:[#allocation81_spill] sm:$0xff] }
 0x4fc   : > { %v4081_v55 = vpop.f32.mrf.mxu1  ;;  %v3000_v45 = vadd.f32 %v2921_v52, %v7289_v5 }
 0x4fd   : > { %4390 = vst.msk [vmem:[%s6533_s27 + $0x8c] sm:$0xf] %vm4354_vm1, %v4333_v51  ;;  %v4162_v11 = vadd.f32 %v4076_v46, %v3773_v1 }
 0x4ff   : > { %v4222_v57 = vadd.f32 %v6807_v13, %v4162_v11  ;;  %4945 = vmatmul.msk.bf16.gmra.mxu1 %vm445_vm0, %v3876_v47 }
 0x500   : > { %v3300_v23 = vpop.f32.mrf.mxu3 }
 0x501   : > { %v4278_v2 = vmax.f32 %v4222_v57, 0.0  ;;  %v3385_v42 = vadd.f32 %v3300_v23, %v2996_v50  ;;  %v3707_v36 = vpop.f32.mrf.mxu0  ;;  %v7290_v57 = vld [vmem:[#allocation55_spill] sm:$0xff] }
 0x502   : > { %v3001_v23 = vadd.f32 %v2924_v41, %v7290_v57 }
 0x503   : > { %v4334_v37 = vpack.c.bf16 %v4278_v2, %v4278_v2  ;;  %v3774_v17 = vadd.f32 %v6826_v48, %v3385_v42  ;;  %v2926_v4 = vpop.f32.mrf.mxu2 }
 0x504   : > { %v4083_v0 = vpop.f32.mrf.mxu1 }
 0x505   : > { %4391 = vst.msk [vmem:[%s6533_s27 + $0x90] sm:$0xf] %vm4354_vm1, %v4334_v37  ;;  %v4163_v33 = vadd.f32 %v4078_v43, %v3774_v17  ;;  %4873 = vmatmul.msk.bf16.gmra.mxu3 %vm445_vm0, %v3098_v21 }
 0x507   : > { %v4223_v31 = vadd.f32 %v6807_v13, %v4163_v33 }
 0x508   : > { %v3303_v40 = vpop.f32.mrf.mxu3 }
 0x509   : > { %v4279_v16 = vmax.f32 %v4223_v31, 0.0  ;;  %v3386_v49 = vadd.f32 %v3303_v40, %v2997_v27  ;;  %v3709_v33 = vpop.f32.mrf.mxu0 }
 0x50b   : > { %v4335_v48 = vpack.c.bf16 %v4279_v16, %v4279_v16  ;;  %v3775_v46 = vadd.f32 %v6841_v44, %v3386_v49  ;;  %v2929_v9 = vpop.f32.mrf.mxu2 }
 0x50c   : > { %v4086_v32 = vpop.f32.mrf.mxu1 }
 0x50d   : > { %4392 = vst.msk [vmem:[%s6533_s27 + $0x94] sm:$0xf] %vm4354_vm1, %v4335_v48  ;;  %v4164_v3 = vadd.f32 %v4081_v55, %v3775_v46 }
 0x50f   : > { %v4224_v19 = vadd.f32 %v6807_v13, %v4164_v3  ;;  %v3003_v3 = vadd.f32 %v2929_v9, %v6378_v35 }
 0x510   : > { %v3305_v28 = vpop.f32.mrf.mxu3 }
 0x511   : > { %v4280_v6 = vmax.f32 %v4224_v19, 0.0  ;;  %v3387_v59 = vadd.f32 %v3305_v28, %v2998_v39  ;;  %v3712_v39 = vpop.f32.mrf.mxu0 }
 0x513   : > { %v4336_v53 = vpack.c.bf16 %v4280_v6, %v4280_v6  ;;  %v3776_v62 = vadd.f32 %v3694_v14, %v3387_v59  ;;  %v2931_v61 = vpop.f32.mrf.mxu2 }
 0x514   : > { %v4088_v58 = vpop.f32.mrf.mxu1 }
 0x515   : > { %4393 = vst.msk [vmem:[%s6533_s27 + $0x98] sm:$0xf] %vm4354_vm1, %v4336_v53  ;;  %v4165_v44 = vadd.f32 %v4083_v0, %v3776_v62 }
 0x517   : > { %v4225_v43 = vadd.f32 %v6807_v13, %v4165_v44 }
 0x518   : > { %v3308_v38 = vpop.f32.mrf.mxu3 }
 0x519   : > { %v4281_v25 = vmax.f32 %v4225_v43, 0.0  ;;  %v3388_v63 = vadd.f32 %v3308_v38, %v2999_v18  ;;  %v3714_v38 = vpop.f32.mrf.mxu0 }
 0x51b   : > { %v4337_v20 = vpack.c.bf16 %v4281_v25, %v4281_v25  ;;  %v3777_v8 = vadd.f32 %v3697_v54, %v3388_v63  ;;  %v2934_v40 = vpop.f32.mrf.mxu2 }
 0x51c   : > { %v4091_v15 = vpop.f32.mrf.mxu1 }
 0x51d   : > { %4394 = vst.msk [vmem:[%s6533_s27 + $0x9c] sm:$0xf] %vm4354_vm1, %v4337_v20  ;;  %v4166_v14 = vadd.f32 %v4086_v32, %v3777_v8 }
 0x51f   : > { %v4226_v51 = vadd.f32 %v6807_v13, %v4166_v14 }
 0x520   : > { %v3310_v1 = vpop.f32.mrf.mxu3 }
 0x521   : > { %v4282_v12 = vmax.f32 %v4226_v51, 0.0  ;;  %v3389_v47 = vadd.f32 %v3310_v1, %v3000_v45 }
 0x523   : > { %v4338_v55 = vpack.c.bf16 %v4282_v12, %v4282_v12  ;;  %v3778_v11 = vadd.f32 %v3699_v30, %v3389_v47  ;;  %v7291_v30 = vld [vmem:[#allocation11_spill] sm:$0xff]  ;;  %v2936_v6 = vpop.f32.mrf.mxu2  ;;  %v3717_v47 = vpop.f32.mrf.mxu0 }
 0x524   : > { %v4093_v50 = vpop.f32.mrf.mxu1  ;;  %v3002_v56 = vadd.f32 %v2926_v4, %v7291_v30 }
 0x525   : > { %4395 = vst.msk [vmem:[%s6533_s27 + $0xa0] sm:$0xf] %vm4354_vm1, %v4338_v55  ;;  %v4167_v54 = vadd.f32 %v4088_v58, %v3778_v11  ;;  %v7292_v58 = vld [vmem:[#allocation84_spill] sm:$0xff]  ;;  %v7294_v11 = vld [vmem:[#allocation86_spill] sm:$0xff] }
 0x526   : > { %v3004_v44 = vadd.f32 %v2931_v61, %v7292_v58 }
 0x527   : > { %v4227_v10 = vadd.f32 %v6807_v13, %v4167_v54 }
 0x528   : > { %v3313_v2 = vpop.f32.mrf.mxu3 }
 0x529   : > { %v4283_v52 = vmax.f32 %v4227_v10, 0.0  ;;  %v3390_v42 = vadd.f32 %v3313_v2, %v3001_v23 }
 0x52b   : > { %v4339_v37 = vpack.c.bf16 %v4283_v52, %v4283_v52  ;;  %v3779_v17 = vadd.f32 %v3702_v29, %v3390_v42 }
 0x52c   : > { %v4096_v21 = vpop.f32.mrf.mxu1 }
 0x52d   : > { %4396 = vst.msk [vmem:[%s6533_s27 + $0xa4] sm:$0xf] %vm4354_vm1, %v4339_v37  ;;  %v4168_v0 = vadd.f32 %v4091_v15, %v3779_v17  ;;  %v7293_v15 = vld [vmem:[#allocation59_spill] sm:$0xff]  ;;  %v3719_v37 = vpop.f32.mrf.mxu0 }
 0x52e   : > { %v3005_v9 = vadd.f32 %v2934_v40, %v7293_v15 }
 0x52f   : > { %v4228_v27 = vadd.f32 %v6807_v13, %v4168_v0 }
 0x530   : > { %v3315_v31 = vpop.f32.mrf.mxu3 }
 0x531   : > { %v4284_v41 = vmax.f32 %v4228_v27, 0.0  ;;  %v3391_v16 = vadd.f32 %v3315_v31, %v3002_v56 }
 0x533   : > { %v4340_v49 = vpack.c.bf16 %v4284_v41, %v4284_v41  ;;  %v3780_v48 = vadd.f32 %v3704_v7, %v3391_v16  ;;  %v2939_v7 = vpop.f32.mrf.mxu2  ;;  %v7295_v16 = vld [vmem:[#allocation63_spill] sm:$0xff] }
 0x534   : > { %v4098_v46 = vpop.f32.mrf.mxu1  ;;  %v3007_v17 = vadd.f32 %v2939_v7, %v6424_v24 }
 0x535   : > { %4397 = vst.msk [vmem:[%s6533_s27 + $0xa8] sm:$0xf] %vm4354_vm1, %v4340_v49  ;;  %v4169_v32 = vadd.f32 %v4093_v50, %v3780_v48 }
 0x537   : > { %v4229_v26 = vadd.f32 %v6807_v13, %v4169_v32 }
 0x538   : > { %v3318_v19 = vpop.f32.mrf.mxu3 }
 0x539   : > { %v4285_v29 = vmax.f32 %v4229_v26, 0.0  ;;  %v3392_v28 = vadd.f32 %v3318_v19, %v3003_v3 }
 0x53b   : > { %v4341_v59 = vpack.c.bf16 %v4285_v29, %v4285_v29  ;;  %v3781_v4 = vadd.f32 %v3707_v36, %v3392_v28  ;;  %v3006_v36 = vadd.f32 %v2936_v6, %v7294_v11  ;;  %v2941_v50 = vpop.f32.mrf.mxu2  ;;  %v7296_v6 = vld [vmem:[#allocation12_spill] sm:$0xff] }
 0x53c   : > { %v4101_v53 = vpop.f32.mrf.mxu1  ;;  %v3008_v49 = vadd.f32 %v2941_v50, %v7295_v16 }
 0x53d   : > { %4398 = vst.msk [vmem:[%s6533_s27 + $0xac] sm:$0xf] %vm4354_vm1, %v4341_v59  ;;  %v4170_v62 = vadd.f32 %v4096_v21, %v3781_v4 }
 0x53f   : > { %v4230_v22 = vadd.f32 %v6807_v13, %v4170_v62 }
 0x540   : > { %v3320_v18 = vpop.f32.mrf.mxu3 }
 0x541   : > { %v4286_v35 = vmax.f32 %v4230_v22, 0.0  ;;  %v3393_v43 = vadd.f32 %v3320_v18, %v3004_v44 }
 0x543   : > { %v4342_v25 = vpack.c.bf16 %v4286_v35, %v4286_v35  ;;  %v3782_v63 = vadd.f32 %v3709_v33, %v3393_v43  ;;  %v2944_v33 = vpop.f32.mrf.mxu2 }
 0x544   : > { %v4103_v8 = vpop.f32.mrf.mxu1  ;;  %v3009_v59 = vadd.f32 %v2944_v33, %v7296_v6 }
 0x545   : > { %4399 = vst.msk [vmem:[%s6533_s27 + $0xb0] sm:$0xf] %vm4354_vm1, %v4342_v25  ;;  %v4171_v20 = vadd.f32 %v4098_v46, %v3782_v63  ;;  %v3722_v46 = vpop.f32.mrf.mxu0  ;;  %v7297_v25 = vld [vmem:[#allocation66_spill] sm:$0xff] }
 0x547   : > { %v4231_v14 = vadd.f32 %v6807_v13, %v4171_v20 }
 0x548   : > { %v3323_v5 = vpop.f32.mrf.mxu3 }
 0x549   : > { %v4287_v45 = vmax.f32 %v4231_v14, 0.0  ;;  %v3394_v51 = vadd.f32 %v3323_v5, %v3005_v9 }
 0x54b   : > { %v4343_v1 = vpack.c.bf16 %v4287_v45, %v4287_v45  ;;  %v3783_v12 = vadd.f32 %v3712_v39, %v3394_v51  ;;  %v2946_v26 = vpop.f32.mrf.mxu2  ;;  %v7298_v51 = vld [vmem:[#allocation70_spill] sm:$0xff] }
 0x54c   : > { %v4106_v57 = vpop.f32.mrf.mxu1  ;;  %v3010_v63 = vadd.f32 %v2946_v26, %v7297_v25 }
 0x54d   : > { %4400 = vst.msk [vmem:[%s6533_s27 + $0xb4] sm:$0xf] %vm4354_vm1, %v4343_v1  ;;  %v4172_v55 = vadd.f32 %v4101_v53, %v3783_v12  ;;  %v3724_v44 = vpop.f32.mrf.mxu0 }
 0x54f   : > { %v4232_v54 = vadd.f32 %v6807_v13, %v4172_v55 }
 0x550   : > { %v3325_v23 = vpop.f32.mrf.mxu3 }
 0x551   : > { %v4288_v61 = vmax.f32 %v4232_v54, 0.0  ;;  %v3395_v10 = vadd.f32 %v3325_v23, %v3006_v36 }
 0x553   : > { %v4344_v2 = vpack.c.bf16 %v4288_v61, %v4288_v61  ;;  %v3784_v52 = vadd.f32 %v3714_v38, %v3395_v10  ;;  %v2949_v35 = vpop.f32.mrf.mxu2  ;;  %v7299_v10 = vld [vmem:[#allocation13_spill] sm:$0xff] }
 0x554   : > { %v4108_v27 = vpop.f32.mrf.mxu1  ;;  %v3011_v1 = vadd.f32 %v2949_v35, %v7298_v51 }
 0x555   : > { %4401 = vst.msk [vmem:[%s6533_s27 + $0xb8] sm:$0xf] %vm4354_vm1, %v4344_v2  ;;  %v4173_v42 = vadd.f32 %v4103_v8, %v3784_v52  ;;  %v3727_v5 = vpop.f32.mrf.mxu0 }
 0x557   : > { %v4233_v21 = vadd.f32 %v6807_v13, %v4173_v42 }
 0x558   : > { %v3328_v0 = vpop.f32.mrf.mxu3 }
 0x559   : > { %v4289_v30 = vmax.f32 %v4233_v21, 0.0  ;;  %v3396_v56 = vadd.f32 %v3328_v0, %v3007_v17 }
 0x55b   : > { %v4345_v31 = vpack.c.bf16 %v4289_v30, %v4289_v30  ;;  %v3785_v40 = vadd.f32 %v3717_v47, %v3396_v56  ;;  %v2951_v12 = vpop.f32.mrf.mxu2 }
 0x55c   : > { %v4111_v29 = vpop.f32.mrf.mxu1  ;;  %v3012_v2 = vadd.f32 %v2951_v12, %v7299_v10 }
 0x55d   : > { %4402 = vst.msk [vmem:[%s6533_s27 + $0xbc] sm:$0xf] %vm4354_vm1, %v4345_v31  ;;  %v4174_v41 = vadd.f32 %v4106_v57, %v3785_v40  ;;  %v3729_v61 = vpop.f32.mrf.mxu0 }
 0x55f   : > { %v4234_v48 = vadd.f32 %v6807_v13, %v4174_v41 }
 0x560   : > { %v3330_v32 = vpop.f32.mrf.mxu3 }
 0x561   : > { %v4290_v24 = vmax.f32 %v4234_v48, 0.0  ;;  %v3397_v3 = vadd.f32 %v3330_v32, %v3008_v49 }
 0x563   : > { %v4346_v39 = vpack.c.bf16 %v4290_v24, %v4290_v24  ;;  %v3786_v19 = vadd.f32 %v3719_v37, %v3397_v3  ;;  %v2954_v21 = vpop.f32.mrf.mxu2 }
 0x564   : > { %v4113_v38 = vpop.f32.mrf.mxu1 }
 0x565   : > { %4403 = vst.msk [vmem:[%s6533_s27 + $0xc0] sm:$0xf] %vm4354_vm1, %v4346_v39  ;;  %v4175_v28 = vadd.f32 %v4108_v27, %v3786_v19  ;;  %v3013_v27 = vadd.f32 %v2954_v21, %v6494_v60  ;;  %v3732_v40 = vpop.f32.mrf.mxu0 }
 0x567   : > { %v4235_v4 = vadd.f32 %v6807_v13, %v4175_v28 }
 0x568   : > { %v3333_v53 = vpop.f32.mrf.mxu3 }
 0x569   : > { %v4291_v62 = vmax.f32 %v4235_v4, 0.0  ;;  %v3398_v58 = vadd.f32 %v3333_v53, %v3009_v59 }
 0x56b   : > { %v4347_v22 = vpack.c.bf16 %v4291_v62, %v4291_v62  ;;  %v3787_v18 = vadd.f32 %v3722_v46, %v3398_v58  ;;  %v2956_v24 = vpop.f32.mrf.mxu2 }
 0x56c   : > { %v4116_v55 = vpop.f32.mrf.mxu1  ;;  %v3014_v26 = vadd.f32 %v2956_v24, %v6506_v34 }
 0x56d   : > { %4404 = vst.msk [vmem:[%s6533_s27 + $0xc4] sm:$0xf] %vm4354_vm1, %v4347_v22  ;;  %v4176_v43 = vadd.f32 %v4111_v29, %v3787_v18  ;;  %v3734_v28 = vpop.f32.mrf.mxu0 }
 0x56f   : > { %v4236_v7 = vadd.f32 %v6807_v13, %v4176_v43 }
 0x570   : > { %v3335_v20 = vpop.f32.mrf.mxu3 }
 0x571   : > { %v4292_v8 = vmax.f32 %v4236_v7, 0.0  ;;  %v3399_v15 = vadd.f32 %v3335_v20, %v3010_v63 }
 0x573   : > { %v4348_v9 = vpack.c.bf16 %v4292_v8, %v4292_v8  ;;  %v3788_v14 = vadd.f32 %v3724_v44, %v3399_v15 }
 0x574   : > { %v4118_v0 = vpop.f32.mrf.mxu1 }
 0x575   : > { %4405 = vst.msk [vmem:[%s6533_s27 + $0xc8] sm:$0xf] %vm4354_vm1, %v4348_v9  ;;  %v4177_v45 = vadd.f32 %v4113_v38, %v3788_v14 }
 0x577   : > { %v4237_v47 = vadd.f32 %v6807_v13, %v4177_v45 }
 0x578   : > { %v3338_v11 = vpop.f32.mrf.mxu3 }
 0x579   : > { %v4293_v36 = vmax.f32 %v4237_v47, 0.0  ;;  %v3400_v50 = vadd.f32 %v3338_v11, %v3011_v1 }
 0x57b   : > { %v4349_v54 = vpack.c.bf16 %v4293_v36, %v4293_v36  ;;  %v3789_v57 = vadd.f32 %v3727_v5, %v3400_v50 }
 0x57c   : > { %v4121_v48 = vpop.f32.mrf.mxu1 }
 0x57d   : > { %4406 = vst.msk [vmem:[%s6533_s27 + $0xcc] sm:$0xf] %vm4354_vm1, %v4349_v54  ;;  %v4178_v23 = vadd.f32 %v4116_v55, %v3789_v57 }
 0x57f   : > { %v4238_v52 = vadd.f32 %v6807_v13, %v4178_v23 }
 0x580   : > { %v3340_v42 = vpop.f32.mrf.mxu3 }
 0x581   : > { %v4294_v37 = vmax.f32 %v4238_v52, 0.0  ;;  %v3401_v17 = vadd.f32 %v3340_v42, %v3012_v2 }
 0x583   : > { %v4350_v33 = vpack.c.bf16 %v4294_v37, %v4294_v37  ;;  %v3790_v30 = vadd.f32 %v3729_v61, %v3401_v17 }
 0x584   : > { %v4123_v4 = vpop.f32.mrf.mxu1 }
 0x585   : > { %4407 = vst.msk [vmem:[%s6533_s27 + $0xd0] sm:$0xf] %vm4354_vm1, %v4350_v33  ;;  %v4179_v56 = vadd.f32 %v4118_v0, %v3790_v30 }
 0x587   : > { %v4239_v31 = vadd.f32 %v6807_v13, %v4179_v56 }
 0x588   : > { %v3343_v41 = vpop.f32.mrf.mxu3 }
 0x589   : > { %v4295_v16 = vmax.f32 %v4239_v31, 0.0  ;;  %v3402_v49 = vadd.f32 %v3343_v41, %v3013_v27 }
 0x58b   : > { %v4351_v46 = vpack.c.bf16 %v4295_v16, %v4295_v16  ;;  %v3791_v32 = vadd.f32 %v3732_v40, %v3402_v49 }
 0x58d   : > { %4408 = vst.msk [vmem:[%s6533_s27 + $0xd4] sm:$0xf] %vm4354_vm1, %v4351_v46  ;;  %v4180_v3 = vadd.f32 %v4121_v48, %v3791_v32 }
 0x58f   : > { %v4240_v39 = vadd.f32 %v6807_v13, %v4180_v3 }
 0x590   : > { %v3345_v60 = vpop.f32.mrf.mxu3 }
 0x591   : > { %v4296_v19 = vmax.f32 %v4240_v39, 0.0  ;;  %v3403_v29 = vadd.f32 %v3345_v60, %v3014_v26 }
 0x593   : > { %v4352_v6 = vpack.c.bf16 %v4296_v19, %v4296_v19  ;;  %v3792_v59 = vadd.f32 %v3734_v28, %v3403_v29 }
 0x595   : > { %4409 = vst.msk [vmem:[%s6533_s27 + $0xd8] sm:$0xf] %vm4354_vm1, %v4352_v6  ;;  %v4181_v53 = vadd.f32 %v4123_v4, %v3792_v59 }
 0x597   : > { %v4241_v62 = vadd.f32 %v6807_v13, %v4181_v53 }
 0x599   : > { %v4297_v58 = vmax.f32 %v4241_v62, 0.0 }
 0x59b   : > { %v4353_v44 = vpack.c.bf16 %v4297_v58, %v4297_v58 }
 0x59d   : > { %4410 = vst.msk [vmem:[%s6533_s27 + $0xdc] sm:$0xf] %vm4354_vm1, %v4353_v44 }
 0x59e PF: > { %s15_s18 = sadd.s32 1, %s5029_s18  }
 0x59f   : > { %p12_p4 = scmp.ge.s32.totalorder %s15_s18, 5  }
 0x5a1   :  { %14 = sbr.rel (!%p12_p4) target bundleno = 1 (0x1), region = 70 }

// kernel: pixel_delta_encoder_forward.3
= control target key start
LH: loop header
LB: loop body
LE: loop exit
PB: predicated region body
PF: predicated region fallthrough
CT: control target
= control target key end

     0   :  { %s2207_s18 = smov 0   ;;  %s2209_s19 = smov 0   ;;  %s2385_s0 = inlined_call_operand.vmem [shape: bf16[8,5376], index: 0, kind: input, shape index: {}]   ;;  %s2386_s1 = inlined_call_operand.vmem [shape: bf16[5376,32], index: 1, kind: input, shape index: {}]   ;;  %s2387_s2 = inlined_call_operand.vmem [shape: f32[1,32], index: 2, kind: input, shape index: {}]   ;;  %s2388_s3 = inlined_call_operand.vmem [shape: f32[1,32], index: 3, kind: input, shape index: {}]   ;;  %s2389_s4 = inlined_call_operand.vmem [shape: f32[1,32], index: 4, kind: input, shape index: {}]   ;;  %s2390_s5 = inlined_call_operand.vmem [shape: f32[8,32], index: 5, kind: output, shape index: {}]  }
   0x1   :  { %s2211_s20 = smov 0  }
   0x2 LB: > { %s24_s21 = sadd.s32 1, %s2169_s19  ;;  %p1548_p0 = scmp.ge.s32.totalorder %s2173_s20, 1  ;;  %s2173_s20 = sphi %s2211_s20, %s15_s20   ;;  %s2169_s19 = sphi %s2209_s19, %s2392_s19   ;;  %s2165_s18 = sphi %s2207_s18, %s2391_s18  }
   0x3   : > { %p25_p1 = scmp.ge.s32.totalorder %s24_s21, 3  ;;  %p217_p2 = scmp.lt.s32.totalorder %s2173_s20, 4 }
   0x5   : > { %s2394_s21 = smov (%p25_p1, %s24_s21), 0  ;;  %p218_p3 = pnand %p1548_p0, %p217_p2 }
   0x6   : > { %s253_s22 = smul.u32 (!%p218_p3), 14, %s2165_s18  ;;  %p1551_p6 = scmp.ne.s32.totalorder (!%p218_p3), %s2165_s18, 0 }
   0x7   : > { %221 = sbr.rel (%p218_p3) target bundleno = 568 (0x238), region = 40 }
   0x8   : > { %s263_s23 = smul.u32 (!%p218_p3), 224, %s2165_s18  ;;  %p256_p4 = scmp.lt.s32.totalorder (!%p218_p3), %s253_s22, 41 }
   0xa   : > { %p264_p5 = scmp.lt.s32.totalorder (!%p218_p3), %s263_s23, 671 }
   0xc   : > { %s2396_s22 = smov (!%p256_p4, %s253_s22), 41  ;;  %s2398_s23 = smov (!%p264_p5, %s263_s23), 671 }
   0xd   : > { %s1549_s24 = sshll.u32 %s2396_s22, 2  ;;  %s1550_s28 = sshll.u32 %s2398_s23, 2 }
   0xe   : > { %s2232_s27 = scalar_lea.vmem %s2385_s0, %s1549_s24  ;;  %s2237_s6 = scalar_lea.vmem %s2386_s1, %s1550_s28 }
   0xf   : > { %276 = sbr.rel (%p1551_p6) target bundleno = 22 (0x16), region = 44 }
  0x14   : > { %vm277_vm0 = vcmask 261120   ;;  %v2175_v0 = vmov 0.0  }
  0x15   : > { %278 = vst.msk [vmem:[#allocation2] sm:$0xff] %vm277_vm0, %v2175_v0 }
  0x16 PF: > { %v2011_v1 = vld [vmem:[%s2237_s6 + $0x38] sm:$0xff]  ;;  %v2010_v5 = vld [vmem:[%s2237_s6 + $0x30] sm:$0xff]  ;;  %v2009_v9 = vld [vmem:[%s2237_s6 + $0x28] sm:$0xff]  ;;  %vm1415_vm1 = vcmask 261120   ;;  %p2000_p7 = scmp.ne.s32.totalorder %s2165_s18, 2 }
  0x17   : > { %v2019_v2 = vld [vmem:[%s2237_s6 + $0x78] sm:$0xff]  ;;  %1232 = vmatpush.bf16.msra.mxu0 %v2011_v1  ;;  %v2018_v6 = vld [vmem:[%s2237_s6 + $0x70] sm:$0xff]  ;;  %v2017_v10 = vld [vmem:[%s2237_s6 + $0x68] sm:$0xff] }
  0x18   : > { %v2027_v3 = vld [vmem:[%s2237_s6 + $0xb8] sm:$0xff]  ;;  %1245 = vmatpush.bf16.msra.mxu1 %v2019_v2  ;;  %v2026_v7 = vld [vmem:[%s2237_s6 + $0xb0] sm:$0xff]  ;;  %v2025_v11 = vld [vmem:[%s2237_s6 + $0xa8] sm:$0xff] }
  0x19   : > { %v2035_v4 = vld [vmem:[%s2237_s6 + $0xf8] sm:$0xff]  ;;  %1258 = vmatpush.bf16.msra.mxu2 %v2027_v3  ;;  %v2034_v8 = vld [vmem:[%s2237_s6 + $0xf0] sm:$0xff]  ;;  %v2033_v12 = vld [vmem:[%s2237_s6 + $0xe8] sm:$0xff] }
  0x1a   : > { %1271 = vmatpush.bf16.msra.mxu3 %v2035_v4  ;;  %v2008_v13 = vld [vmem:[%s2237_s6 + $0x20] sm:$0xff]  ;;  %v2007_v17 = vld [vmem:[%s2237_s6 + $0x18] sm:$0xff]  ;;  %v2006_v21 = vld [vmem:[%s2237_s6 + $0x10] sm:$0xff] }
  0x1b   : > { %1233 = vmatpush.bf16.msra.mxu0 %v2010_v5  ;;  %v2016_v14 = vld [vmem:[%s2237_s6 + $0x60] sm:$0xff]  ;;  %v2015_v18 = vld [vmem:[%s2237_s6 + $0x58] sm:$0xff]  ;;  %v2014_v22 = vld [vmem:[%s2237_s6 + $0x50] sm:$0xff] }
  0x1c   : > { %1246 = vmatpush.bf16.msra.mxu1 %v2018_v6  ;;  %v2024_v15 = vld [vmem:[%s2237_s6 + $0xa0] sm:$0xff]  ;;  %v2023_v19 = vld [vmem:[%s2237_s6 + $0x98] sm:$0xff]  ;;  %v2022_v23 = vld [vmem:[%s2237_s6 + $0x90] sm:$0xff] }
  0x1d   : > { %1259 = vmatpush.bf16.msra.mxu2 %v2026_v7  ;;  %v2032_v16 = vld [vmem:[%s2237_s6 + $0xe0] sm:$0xff]  ;;  %v2031_v20 = vld [vmem:[%s2237_s6 + $0xd8] sm:$0xff]  ;;  %v2030_v24 = vld [vmem:[%s2237_s6 + $0xd0] sm:$0xff] }
  0x1e   : > { %1272 = vmatpush.bf16.msra.mxu3 %v2034_v8  ;;  %v2005_v25 = vld [vmem:[%s2237_s6 + $0x8] sm:$0xff]  ;;  %v280_v27 = vld [vmem:[%s2232_s27] sm:$0xff]  ;;  %v2043_v36 = vld [vmem:[%s2237_s6 + $0x138] sm:$0xff] }
  0x1f   : > { %1234 = vmatpush.bf16.msra.mxu0 %v2009_v9  ;;  %v2013_v26 = vld [vmem:[%s2237_s6 + $0x48] sm:$0xff]  ;;  %v518_v31 = vunpack.c.l.b16 %v280_v27  ;;  %v2004_v32 = vld [vmem:[%s2237_s6] sm:$0xff]  ;;  %v519_v37 = vunpack.c.h.b16 %v280_v27  ;;  %v2051_v38 = vld [vmem:[%s2237_s6 + $0x178] sm:$0xff] }
  0x20   : > { %1247 = vmatpush.bf16.msra.mxu1 %v2017_v10  ;;  %v2021_v28 = vld [vmem:[%s2237_s6 + $0x88] sm:$0xff]  ;;  %v2012_v33 = vld [vmem:[%s2237_s6 + $0x40] sm:$0xff]  ;;  %v2059_v39 = vld [vmem:[%s2237_s6 + $0x1b8] sm:$0xff] }
  0x21   : > { %1260 = vmatpush.bf16.msra.mxu2 %v2025_v11  ;;  %v2029_v29 = vld [vmem:[%s2237_s6 + $0xc8] sm:$0xff]  ;;  %v2020_v35 = vld [vmem:[%s2237_s6 + $0x80] sm:$0xff]  ;;  %v532_v41 = vpack.c.b16 %v518_v31, %v518_v31  ;;  %v2067_v43 = vld [vmem:[%s2237_s6 + $0x1f8] sm:$0xff]  ;;  %v533_v46 = vpack.c.b16 %v519_v37, %v519_v37 }
  0x22   : > { %1273 = vmatpush.bf16.msra.mxu3 %v2033_v12  ;;  %v281_v30 = vld [vmem:[%s2232_s27 + $0x8] sm:$0xff]  ;;  %v2028_v40 = vld [vmem:[%s2237_s6 + $0xc0] sm:$0xff]  ;;  %v2042_v45 = vld [vmem:[%s2237_s6 + $0x130] sm:$0xff] }
  0x23   : > { %1235 = vmatpush.bf16.msra.mxu0 %v2008_v13  ;;  %v520_v34 = vunpack.c.l.b16 %v281_v30  ;;  %v521_v42 = vunpack.c.h.b16 %v281_v30  ;;  %v2050_v47 = vld [vmem:[%s2237_s6 + $0x170] sm:$0xff]  ;;  %v2041_v51 = vld [vmem:[%s2237_s6 + $0x128] sm:$0xff]  ;;  %v2040_v55 = vld [vmem:[%s2237_s6 + $0x120] sm:$0xff] }
  0x24   : > { %1248 = vmatpush.bf16.msra.mxu1 %v2016_v14  ;;  %v2058_v48 = vld [vmem:[%s2237_s6 + $0x1b0] sm:$0xff]  ;;  %v2049_v52 = vld [vmem:[%s2237_s6 + $0x168] sm:$0xff]  ;;  %v2048_v56 = vld [vmem:[%s2237_s6 + $0x160] sm:$0xff] }
  0x25   : > { %1261 = vmatpush.bf16.msra.mxu2 %v2024_v15  ;;  %v534_v44 = vpack.c.b16 %v520_v34, %v520_v34  ;;  %v535_v49 = vpack.c.b16 %v521_v42, %v521_v42  ;;  %v2066_v50 = vld [vmem:[%s2237_s6 + $0x1f0] sm:$0xff]  ;;  %v2057_v53 = vld [vmem:[%s2237_s6 + $0x1a8] sm:$0xff]  ;;  %v2056_v57 = vld [vmem:[%s2237_s6 + $0x1a0] sm:$0xff] }
  0x26   : > { %1274 = vmatpush.bf16.msra.mxu3 %v2032_v16  ;;  %v2065_v54 = vld [vmem:[%s2237_s6 + $0x1e8] sm:$0xff]  ;;  %v2064_v58 = vld [vmem:[%s2237_s6 + $0x1e0] sm:$0xff]  ;;  %v2039_v59 = vld [vmem:[%s2237_s6 + $0x118] sm:$0xff] }
  0x27   : > { %1236 = vmatpush.bf16.msra.mxu0 %v2007_v17  ;;  %v2047_v60 = vld [vmem:[%s2237_s6 + $0x158] sm:$0xff]  ;;  %v2038_v63 = vld [vmem:[%s2237_s6 + $0x110] sm:$0xff]  ;;  %v2037_v3 = vld [vmem:[%s2237_s6 + $0x108] sm:$0xff] }
  0x28   : > { %1249 = vmatpush.bf16.msra.mxu1 %v2015_v18  ;;  %v2055_v61 = vld [vmem:[%s2237_s6 + $0x198] sm:$0xff]  ;;  %v2046_v0 = vld [vmem:[%s2237_s6 + $0x150] sm:$0xff]  ;;  %v2045_v4 = vld [vmem:[%s2237_s6 + $0x148] sm:$0xff] }
  0x29   : > { %1262 = vmatpush.bf16.msra.mxu2 %v2023_v19  ;;  %v2063_v62 = vld [vmem:[%s2237_s6 + $0x1d8] sm:$0xff]  ;;  %v2054_v1 = vld [vmem:[%s2237_s6 + $0x190] sm:$0xff]  ;;  %v2053_v5 = vld [vmem:[%s2237_s6 + $0x188] sm:$0xff] }
  0x2a   : > { %1275 = vmatpush.bf16.msra.mxu3 %v2031_v20  ;;  %v2062_v2 = vld [vmem:[%s2237_s6 + $0x1d0] sm:$0xff]  ;;  %v283_v6 = vld [vmem:[%s2232_s27 + $0x18] sm:$0xff]  ;;  %v2061_v8 = vld [vmem:[%s2237_s6 + $0x1c8] sm:$0xff] }
  0x2b   : > { %1237 = vmatpush.bf16.msra.mxu0 %v2006_v21  ;;  %v282_v7 = vld [vmem:[%s2232_s27 + $0x10] sm:$0xff]  ;;  %v2036_v9 = vld [vmem:[%s2237_s6 + $0x100] sm:$0xff]  ;;  %v524_v10 = vunpack.c.l.b16 %v283_v6  ;;  %v2075_v15 = vld [vmem:[%s2237_s6 + $0x238] sm:$0xff]  ;;  %v525_v19 = vunpack.c.h.b16 %v283_v6 }
  0x2c   : > { %1250 = vmatpush.bf16.msra.mxu1 %v2014_v22  ;;  %v2044_v11 = vld [vmem:[%s2237_s6 + $0x140] sm:$0xff]  ;;  %v522_v13 = vunpack.c.l.b16 %v282_v7  ;;  %v523_v14 = vunpack.c.h.b16 %v282_v7  ;;  %v2083_v16 = vld [vmem:[%s2237_s6 + $0x278] sm:$0xff]  ;;  %v2081_v30 = vld [vmem:[%s2237_s6 + $0x268] sm:$0xff] }
  0x2d   : > { %1263 = vmatpush.bf16.msra.mxu2 %v2022_v23  ;;  %v2052_v12 = vld [vmem:[%s2237_s6 + $0x180] sm:$0xff]  ;;  %v2091_v17 = vld [vmem:[%s2237_s6 + $0x2b8] sm:$0xff]  ;;  %v538_v21 = vpack.c.b16 %v524_v10, %v524_v10  ;;  %v539_v27 = vpack.c.b16 %v525_v19, %v525_v19  ;;  %v2089_v31 = vld [vmem:[%s2237_s6 + $0x2a8] sm:$0xff] }
  0x2e   : > { %1276 = vmatpush.bf16.msra.mxu3 %v2030_v24  ;;  %v2060_v18 = vld [vmem:[%s2237_s6 + $0x1c0] sm:$0xff]  ;;  %v2099_v20 = vld [vmem:[%s2237_s6 + $0x2f8] sm:$0xff]  ;;  %v536_v22 = vpack.c.b16 %v522_v13, %v522_v13  ;;  %v537_v23 = vpack.c.b16 %v523_v14, %v523_v14  ;;  %v2074_v24 = vld [vmem:[%s2237_s6 + $0x230] sm:$0xff] }
  0x2f   : > { %1238 = vmatpush.bf16.msra.mxu0 %v2005_v25  ;;  %v2082_v25 = vld [vmem:[%s2237_s6 + $0x270] sm:$0xff]  ;;  %v2080_v34 = vld [vmem:[%s2237_s6 + $0x260] sm:$0xff]  ;;  %v2071_v37 = vld [vmem:[%s2237_s6 + $0x218] sm:$0xff] }
  0x30   : > { %1251 = vmatpush.bf16.msra.mxu1 %v2013_v26  ;;  %v2090_v26 = vld [vmem:[%s2237_s6 + $0x2b0] sm:$0xff]  ;;  %v2112_v6 = vld [vmem:[%s2237_s6 + $0x360] sm:$0xff]  ;;  %v2103_v7 = vld [vmem:[%s2237_s6 + $0x318] sm:$0xff] }
  0x31   : > { %1264 = vmatpush.bf16.msra.mxu2 %v2021_v28  ;;  %v2098_v28 = vld [vmem:[%s2237_s6 + $0x2f0] sm:$0xff]  ;;  %v2109_v13 = vld [vmem:[%s2237_s6 + $0x348] sm:$0xff] }
  0x32   : > { %1277 = vmatpush.bf16.msra.mxu3 %v2029_v29  ;;  %v2073_v29 = vld [vmem:[%s2237_s6 + $0x228] sm:$0xff]  ;;  %v2078_v42 = vld [vmem:[%s2237_s6 + $0x250] sm:$0xff] }
  0x33   : > { %1239 = vmatpush.bf16.msra.mxu0 %v2004_v32  ;;  %v2097_v32 = vld [vmem:[%s2237_s6 + $0x2e8] sm:$0xff]  ;;  %v2110_v10 = vld [vmem:[%s2237_s6 + $0x350] sm:$0xff] }
  0x34   : > { %1252 = vmatpush.bf16.msra.mxu1 %v2012_v33  ;;  %v2072_v33 = vld [vmem:[%s2237_s6 + $0x220] sm:$0xff] }
  0x35   : > { %1265 = vmatpush.bf16.msra.mxu2 %v2020_v35  ;;  %v2088_v35 = vld [vmem:[%s2237_s6 + $0x2a0] sm:$0xff] }
  0x36   : > { %1278 = vmatpush.bf16.msra.mxu3 %v2028_v40  ;;  %1240 = vmatmul.bf16.vlgmr.msra.gmra.mxu0 %v532_v41  ;;  %v2095_v40 = vld [vmem:[%s2237_s6 + $0x2d8] sm:$0xff]  ;;  %v2070_v41 = vld [vmem:[%s2237_s6 + $0x210] sm:$0xff] }
  0x37   : > { %1284 = vmatpush.bf16.msrb.mxu0 %v2043_v36  ;;  %1253 = vmatmul.bf16.vlgmr.msra.gmra.mxu1 %v533_v46  ;;  %v2096_v36 = vld [vmem:[%s2237_s6 + $0x2e0] sm:$0xff]  ;;  %v2077_v46 = vld [vmem:[%s2237_s6 + $0x248] sm:$0xff] }
  0x38   : > { %1297 = vmatpush.bf16.msrb.mxu1 %v2051_v38  ;;  %1266 = vmatmul.bf16.vlgmr.msra.gmra.mxu2 %v534_v44  ;;  %v2079_v38 = vld [vmem:[%s2237_s6 + $0x258] sm:$0xff]  ;;  %v2094_v44 = vld [vmem:[%s2237_s6 + $0x2d0] sm:$0xff] }
  0x39   : > { %1310 = vmatpush.bf16.msrb.mxu2 %v2059_v39  ;;  %1279 = vmatmul.bf16.vlgmr.msra.gmra.mxu3 %v535_v49  ;;  %v2087_v39 = vld [vmem:[%s2237_s6 + $0x298] sm:$0xff]  ;;  %v285_v49 = vld [vmem:[%s2232_s27 + $0x28] sm:$0xff] }
  0x3a   : > { %1323 = vmatpush.bf16.msrb.mxu3 %v2067_v43  ;;  %v2086_v43 = vld [vmem:[%s2237_s6 + $0x290] sm:$0xff] }
  0x3b   : > { %1285 = vmatpush.bf16.msrb.mxu0 %v2042_v45  ;;  %v2069_v45 = vld [vmem:[%s2237_s6 + $0x208] sm:$0xff] }
  0x3c   : > { %1298 = vmatpush.bf16.msrb.mxu1 %v2050_v47  ;;  %v284_v47 = vld [vmem:[%s2232_s27 + $0x20] sm:$0xff] }
  0x3d   : > { %1311 = vmatpush.bf16.msrb.mxu2 %v2058_v48  ;;  %v2085_v48 = vld [vmem:[%s2237_s6 + $0x288] sm:$0xff] }
  0x3e   : > { %1324 = vmatpush.bf16.msrb.mxu3 %v2066_v50  ;;  %v2093_v50 = vld [vmem:[%s2237_s6 + $0x2c8] sm:$0xff] }
  0x3f   : > { %1286 = vmatpush.bf16.msrb.mxu0 %v2041_v51  ;;  %v526_v51 = vunpack.c.l.b16 %v284_v47 }
  0x40   : > { %1299 = vmatpush.bf16.msrb.mxu1 %v2049_v52  ;;  %v527_v52 = vunpack.c.h.b16 %v284_v47 }
  0x41   : > { %1312 = vmatpush.bf16.msrb.mxu2 %v2057_v53  ;;  %v2068_v53 = vld [vmem:[%s2237_s6 + $0x200] sm:$0xff] }
  0x42   : > { %1325 = vmatpush.bf16.msrb.mxu3 %v2065_v54  ;;  %v2076_v54 = vld [vmem:[%s2237_s6 + $0x240] sm:$0xff] }
  0x43   : > { %1287 = vmatpush.bf16.msrb.mxu0 %v2040_v55  ;;  %v528_v55 = vunpack.c.l.b16 %v285_v49 }
  0x44   : > { %1300 = vmatpush.bf16.msrb.mxu1 %v2048_v56  ;;  %v2084_v56 = vld [vmem:[%s2237_s6 + $0x280] sm:$0xff] }
  0x45   : > { %1313 = vmatpush.bf16.msrb.mxu2 %v2056_v57  ;;  %v2107_v57 = vld [vmem:[%s2237_s6 + $0x338] sm:$0xff] }
  0x46   : > { %1326 = vmatpush.bf16.msrb.mxu3 %v2064_v58  ;;  %v529_v58 = vunpack.c.h.b16 %v285_v49 }
  0x47   : > { %1288 = vmatpush.bf16.msrb.mxu0 %v2039_v59  ;;  %v2115_v59 = vld [vmem:[%s2237_s6 + $0x378] sm:$0xff] }
  0x48   : > { %1301 = vmatpush.bf16.msrb.mxu1 %v2047_v60  ;;  %v2092_v60 = vld [vmem:[%s2237_s6 + $0x2c0] sm:$0xff] }
  0x49   : > { %1314 = vmatpush.bf16.msrb.mxu2 %v2055_v61  ;;  %v540_v61 = vpack.c.b16 %v526_v51, %v526_v51 }
  0x4a   : > { %1327 = vmatpush.bf16.msrb.mxu3 %v2063_v62  ;;  %v541_v62 = vpack.c.b16 %v527_v52, %v527_v52 }
  0x4b   : > { %1289 = vmatpush.bf16.msrb.mxu0 %v2038_v63  ;;  %v542_v63 = vpack.c.b16 %v528_v55, %v528_v55 }
  0x4c   : > { %1302 = vmatpush.bf16.msrb.mxu1 %v2046_v0  ;;  %v543_v0 = vpack.c.b16 %v529_v58, %v529_v58  ;;  %v279_v58 = vld [vmem:[#allocation2] sm:$0xff] }
  0x4d   : > { %1315 = vmatpush.bf16.msrb.mxu2 %v2054_v1  ;;  %v2106_v1 = vld [vmem:[%s2237_s6 + $0x330] sm:$0xff] }
  0x4e   : > { %1328 = vmatpush.bf16.msrb.mxu3 %v2062_v2  ;;  %v2114_v2 = vld [vmem:[%s2237_s6 + $0x370] sm:$0xff] }
  0x4f   : > { %1290 = vmatpush.bf16.msrb.mxu0 %v2037_v3  ;;  %v2105_v3 = vld [vmem:[%s2237_s6 + $0x328] sm:$0xff] }
  0x50   : > { %1303 = vmatpush.bf16.msrb.mxu1 %v2045_v4  ;;  %v2113_v4 = vld [vmem:[%s2237_s6 + $0x368] sm:$0xff] }
  0x51   : > { %1316 = vmatpush.bf16.msrb.mxu2 %v2053_v5  ;;  %v2104_v5 = vld [vmem:[%s2237_s6 + $0x320] sm:$0xff] }
  0x52   : > { %1329 = vmatpush.bf16.msrb.mxu3 %v2061_v8  ;;  %v2111_v8 = vld [vmem:[%s2237_s6 + $0x358] sm:$0xff] }
  0x53   : > { %1291 = vmatpush.bf16.msrb.mxu0 %v2036_v9  ;;  %v2102_v9 = vld [vmem:[%s2237_s6 + $0x310] sm:$0xff] }
  0x54   : > { %1304 = vmatpush.bf16.msrb.mxu1 %v2044_v11  ;;  %v2101_v11 = vld [vmem:[%s2237_s6 + $0x308] sm:$0xff] }
  0x55   : > { %1317 = vmatpush.bf16.msrb.mxu2 %v2052_v12  ;;  %v286_v12 = vld [vmem:[%s2232_s27 + $0x30] sm:$0xff] }
  0x56   : > { %1330 = vmatpush.bf16.msrb.mxu3 %v2060_v18  ;;  %1292 = vmatmul.bf16.vlgmr.msrb.gmra.mxu0 %v536_v22  ;;  %v530_v14 = vunpack.c.l.b16 %v286_v12 }
  0x57   : > { %1336 = vmatpush.bf16.msra.mxu0 %v2075_v15  ;;  %1305 = vmatmul.bf16.vlgmr.msrb.gmra.mxu1 %v537_v23  ;;  %v2100_v15 = vld [vmem:[%s2237_s6 + $0x300] sm:$0xff] }
  0x58   : > { %1349 = vmatpush.bf16.msra.mxu1 %v2083_v16  ;;  %1318 = vmatmul.bf16.vlgmr.msrb.gmra.mxu2 %v538_v21  ;;  %v531_v16 = vunpack.c.h.b16 %v286_v12  ;;  %v544_v18 = vpack.c.b16 %v530_v14, %v530_v14 }
  0x59   : > { %1362 = vmatpush.bf16.msra.mxu2 %v2091_v17  ;;  %1331 = vmatmul.bf16.vlgmr.msrb.gmra.mxu3 %v539_v27  ;;  %v2108_v17 = vld [vmem:[%s2237_s6 + $0x340] sm:$0xff] }
  0x5a   : > { %1375 = vmatpush.bf16.msra.mxu3 %v2099_v20  ;;  %v545_v19 = vpack.c.b16 %v531_v16, %v531_v16 }
  0x5b   : > { %1337 = vmatpush.bf16.msra.mxu0 %v2074_v24 }
  0x5c   : > { %1350 = vmatpush.bf16.msra.mxu1 %v2082_v25 }
  0x5d   : > { %1363 = vmatpush.bf16.msra.mxu2 %v2090_v26 }
  0x5e   : > { %1376 = vmatpush.bf16.msra.mxu3 %v2098_v28 }
  0x5f   : > { %1338 = vmatpush.bf16.msra.mxu0 %v2073_v29 }
  0x60   : > { %1351 = vmatpush.bf16.msra.mxu1 %v2081_v30 }
  0x61   : > { %1364 = vmatpush.bf16.msra.mxu2 %v2089_v31 }
  0x62   : > { %1377 = vmatpush.bf16.msra.mxu3 %v2097_v32 }
  0x63   : > { %1339 = vmatpush.bf16.msra.mxu0 %v2072_v33 }
  0x64   : > { %1352 = vmatpush.bf16.msra.mxu1 %v2080_v34 }
  0x65   : > { %1365 = vmatpush.bf16.msra.mxu2 %v2088_v35 }
  0x66   : > { %1378 = vmatpush.bf16.msra.mxu3 %v2096_v36 }
  0x67   : > { %1340 = vmatpush.bf16.msra.mxu0 %v2071_v37 }
  0x68   : > { %1353 = vmatpush.bf16.msra.mxu1 %v2079_v38 }
  0x69   : > { %1366 = vmatpush.bf16.msra.mxu2 %v2087_v39 }
  0x6a   : > { %1379 = vmatpush.bf16.msra.mxu3 %v2095_v40 }
  0x6b   : > { %1341 = vmatpush.bf16.msra.mxu0 %v2070_v41 }
  0x6c   : > { %1354 = vmatpush.bf16.msra.mxu1 %v2078_v42 }
  0x6d   : > { %1367 = vmatpush.bf16.msra.mxu2 %v2086_v43 }
  0x6e   : > { %1380 = vmatpush.bf16.msra.mxu3 %v2094_v44 }
  0x6f   : > { %1342 = vmatpush.bf16.msra.mxu0 %v2069_v45 }
  0x70   : > { %1355 = vmatpush.bf16.msra.mxu1 %v2077_v46 }
  0x71   : > { %1368 = vmatpush.bf16.msra.mxu2 %v2085_v48 }
  0x72   : > { %1381 = vmatpush.bf16.msra.mxu3 %v2093_v50 }
  0x73   : > { %1343 = vmatpush.bf16.msra.mxu0 %v2068_v53 }
  0x74   : > { %1356 = vmatpush.bf16.msra.mxu1 %v2076_v54 }
  0x75   : > { %1369 = vmatpush.bf16.msra.mxu2 %v2084_v56 }
  0x76   : > { %1382 = vmatpush.bf16.msra.mxu3 %v2092_v60  ;;  %1344 = vmatmul.bf16.vlgmr.msra.gmra.mxu0 %v540_v61 }
  0x77   : > { %1388 = vmatpush.bf16.msrb.mxu0 %v2107_v57  ;;  %1357 = vmatmul.bf16.vlgmr.msra.gmra.mxu1 %v541_v62 }
  0x78   : > { %1401 = vmatpush.bf16.msrb.mxu1 %v2115_v59  ;;  %1370 = vmatmul.bf16.vlgmr.msra.gmra.mxu2 %v542_v63 }
  0x79   : > { %1383 = vmatmul.bf16.vlgmr.msra.gmra.mxu3 %v543_v0 }
  0x7b   : > { %1389 = vmatpush.bf16.msrb.mxu0 %v2106_v1 }
  0x7c   : > { %1402 = vmatpush.bf16.msrb.mxu1 %v2114_v2 }
  0x7f   : > { %1390 = vmatpush.bf16.msrb.mxu0 %v2105_v3 }
  0x80   : > { %1403 = vmatpush.bf16.msrb.mxu1 %v2113_v4 }
  0x83   : > { %1391 = vmatpush.bf16.msrb.mxu0 %v2104_v5 }
  0x84   : > { %1404 = vmatpush.bf16.msrb.mxu1 %v2112_v6 }
  0x87   : > { %1392 = vmatpush.bf16.msrb.mxu0 %v2103_v7 }
  0x88   : > { %1405 = vmatpush.bf16.msrb.mxu1 %v2111_v8 }
  0x8b   : > { %1393 = vmatpush.bf16.msrb.mxu0 %v2102_v9 }
  0x8c   : > { %1406 = vmatpush.bf16.msrb.mxu1 %v2110_v10 }
  0x8f   : > { %1394 = vmatpush.bf16.msrb.mxu0 %v2101_v11 }
  0x90   : > { %1407 = vmatpush.bf16.msrb.mxu1 %v2109_v13 }
  0x93   : > { %1395 = vmatpush.bf16.msrb.mxu0 %v2100_v15 }
  0x94   : > { %1408 = vmatpush.bf16.msrb.mxu1 %v2108_v17 }
  0x96   : > { %1396 = vmatmul.bf16.vlgmr.msrb.gmra.mxu0 %v544_v18 }
  0x97   : > { %1409 = vmatmul.bf16.vlgmr.msrb.gmra.mxu1 %v545_v19 }
  0xb3   : > { %v1241_v20 = vpop.f32.mrf.mxu0 }
  0xb4   : > { %v1254_v21 = vpop.f32.mrf.mxu1 }
  0xb5   : > { %v1255_v22 = vadd.f32 %v1254_v21, %v1241_v20 }
  0xbb   : > { %v1267_v23 = vpop.f32.mrf.mxu2  ;;  %v1243_v24 = vpop.f32.mrf.mxu0 }
  0xbc   : > { %v1280_v25 = vpop.f32.mrf.mxu3  ;;  %v1256_v26 = vpop.f32.mrf.mxu1  ;;  %v1268_v37 = vadd.f32 %v1267_v23, %v1255_v22 }
  0xbe   : > { %v1281_v38 = vadd.f32 %v1280_v25, %v1268_v37 }
  0xc3   : > { %v1269_v27 = vpop.f32.mrf.mxu2 }
  0xc4   : > { %v1282_v28 = vpop.f32.mrf.mxu3 }
  0xd3   : > { %v1293_v29 = vpop.f32.mrf.mxu0 }
  0xd4   : > { %v1306_v30 = vpop.f32.mrf.mxu1  ;;  %v1294_v41 = vadd.f32 %v1293_v29, %v1281_v38 }
  0xd6   : > { %v1307_v43 = vadd.f32 %v1306_v30, %v1294_v41 }
  0xdb   : > { %v1319_v31 = vpop.f32.mrf.mxu2  ;;  %v1295_v33 = vpop.f32.mrf.mxu0 }
  0xdc   : > { %v1332_v32 = vpop.f32.mrf.mxu3  ;;  %v1308_v34 = vpop.f32.mrf.mxu1  ;;  %v1320_v47 = vadd.f32 %v1319_v31, %v1307_v43 }
  0xde   : > { %v1333_v49 = vadd.f32 %v1332_v32, %v1320_v47 }
  0xe3   : > { %v1321_v35 = vpop.f32.mrf.mxu2 }
  0xe4   : > { %v1334_v36 = vpop.f32.mrf.mxu3 }
  0xf3   : > { %v1345_v39 = vpop.f32.mrf.mxu0 }
  0xf4   : > { %v1358_v40 = vpop.f32.mrf.mxu1  ;;  %v1346_v51 = vadd.f32 %v1345_v39, %v1333_v49 }
  0xf6   : > { %v1359_v52 = vadd.f32 %v1358_v40, %v1346_v51 }
  0xfb   : > { %v1371_v42 = vpop.f32.mrf.mxu2  ;;  %v1347_v45 = vpop.f32.mrf.mxu0 }
  0xfc   : > { %v1384_v44 = vpop.f32.mrf.mxu3  ;;  %v1360_v46 = vpop.f32.mrf.mxu1  ;;  %v1372_v53 = vadd.f32 %v1371_v42, %v1359_v52 }
  0xfe   : > { %v1385_v54 = vadd.f32 %v1384_v44, %v1372_v53 }
 0x103   : > { %v1373_v48 = vpop.f32.mrf.mxu2 }
 0x104   : > { %v1386_v50 = vpop.f32.mrf.mxu3 }
 0x113   : > { %v1397_v55 = vpop.f32.mrf.mxu0 }
 0x114   : > { %v1398_v56 = vadd.f32 %v1397_v55, %v1385_v54  ;;  %v1410_v57 = vpop.f32.mrf.mxu1 }
 0x116   : > { %v1411_v59 = vadd.f32 %v1410_v57, %v1398_v56 }
 0x118   : > { %v1414_v60 = vadd.f32 %v1411_v59, %v279_v58  ;;  %1420 = sbr.rel (%p2000_p7) target bundleno = 568 (0x238), region = 48 }
 0x11a   : > { %1416 = vst.msk [vmem:[#allocation2] sm:$0xff] %vm1415_vm1, %v1414_v60 }
 0x11b   : > { %v1399_v61 = vpop.f32.mrf.mxu0 }
 0x11c   : > { %v1412_v62 = vpop.f32.mrf.mxu1 }
 0x11d   : > { %v2142_v0 = vld [vmem:[%s2387_s2] ss:$0 sm:$0xff]  ;;  %v2176_v3 = vmov 32.0  }
 0x11e   : > { %2145 = vrcp.f32 %v2176_v3  ;;  %v2143_v24 = vld [vmem:[%s2388_s3] ss:$0 sm:$0xff] }
 0x11f   : > { %v2144_v26 = vld [vmem:[%s2389_s4] ss:$0 sm:$0xff] }
 0x121   : > { %v1421_v63 = vld [vmem:[#allocation2] sm:$0xff] }
 0x122   : > { %v1426_v1 = vadd.f32 %v2142_v0, %v1421_v63 }
 0x124   : > { %v1427_v2 = vsel %vm1415_vm1, %v1426_v1, 0.0  ;;  %v2146_v4 = vpop.eup %2145 }
 0x125   : > { %1428 = vadd.xlane.f32.xlu0 %v1427_v2  ;;  %v1431_v5 = vmul.f32 32.0, %v2146_v4  ;;  %vm1435_vm2 = vweird.f32 %v2146_v4 }
 0x127   : > { %v1432_v6 = vsub.f32 1.0, %v1431_v5 }
 0x129   : > { %v1433_v7 = vmul.f32 %v2146_v4, %v1432_v6 }
 0x12b   : > { %v1434_v8 = vadd.f32 %v2146_v4, %v1433_v7 }
 0x12d   : > { %v1436_v9 = vsel %vm1435_vm2, %v2146_v4, %v1434_v8 }
 0x198   : > { %v1429_v10 = vpop.xlane.xlu0 %1428 }
 0x199   : > { %v1437_v11 = vmul.f32 %v1436_v9, %v1429_v10 }
 0x19b   : > { %v1438_v12 = vsub.f32 %v1426_v1, %v1437_v11 }
 0x19d   : > { %v1439_v13 = vmul.f32 %v1438_v12, %v1438_v12 }
 0x19f   : > { %v1440_v14 = vsel %vm1415_vm1, %v1439_v13, 0.0 }
 0x1a0   : > { %1441 = vadd.xlane.f32.xlu0 %v1440_v14 }
 0x213   : > { %v1442_v15 = vpop.xlane.xlu0 %1441 }
 0x214   : > { %v1443_v16 = vmul.f32 %v1442_v15, %v1436_v9 }
 0x216   : > { %v1444_v17 = vadd.f32 1e-05, %v1443_v16 }
 0x218   : > { %2147 = vrsqrt.f32 %v1444_v17  ;;  %vm1451_vm4 = vweird.f32 %v1444_v17 }
 0x21e   : > { %v2148_v18 = vpop.eup %2147 }
 0x21f   : > { %v1446_v19 = vmul.f32 %v2148_v18, %v1444_v17  ;;  %vm1452_vm3 = vweird.f32 %v2148_v18 }
 0x220   : > { %vm1453_vm5 = vmor %vm1451_vm4, %vm1452_vm3 }
 0x221   : > { %v1447_v20 = vmul.f32 %v2148_v18, %v1446_v19 }
 0x223   : > { %v1448_v21 = vmul.f32 0.5, %v1447_v20 }
 0x225   : > { %v1449_v22 = vsub.f32 1.5, %v1448_v21 }
 0x227   : > { %v1450_v23 = vmul.f32 %v2148_v18, %v1449_v22 }
 0x229   : > { %v1454_v25 = vsel %vm1453_vm5, %v2148_v18, %v1450_v23 }
 0x22a   : > { %v1455_v27 = vmul.f32 %v1454_v25, %v1438_v12 }
 0x22c   : > { %v1460_v28 = vmul.f32 %v2143_v24, %v1455_v27 }
 0x22e   : > { %v1465_v29 = vadd.f32 %v2144_v26, %v1460_v28 }
 0x230   : > { %2149 = vtanh.f32 %v1465_v29 }
 0x236   : > { %v2150_v30 = vpop.eup %2149 }
 0x237   : > { %1467 = vst.msk [vmem:[%s2390_s5] sm:$0xff] %vm1415_vm1, %v2150_v30 }
 0x238 PF: > { %s15_s20 = sadd.s32 1, %s2173_s20   ;;  %s2391_s18 = smov %s2169_s19 }
 0x239   : > { %p12_p8 = scmp.ge.s32.totalorder %s15_s20, 5   ;;  %s2392_s19 = smov %s2394_s21 }
 0x23b   :  { %14 = sbr.rel (!%p12_p8) target bundleno = 2 (0x2), region = 81 }

</bundles_post_ra>
